<compile_context>
chip_gen: v6e
topology: v6e:2x2x1
jax: 0.10.0
libtpu: 0.0.40
codegen_flags: <defaults>
</compile_context>

<pallas_src>
import functools

import jax
import jax.numpy as jnp
from jax import lax
from jax.experimental import pallas as pl
from jax.experimental.pallas import tpu as pltpu


# Channel constants from the module spec.
_C_POOL, _C_1x1, _C_MID, _C_BR = 24, 16, 16, 24
_C_FIRST = _C_POOL + _C_1x1 + _C_MID + _C_MID      # 72 fused 1x1 outputs
_C_OUT = _C_POOL + _C_1x1 + _C_BR + _C_BR          # 88 output channels


# ---------------------------------------------------------------------------
# Fused Inception kernel (one grid step == one image)
#
# Flat layout: the image is vertically zero-padded by 2 rows and flattened
# row-major to MP = (H+4)*W "positions"; every buffer is (channels, lanes) and
# covers a contiguous position range [start, start+width) so that a conv tap is
# just a static lane slice.  Horizontal zero padding is emulated by per-tap
# column masks (reads that would cross a row boundary are zeroed).
# ---------------------------------------------------------------------------
def _inception_kernel(x_ref, m_ref, wf_ref, bf_ref, w5_ref, b5_ref,
                      w3a_ref, b3a_ref, w3b_ref, b3b_ref, o_ref, *, H, W):
    f32 = jnp.float32
    MP = (H + 4) * W                   # vertically padded flat grid
    SX, WX = -4 * W, MP + 8 * W        # x buffer coverage [SX, SX+WX)
    S1, W1 = -2 * W, MP + 4 * W        # stage-1 coverage (pool / fused 1x1 out)
    S2, W2 = 0, MP                     # mid (3x3a output) coverage
    SF, WF = 2 * W, H * W              # final/interior coverage (lane-dense)

    xv = x_ref[...]                    # (C, WX), zeros outside the true image
    masks = m_ref[...]                 # (6, W1): rows 0..4 col masks d=-2..+2,
                                       #          row 5 interior-row mask

    def pieces(src, src_start, out_start, out_w, ksz, pad):
        """One masked, shifted window of `src` per conv tap.

        piece[dy*ksz+dx][:, c] == src value at flat position
        (out_start + c) + (dy-pad)*W + (dx-pad), zeroed whenever the horizontal
        offset leaves the image row (emulating zero padding in W)."""
        out = []
        for dy in range(ksz):
            for dx in range(ksz):
                off = out_start + (dy - pad) * W + (dx - pad) - src_start
                p = src[:, off:off + out_w]
                d = dx - pad
                if d != 0:
                    p = p * masks[d + 2:d + 3, :out_w]
                out.append(p)
        return out

    # ---- avg_pool2d(3, stride=1, pad=1, count_include_pad=True) -------------
    pool_taps = pieces(xv, SX, S1, W1, 3, 1)
    pool = pool_taps[0]
    for p in pool_taps[1:]:
        pool = pool + p
    pool = pool * (1.0 / 9.0)                                    # (C, W1)

    # ---- all four first-stage 1x1 convs fused into ONE matmul ---------------
    lhs = jnp.concatenate([xv[:, S1 - SX:S1 - SX + W1], pool], axis=0)  # (2C, W1)
    firstb = (jnp.dot(wf_ref[...], lhs, preferred_element_type=f32)
              + bf_ref[...])                                     # (72, W1)
    # row sections: [pool 0:24 | 1x1 24:40 | 5x5-in 40:56 | 3x3-in 56:72]

    rm1 = masks[5:6, :W1]              # zero everything outside true image rows
    t5 = firstb[40:56, :] * rm1        # (16, W1) zero-padded 5x5-branch input
    t3 = firstb[56:72, :] * rm1        # (16, W1) zero-padded 3x3-branch input

    # ---- branch 5x5: 25 taps fused along K into one matmul ------------------
    col5 = jnp.concatenate(pieces(t5, S1, SF, WF, 5, 2), axis=0)        # (400, WF)
    out5 = jnp.dot(w5_ref[...], col5, preferred_element_type=f32) + b5_ref[...]

    # ---- branch 3x3 -> 3x3 ---------------------------------------------------
    col3a = jnp.concatenate(pieces(t3, S1, S2, W2, 3, 1), axis=0)       # (144, W2)
    rm_mid = masks[5:6, S2 - S1:S2 - S1 + W2]
    mid = (jnp.dot(w3a_ref[...], col3a, preferred_element_type=f32)
           + b3a_ref[...]) * rm_mid                                     # (24, W2)
    col3b = jnp.concatenate(pieces(mid, S2, SF, WF, 3, 1), axis=0)      # (216, WF)
    out3 = jnp.dot(w3b_ref[...], col3b, preferred_element_type=f32) + b3b_ref[...]

    # ---- store: channels in sublanes, H*W lane-dense => NCHW flat ------------
    c0, c1, c2 = _C_POOL, _C_POOL + _C_1x1, _C_POOL + _C_1x1 + _C_BR
    o_ref[0:c0, :] = firstb[0:c0, SF - S1:SF - S1 + WF]          # branch_pool
    o_ref[c0:c1, :] = firstb[c0:c1, SF - S1:SF - S1 + WF]        # branch_1x1
    o_ref[c1:c2, :] = out5                                       # branch_5x5
    o_ref[c2:_C_OUT, :] = out3                                   # branch_3x3


# ---------------------------------------------------------------------------
# Wrapper: NCHW boundary, weight packing, pallas_call
# ---------------------------------------------------------------------------
def inception_forward(x_nchw, params):
    n, c, h, w = x_nchw.shape
    MP = (h + 4) * w
    WX = MP + 8 * w
    W1 = MP + 4 * w

    x = x_nchw.astype(jnp.float32)
    # vertical zero pad (2 rows each side) -> flatten -> lane margins (garbage
    # margins would also be fine: every margin read is column-masked).
    xflat = jnp.pad(x, ((0, 0), (0, 0), (2, 2), (0, 0))).reshape(n, c, MP)
    xflat = jnp.pad(xflat, ((0, 0), (0, 0), (4 * w, 4 * w)))     # (n, c, WX)

    # Masks (all conv output coverages start at positions ≡ 0 mod W, so one
    # phase-0 master per horizontal offset suffices; prefixes are sliced off).
    cols = jnp.arange(W1)
    j = cols % w
    cms = [((j + d >= 0) & (j + d < w)).astype(jnp.float32)
           for d in (-2, -1, 0, 1, 2)]
    pos = cols - 2 * w                                           # stage-1 positions
    rm = ((pos >= 2 * w) & (pos < (2 + h) * w)).astype(jnp.float32)
    masks = jnp.stack(cms + [rm], axis=0)                        # (6, W1)

    def w1x1(wo):                       # OIHW (o, c, 1, 1) -> (o, c)
        return wo[:, :, 0, 0]

    def wkxk(wo):                       # OIHW -> (o, kh*kw*cin), tap-major
        o, i, kh, kw = wo.shape
        return jnp.transpose(wo, (0, 2, 3, 1)).reshape(o, kh * kw * i)

    # Fused first-stage 1x1 weights: cols 0:C act on x, cols C:2C on pooled x.
    wf = jnp.zeros((_C_FIRST, 2 * c), jnp.float32)
    wf = wf.at[0:24, c:2 * c].set(w1x1(params["pool_w"]))
    wf = wf.at[24:40, 0:c].set(w1x1(params["b1_w"]))
    wf = wf.at[40:56, 0:c].set(w1x1(params["b5_1_w"]))
    wf = wf.at[56:72, 0:c].set(w1x1(params["b3_1_w"]))
    bf = jnp.concatenate([params["pool_b"], params["b1_b"],
                          params["b5_1_b"], params["b3_1_b"]])[:, None]

    w5f, b5 = wkxk(params["b5_2_w"]), params["b5_2_b"][:, None]
    w3af, b3a = wkxk(params["b3_2_w"]), params["b3_2_b"][:, None]
    w3bf, b3b = wkxk(params["b3_3_w"]), params["b3_3_b"][:, None]

    kern = functools.partial(_inception_kernel, H=h, W=w)
    out = pl.pallas_call(
        kern,
        out_shape=jax.ShapeDtypeStruct((n, _C_OUT, h * w), jnp.float32),
        grid=(n,),
        in_specs=[
            pl.BlockSpec((None, c, WX), lambda i: (i, 0, 0)),
            pl.BlockSpec((6, W1), lambda i: (0, 0)),
            pl.BlockSpec((_C_FIRST, 2 * c), lambda i: (0, 0)),
            pl.BlockSpec((_C_FIRST, 1), lambda i: (0, 0)),
            pl.BlockSpec((_C_BR, 25 * _C_MID), lambda i: (0, 0)),
            pl.BlockSpec((_C_BR, 1), lambda i: (0, 0)),
            pl.BlockSpec((_C_BR, 9 * _C_MID), lambda i: (0, 0)),
            pl.BlockSpec((_C_BR, 1), lambda i: (0, 0)),
            pl.BlockSpec((_C_BR, 9 * _C_BR), lambda i: (0, 0)),
            pl.BlockSpec((_C_BR, 1), lambda i: (0, 0)),
        ],
        out_specs=pl.BlockSpec((None, _C_OUT, h * w), lambda i: (i, 0, 0)),
        compiler_params=pltpu.CompilerParams(
            dimension_semantics=("parallel",)),
    )(xflat, masks, wf, bf, w5f, b5, w3af, b3a, w3bf, b3b)

    # (N, 88, H*W) is already NCHW flat — a free reshape, no transpose, no slice.
    return out.reshape(n, _C_OUT, h, w)


# ---------------------------------------------------------------------------
# Pure-JAX reference (correctness check)
# ---------------------------------------------------------------------------
def _conv_ref(x_nchw, w_oihw, bias, k):
    p = k // 2
    out = lax.conv_general_dilated(
        x_nchw, w_oihw, window_strides=(1, 1), padding=[(p, p), (p, p)],
        dimension_numbers=("NCHW", "OIHW", "NCHW"))
    return out + bias[None, :, None, None]


def inception_ref(x_nchw, params):
    pooled = lax.reduce_window(
        x_nchw, 0.0, lax.add, (1, 1, 3, 3), (1, 1, 1, 1),
        [(0, 0), (0, 0), (1, 1), (1, 1)]) / 9.0
    pool = _conv_ref(pooled, params["pool_w"], params["pool_b"], 1)
    b1 = _conv_ref(x_nchw, params["b1_w"], params["b1_b"], 1)
    b5 = _conv_ref(x_nchw, params["b5_1_w"], params["b5_1_b"], 1)
    b5 = _conv_ref(b5, params["b5_2_w"], params["b5_2_b"], 5)
    b3 = _conv_ref(x_nchw, params["b3_1_w"], params["b3_1_b"], 1)
    b3 = _conv_ref(b3, params["b3_2_w"], params["b3_2_b"], 3)
    b3 = _conv_ref(b3, params["b3_3_w"], params["b3_3_b"], 3)
    return jnp.concatenate([pool, b1, b5, b3], axis=1)


# ---------------------------------------------------------------------------
# Deterministic parameter init (shapes from the PyTorch __init__)
# ---------------------------------------------------------------------------
def init_params(key, in_channels):
    def conv_init(k, cout, cin, ksz):
        kw, kb = jax.random.split(k)
        fan_in = cin * ksz * ksz
        scale = 1.0 / jnp.sqrt(jnp.float32(fan_in))
        wgt = jax.random.uniform(kw, (cout, cin, ksz, ksz), jnp.float32,
                                 -scale, scale)
        b = jax.random.uniform(kb, (cout,), jnp.float32, -scale, scale)
        return wgt, b

    keys = jax.random.split(key, 7)
    params = {}
    params["pool_w"], params["pool_b"] = conv_init(keys[0], 24, in_channels, 1)
    params["b1_w"], params["b1_b"] = conv_init(keys[1], 16, in_channels, 1)
    params["b5_1_w"], params["b5_1_b"] = conv_init(keys[2], 16, in_channels, 1)
    params["b5_2_w"], params["b5_2_b"] = conv_init(keys[3], 24, 16, 5)
    params["b3_1_w"], params["b3_1_b"] = conv_init(keys[4], 16, in_channels, 1)
    params["b3_2_w"], params["b3_2_b"] = conv_init(keys[5], 24, 16, 3)
    params["b3_3_w"], params["b3_3_b"] = conv_init(keys[6], 24, 24, 3)
    return params


# ---------------------------------------------------------------------------
if __name__ == "__main__":
    key = jax.random.PRNGKey(0)
    k_x, k_p = jax.random.split(key)

    N, C, H, W = 2, 4, 16, 16
    x = jax.random.normal(k_x, (N, C, H, W), jnp.float32)
    params = init_params(k_p, C)

    fwd = jax.jit(inception_forward)
    out = jax.block_until_ready(fwd(x, params))
    assert out.shape == (N, 88, H, W), out.shape

    ref = jax.block_until_ready(inception_ref(x, params))
    max_err = float(jnp.max(jnp.abs(out - ref)))
    if max_err > 2e-3:
        raise AssertionError(f"mismatch vs reference, max abs err = {max_err}")

    print("KERNEL_OK")
</pallas_src>

<mosaic_0001>
module attributes {stable_mosaic.version = 11 : i64} {
  func.func @_inception_kernel(%arg0: i32, %arg1: memref<1x4x448xf32, #tpu.memory_space<vmem>>, %arg2: memref<6x384xf32, #tpu.memory_space<vmem>>, %arg3: memref<72x8xf32, #tpu.memory_space<vmem>>, %arg4: memref<72x1xf32, #tpu.memory_space<vmem>>, %arg5: memref<24x400xf32, #tpu.memory_space<vmem>>, %arg6: memref<24x1xf32, #tpu.memory_space<vmem>>, %arg7: memref<24x144xf32, #tpu.memory_space<vmem>>, %arg8: memref<24x1xf32, #tpu.memory_space<vmem>>, %arg9: memref<24x216xf32, #tpu.memory_space<vmem>>, %arg10: memref<24x1xf32, #tpu.memory_space<vmem>>, %arg11: memref<1x88x256xf32, #tpu.memory_space<vmem>>) attributes {dimension_semantics = [#tpu.dimension_semantics<parallel>], iteration_bounds = array<i64: 2>, scalar_prefetch = 0 : i64, scratch_operands = 0 : i64, tpu.core_type = #tpu.core_type<tc>, window_params = [{transform_indices = @transform_0, window_bounds = array<i64: 1, 4, 448>}, {pipeline_mode = #tpu.pipeline_mode<synchronous>, transform_indices = @transform_1, window_bounds = array<i64: 6, 384>}, {pipeline_mode = #tpu.pipeline_mode<synchronous>, transform_indices = @transform_2, window_bounds = array<i64: 72, 8>}, {pipeline_mode = #tpu.pipeline_mode<synchronous>, transform_indices = @transform_3, window_bounds = array<i64: 72, 1>}, {pipeline_mode = #tpu.pipeline_mode<synchronous>, transform_indices = @transform_4, window_bounds = array<i64: 24, 400>}, {pipeline_mode = #tpu.pipeline_mode<synchronous>, transform_indices = @transform_5, window_bounds = array<i64: 24, 1>}, {pipeline_mode = #tpu.pipeline_mode<synchronous>, transform_indices = @transform_6, window_bounds = array<i64: 24, 144>}, {pipeline_mode = #tpu.pipeline_mode<synchronous>, transform_indices = @transform_7, window_bounds = array<i64: 24, 1>}, {pipeline_mode = #tpu.pipeline_mode<synchronous>, transform_indices = @transform_8, window_bounds = array<i64: 24, 216>}, {pipeline_mode = #tpu.pipeline_mode<synchronous>, transform_indices = @transform_9, window_bounds = array<i64: 24, 1>}, {transform_indices = @transform_10, window_bounds = array<i64: 1, 88, 256>}]} {
    %c0 = arith.constant 0 : index
    %c0_0 = arith.constant 0 : index
    %c0_1 = arith.constant 0 : index
    %0 = vector.load %arg1[%c0, %c0_0, %c0_1] : memref<1x4x448xf32, #tpu.memory_space<vmem>>, vector<1x4x448xf32>
    %1 = vector.shape_cast %0 : vector<1x4x448xf32> to vector<4x448xf32>
    %c0_2 = arith.constant 0 : index
    %c0_3 = arith.constant 0 : index
    %2 = vector.load %arg2[%c0_2, %c0_3] : memref<6x384xf32, #tpu.memory_space<vmem>>, vector<6x384xf32>
    %3 = vector.extract_strided_slice %1 {offsets = [0, 15], sizes = [4, 384], strides = [1, 1]} : vector<4x448xf32> to vector<4x384xf32>
    %4 = vector.extract_strided_slice %2 {offsets = [1, 0], sizes = [1, 384], strides = [1, 1]} : vector<6x384xf32> to vector<1x384xf32>
    %5 = vector.broadcast %4 : vector<1x384xf32> to vector<4x384xf32>
    %6 = arith.mulf %3, %5 : vector<4x384xf32>
    %7 = vector.extract_strided_slice %1 {offsets = [0, 16], sizes = [4, 384], strides = [1, 1]} : vector<4x448xf32> to vector<4x384xf32>
    %8 = vector.extract_strided_slice %1 {offsets = [0, 17], sizes = [4, 384], strides = [1, 1]} : vector<4x448xf32> to vector<4x384xf32>
    %9 = vector.extract_strided_slice %2 {offsets = [3, 0], sizes = [1, 384], strides = [1, 1]} : vector<6x384xf32> to vector<1x384xf32>
    %10 = vector.broadcast %9 : vector<1x384xf32> to vector<4x384xf32>
    %11 = arith.mulf %8, %10 : vector<4x384xf32>
    %12 = vector.extract_strided_slice %1 {offsets = [0, 31], sizes = [4, 384], strides = [1, 1]} : vector<4x448xf32> to vector<4x384xf32>
    %13 = vector.extract_strided_slice %2 {offsets = [1, 0], sizes = [1, 384], strides = [1, 1]} : vector<6x384xf32> to vector<1x384xf32>
    %14 = vector.broadcast %13 : vector<1x384xf32> to vector<4x384xf32>
    %15 = arith.mulf %12, %14 : vector<4x384xf32>
    %16 = vector.extract_strided_slice %1 {offsets = [0, 32], sizes = [4, 384], strides = [1, 1]} : vector<4x448xf32> to vector<4x384xf32>
    %17 = vector.extract_strided_slice %1 {offsets = [0, 33], sizes = [4, 384], strides = [1, 1]} : vector<4x448xf32> to vector<4x384xf32>
    %18 = vector.extract_strided_slice %2 {offsets = [3, 0], sizes = [1, 384], strides = [1, 1]} : vector<6x384xf32> to vector<1x384xf32>
    %19 = vector.broadcast %18 : vector<1x384xf32> to vector<4x384xf32>
    %20 = arith.mulf %17, %19 : vector<4x384xf32>
    %21 = vector.extract_strided_slice %1 {offsets = [0, 47], sizes = [4, 384], strides = [1, 1]} : vector<4x448xf32> to vector<4x384xf32>
    %22 = vector.extract_strided_slice %2 {offsets = [1, 0], sizes = [1, 384], strides = [1, 1]} : vector<6x384xf32> to vector<1x384xf32>
    %23 = vector.broadcast %22 : vector<1x384xf32> to vector<4x384xf32>
    %24 = arith.mulf %21, %23 : vector<4x384xf32>
    %25 = vector.extract_strided_slice %1 {offsets = [0, 48], sizes = [4, 384], strides = [1, 1]} : vector<4x448xf32> to vector<4x384xf32>
    %26 = vector.extract_strided_slice %1 {offsets = [0, 49], sizes = [4, 384], strides = [1, 1]} : vector<4x448xf32> to vector<4x384xf32>
    %27 = vector.extract_strided_slice %2 {offsets = [3, 0], sizes = [1, 384], strides = [1, 1]} : vector<6x384xf32> to vector<1x384xf32>
    %28 = vector.broadcast %27 : vector<1x384xf32> to vector<4x384xf32>
    %29 = arith.mulf %26, %28 : vector<4x384xf32>
    %30 = arith.addf %6, %7 : vector<4x384xf32>
    %31 = arith.addf %30, %11 : vector<4x384xf32>
    %32 = arith.addf %31, %15 : vector<4x384xf32>
    %33 = arith.addf %32, %16 : vector<4x384xf32>
    %34 = arith.addf %33, %20 : vector<4x384xf32>
    %35 = arith.addf %34, %24 : vector<4x384xf32>
    %36 = arith.addf %35, %25 : vector<4x384xf32>
    %37 = arith.addf %36, %29 : vector<4x384xf32>
    %cst = arith.constant 0.111111112 : f32
    %38 = vector.broadcast %cst : f32 to vector<4x384xf32>
    %39 = arith.mulf %37, %38 : vector<4x384xf32>
    %40 = vector.extract_strided_slice %1 {offsets = [0, 32], sizes = [4, 384], strides = [1, 1]} : vector<4x448xf32> to vector<4x384xf32>
    %41 = tpu.concatenate %40, %39 in 0 : vector<4x384xf32>, vector<4x384xf32> -> vector<8x384xf32>
    %c0_4 = arith.constant 0 : index
    %c0_5 = arith.constant 0 : index
    %42 = vector.load %arg3[%c0_4, %c0_5] : memref<72x8xf32, #tpu.memory_space<vmem>>, vector<72x8xf32>
    %cst_6 = arith.constant dense<0.000000e+00> : vector<72x384xf32>
    %43 = tpu.matmul %42, %41, %cst_6 {dimension_numbers = #tpu.dot_dimension_numbers<[1], [0], [0], [1], [0, 0, 1, 1], [], []>} : vector<72x8xf32>, vector<8x384xf32>, vector<72x384xf32> -> vector<72x384xf32>
    %c0_7 = arith.constant 0 : index
    %c0_8 = arith.constant 0 : index
    %44 = vector.load %arg4[%c0_7, %c0_8] : memref<72x1xf32, #tpu.memory_space<vmem>>, vector<72x1xf32>
    %45 = vector.broadcast %44 : vector<72x1xf32> to vector<72x384xf32>
    %46 = arith.addf %43, %45 : vector<72x384xf32>
    %47 = vector.extract_strided_slice %2 {offsets = [5, 0], sizes = [1, 384], strides = [1, 1]} : vector<6x384xf32> to vector<1x384xf32>
    %48 = vector.extract_strided_slice %46 {offsets = [40, 0], sizes = [16, 384], strides = [1, 1]} : vector<72x384xf32> to vector<16x384xf32>
    %49 = vector.broadcast %47 : vector<1x384xf32> to vector<16x384xf32>
    %50 = arith.mulf %48, %49 : vector<16x384xf32>
    %51 = vector.extract_strided_slice %46 {offsets = [56, 0], sizes = [16, 384], strides = [1, 1]} : vector<72x384xf32> to vector<16x384xf32>
    %52 = vector.broadcast %47 : vector<1x384xf32> to vector<16x384xf32>
    %53 = arith.mulf %51, %52 : vector<16x384xf32>
    %54 = vector.extract_strided_slice %50 {offsets = [0, 30], sizes = [16, 256], strides = [1, 1]} : vector<16x384xf32> to vector<16x256xf32>
    %55 = vector.extract_strided_slice %2 {offsets = [0, 0], sizes = [1, 256], strides = [1, 1]} : vector<6x384xf32> to vector<1x256xf32>
    %56 = vector.broadcast %55 : vector<1x256xf32> to vector<16x256xf32>
    %57 = arith.mulf %54, %56 : vector<16x256xf32>
    %58 = vector.extract_strided_slice %50 {offsets = [0, 31], sizes = [16, 256], strides = [1, 1]} : vector<16x384xf32> to vector<16x256xf32>
    %59 = vector.extract_strided_slice %2 {offsets = [1, 0], sizes = [1, 256], strides = [1, 1]} : vector<6x384xf32> to vector<1x256xf32>
    %60 = vector.broadcast %59 : vector<1x256xf32> to vector<16x256xf32>
    %61 = arith.mulf %58, %60 : vector<16x256xf32>
    %62 = vector.extract_strided_slice %50 {offsets = [0, 32], sizes = [16, 256], strides = [1, 1]} : vector<16x384xf32> to vector<16x256xf32>
    %63 = vector.extract_strided_slice %50 {offsets = [0, 33], sizes = [16, 256], strides = [1, 1]} : vector<16x384xf32> to vector<16x256xf32>
    %64 = vector.extract_strided_slice %2 {offsets = [3, 0], sizes = [1, 256], strides = [1, 1]} : vector<6x384xf32> to vector<1x256xf32>
    %65 = vector.broadcast %64 : vector<1x256xf32> to vector<16x256xf32>
    %66 = arith.mulf %63, %65 : vector<16x256xf32>
    %67 = vector.extract_strided_slice %50 {offsets = [0, 34], sizes = [16, 256], strides = [1, 1]} : vector<16x384xf32> to vector<16x256xf32>
    %68 = vector.extract_strided_slice %2 {offsets = [4, 0], sizes = [1, 256], strides = [1, 1]} : vector<6x384xf32> to vector<1x256xf32>
    %69 = vector.broadcast %68 : vector<1x256xf32> to vector<16x256xf32>
    %70 = arith.mulf %67, %69 : vector<16x256xf32>
    %71 = vector.extract_strided_slice %50 {offsets = [0, 46], sizes = [16, 256], strides = [1, 1]} : vector<16x384xf32> to vector<16x256xf32>
    %72 = vector.extract_strided_slice %2 {offsets = [0, 0], sizes = [1, 256], strides = [1, 1]} : vector<6x384xf32> to vector<1x256xf32>
    %73 = vector.broadcast %72 : vector<1x256xf32> to vector<16x256xf32>
    %74 = arith.mulf %71, %73 : vector<16x256xf32>
    %75 = vector.extract_strided_slice %50 {offsets = [0, 47], sizes = [16, 256], strides = [1, 1]} : vector<16x384xf32> to vector<16x256xf32>
    %76 = vector.extract_strided_slice %2 {offsets = [1, 0], sizes = [1, 256], strides = [1, 1]} : vector<6x384xf32> to vector<1x256xf32>
    %77 = vector.broadcast %76 : vector<1x256xf32> to vector<16x256xf32>
    %78 = arith.mulf %75, %77 : vector<16x256xf32>
    %79 = vector.extract_strided_slice %50 {offsets = [0, 48], sizes = [16, 256], strides = [1, 1]} : vector<16x384xf32> to vector<16x256xf32>
    %80 = vector.extract_strided_slice %50 {offsets = [0, 49], sizes = [16, 256], strides = [1, 1]} : vector<16x384xf32> to vector<16x256xf32>
    %81 = vector.extract_strided_slice %2 {offsets = [3, 0], sizes = [1, 256], strides = [1, 1]} : vector<6x384xf32> to vector<1x256xf32>
    %82 = vector.broadcast %81 : vector<1x256xf32> to vector<16x256xf32>
    %83 = arith.mulf %80, %82 : vector<16x256xf32>
    %84 = vector.extract_strided_slice %50 {offsets = [0, 50], sizes = [16, 256], strides = [1, 1]} : vector<16x384xf32> to vector<16x256xf32>
    %85 = vector.extract_strided_slice %2 {offsets = [4, 0], sizes = [1, 256], strides = [1, 1]} : vector<6x384xf32> to vector<1x256xf32>
    %86 = vector.broadcast %85 : vector<1x256xf32> to vector<16x256xf32>
    %87 = arith.mulf %84, %86 : vector<16x256xf32>
    %88 = vector.extract_strided_slice %50 {offsets = [0, 62], sizes = [16, 256], strides = [1, 1]} : vector<16x384xf32> to vector<16x256xf32>
    %89 = vector.extract_strided_slice %2 {offsets = [0, 0], sizes = [1, 256], strides = [1, 1]} : vector<6x384xf32> to vector<1x256xf32>
    %90 = vector.broadcast %89 : vector<1x256xf32> to vector<16x256xf32>
    %91 = arith.mulf %88, %90 : vector<16x256xf32>
    %92 = vector.extract_strided_slice %50 {offsets = [0, 63], sizes = [16, 256], strides = [1, 1]} : vector<16x384xf32> to vector<16x256xf32>
    %93 = vector.extract_strided_slice %2 {offsets = [1, 0], sizes = [1, 256], strides = [1, 1]} : vector<6x384xf32> to vector<1x256xf32>
    %94 = vector.broadcast %93 : vector<1x256xf32> to vector<16x256xf32>
    %95 = arith.mulf %92, %94 : vector<16x256xf32>
    %96 = vector.extract_strided_slice %50 {offsets = [0, 64], sizes = [16, 256], strides = [1, 1]} : vector<16x384xf32> to vector<16x256xf32>
    %97 = vector.extract_strided_slice %50 {offsets = [0, 65], sizes = [16, 256], strides = [1, 1]} : vector<16x384xf32> to vector<16x256xf32>
    %98 = vector.extract_strided_slice %2 {offsets = [3, 0], sizes = [1, 256], strides = [1, 1]} : vector<6x384xf32> to vector<1x256xf32>
    %99 = vector.broadcast %98 : vector<1x256xf32> to vector<16x256xf32>
    %100 = arith.mulf %97, %99 : vector<16x256xf32>
    %101 = vector.extract_strided_slice %50 {offsets = [0, 66], sizes = [16, 256], strides = [1, 1]} : vector<16x384xf32> to vector<16x256xf32>
    %102 = vector.extract_strided_slice %2 {offsets = [4, 0], sizes = [1, 256], strides = [1, 1]} : vector<6x384xf32> to vector<1x256xf32>
    %103 = vector.broadcast %102 : vector<1x256xf32> to vector<16x256xf32>
    %104 = arith.mulf %101, %103 : vector<16x256xf32>
    %105 = vector.extract_strided_slice %50 {offsets = [0, 78], sizes = [16, 256], strides = [1, 1]} : vector<16x384xf32> to vector<16x256xf32>
    %106 = vector.extract_strided_slice %2 {offsets = [0, 0], sizes = [1, 256], strides = [1, 1]} : vector<6x384xf32> to vector<1x256xf32>
    %107 = vector.broadcast %106 : vector<1x256xf32> to vector<16x256xf32>
    %108 = arith.mulf %105, %107 : vector<16x256xf32>
    %109 = vector.extract_strided_slice %50 {offsets = [0, 79], sizes = [16, 256], strides = [1, 1]} : vector<16x384xf32> to vector<16x256xf32>
    %110 = vector.extract_strided_slice %2 {offsets = [1, 0], sizes = [1, 256], strides = [1, 1]} : vector<6x384xf32> to vector<1x256xf32>
    %111 = vector.broadcast %110 : vector<1x256xf32> to vector<16x256xf32>
    %112 = arith.mulf %109, %111 : vector<16x256xf32>
    %113 = vector.extract_strided_slice %50 {offsets = [0, 80], sizes = [16, 256], strides = [1, 1]} : vector<16x384xf32> to vector<16x256xf32>
    %114 = vector.extract_strided_slice %50 {offsets = [0, 81], sizes = [16, 256], strides = [1, 1]} : vector<16x384xf32> to vector<16x256xf32>
    %115 = vector.extract_strided_slice %2 {offsets = [3, 0], sizes = [1, 256], strides = [1, 1]} : vector<6x384xf32> to vector<1x256xf32>
    %116 = vector.broadcast %115 : vector<1x256xf32> to vector<16x256xf32>
    %117 = arith.mulf %114, %116 : vector<16x256xf32>
    %118 = vector.extract_strided_slice %50 {offsets = [0, 82], sizes = [16, 256], strides = [1, 1]} : vector<16x384xf32> to vector<16x256xf32>
    %119 = vector.extract_strided_slice %2 {offsets = [4, 0], sizes = [1, 256], strides = [1, 1]} : vector<6x384xf32> to vector<1x256xf32>
    %120 = vector.broadcast %119 : vector<1x256xf32> to vector<16x256xf32>
    %121 = arith.mulf %118, %120 : vector<16x256xf32>
    %122 = vector.extract_strided_slice %50 {offsets = [0, 94], sizes = [16, 256], strides = [1, 1]} : vector<16x384xf32> to vector<16x256xf32>
    %123 = vector.extract_strided_slice %2 {offsets = [0, 0], sizes = [1, 256], strides = [1, 1]} : vector<6x384xf32> to vector<1x256xf32>
    %124 = vector.broadcast %123 : vector<1x256xf32> to vector<16x256xf32>
    %125 = arith.mulf %122, %124 : vector<16x256xf32>
    %126 = vector.extract_strided_slice %50 {offsets = [0, 95], sizes = [16, 256], strides = [1, 1]} : vector<16x384xf32> to vector<16x256xf32>
    %127 = vector.extract_strided_slice %2 {offsets = [1, 0], sizes = [1, 256], strides = [1, 1]} : vector<6x384xf32> to vector<1x256xf32>
    %128 = vector.broadcast %127 : vector<1x256xf32> to vector<16x256xf32>
    %129 = arith.mulf %126, %128 : vector<16x256xf32>
    %130 = vector.extract_strided_slice %50 {offsets = [0, 96], sizes = [16, 256], strides = [1, 1]} : vector<16x384xf32> to vector<16x256xf32>
    %131 = vector.extract_strided_slice %50 {offsets = [0, 97], sizes = [16, 256], strides = [1, 1]} : vector<16x384xf32> to vector<16x256xf32>
    %132 = vector.extract_strided_slice %2 {offsets = [3, 0], sizes = [1, 256], strides = [1, 1]} : vector<6x384xf32> to vector<1x256xf32>
    %133 = vector.broadcast %132 : vector<1x256xf32> to vector<16x256xf32>
    %134 = arith.mulf %131, %133 : vector<16x256xf32>
    %135 = vector.extract_strided_slice %50 {offsets = [0, 98], sizes = [16, 256], strides = [1, 1]} : vector<16x384xf32> to vector<16x256xf32>
    %136 = vector.extract_strided_slice %2 {offsets = [4, 0], sizes = [1, 256], strides = [1, 1]} : vector<6x384xf32> to vector<1x256xf32>
    %137 = vector.broadcast %136 : vector<1x256xf32> to vector<16x256xf32>
    %138 = arith.mulf %135, %137 : vector<16x256xf32>
    %139 = tpu.concatenate %57, %61, %62, %66, %70, %74, %78, %79, %83, %87, %91, %95, %96, %100, %104, %108 in 0 : vector<16x256xf32>, vector<16x256xf32>, vector<16x256xf32>, vector<16x256xf32>, vector<16x256xf32>, vector<16x256xf32>, vector<16x256xf32>, vector<16x256xf32>, vector<16x256xf32>, vector<16x256xf32>, vector<16x256xf32>, vector<16x256xf32>, vector<16x256xf32>, vector<16x256xf32>, vector<16x256xf32>, vector<16x256xf32> -> vector<256x256xf32>
    %140 = tpu.concatenate %112, %113, %117, %121, %125, %129, %130, %134, %138 in 0 : vector<16x256xf32>, vector<16x256xf32>, vector<16x256xf32>, vector<16x256xf32>, vector<16x256xf32>, vector<16x256xf32>, vector<16x256xf32>, vector<16x256xf32>, vector<16x256xf32> -> vector<144x256xf32>
    %141 = tpu.concatenate %139, %140 in 0 : vector<256x256xf32>, vector<144x256xf32> -> vector<400x256xf32>
    %c0_9 = arith.constant 0 : index
    %c0_10 = arith.constant 0 : index
    %142 = vector.load %arg5[%c0_9, %c0_10] : memref<24x400xf32, #tpu.memory_space<vmem>>, vector<24x400xf32>
    %cst_11 = arith.constant dense<0.000000e+00> : vector<24x256xf32>
    %143 = tpu.matmul %142, %141, %cst_11 {dimension_numbers = #tpu.dot_dimension_numbers<[1], [0], [0], [1], [0, 0, 1, 1], [], []>} : vector<24x400xf32>, vector<400x256xf32>, vector<24x256xf32> -> vector<24x256xf32>
    %c0_12 = arith.constant 0 : index
    %c0_13 = arith.constant 0 : index
    %144 = vector.load %arg6[%c0_12, %c0_13] : memref<24x1xf32, #tpu.memory_space<vmem>>, vector<24x1xf32>
    %145 = vector.broadcast %144 : vector<24x1xf32> to vector<24x256xf32>
    %146 = arith.addf %143, %145 : vector<24x256xf32>
    %147 = vector.extract_strided_slice %53 {offsets = [0, 15], sizes = [16, 320], strides = [1, 1]} : vector<16x384xf32> to vector<16x320xf32>
    %148 = vector.extract_strided_slice %2 {offsets = [1, 0], sizes = [1, 320], strides = [1, 1]} : vector<6x384xf32> to vector<1x320xf32>
    %149 = vector.broadcast %148 : vector<1x320xf32> to vector<16x320xf32>
    %150 = arith.mulf %147, %149 : vector<16x320xf32>
    %151 = vector.extract_strided_slice %53 {offsets = [0, 16], sizes = [16, 320], strides = [1, 1]} : vector<16x384xf32> to vector<16x320xf32>
    %152 = vector.extract_strided_slice %53 {offsets = [0, 17], sizes = [16, 320], strides = [1, 1]} : vector<16x384xf32> to vector<16x320xf32>
    %153 = vector.extract_strided_slice %2 {offsets = [3, 0], sizes = [1, 320], strides = [1, 1]} : vector<6x384xf32> to vector<1x320xf32>
    %154 = vector.broadcast %153 : vector<1x320xf32> to vector<16x320xf32>
    %155 = arith.mulf %152, %154 : vector<16x320xf32>
    %156 = vector.extract_strided_slice %53 {offsets = [0, 31], sizes = [16, 320], strides = [1, 1]} : vector<16x384xf32> to vector<16x320xf32>
    %157 = vector.extract_strided_slice %2 {offsets = [1, 0], sizes = [1, 320], strides = [1, 1]} : vector<6x384xf32> to vector<1x320xf32>
    %158 = vector.broadcast %157 : vector<1x320xf32> to vector<16x320xf32>
    %159 = arith.mulf %156, %158 : vector<16x320xf32>
    %160 = vector.extract_strided_slice %53 {offsets = [0, 32], sizes = [16, 320], strides = [1, 1]} : vector<16x384xf32> to vector<16x320xf32>
    %161 = vector.extract_strided_slice %53 {offsets = [0, 33], sizes = [16, 320], strides = [1, 1]} : vector<16x384xf32> to vector<16x320xf32>
    %162 = vector.extract_strided_slice %2 {offsets = [3, 0], sizes = [1, 320], strides = [1, 1]} : vector<6x384xf32> to vector<1x320xf32>
    %163 = vector.broadcast %162 : vector<1x320xf32> to vector<16x320xf32>
    %164 = arith.mulf %161, %163 : vector<16x320xf32>
    %165 = vector.extract_strided_slice %53 {offsets = [0, 47], sizes = [16, 320], strides = [1, 1]} : vector<16x384xf32> to vector<16x320xf32>
    %166 = vector.extract_strided_slice %2 {offsets = [1, 0], sizes = [1, 320], strides = [1, 1]} : vector<6x384xf32> to vector<1x320xf32>
    %167 = vector.broadcast %166 : vector<1x320xf32> to vector<16x320xf32>
    %168 = arith.mulf %165, %167 : vector<16x320xf32>
    %169 = vector.extract_strided_slice %53 {offsets = [0, 48], sizes = [16, 320], strides = [1, 1]} : vector<16x384xf32> to vector<16x320xf32>
    %170 = vector.extract_strided_slice %53 {offsets = [0, 49], sizes = [16, 320], strides = [1, 1]} : vector<16x384xf32> to vector<16x320xf32>
    %171 = vector.extract_strided_slice %2 {offsets = [3, 0], sizes = [1, 320], strides = [1, 1]} : vector<6x384xf32> to vector<1x320xf32>
    %172 = vector.broadcast %171 : vector<1x320xf32> to vector<16x320xf32>
    %173 = arith.mulf %170, %172 : vector<16x320xf32>
    %174 = tpu.concatenate %150, %151, %155, %159, %160, %164, %168, %169, %173 in 0 : vector<16x320xf32>, vector<16x320xf32>, vector<16x320xf32>, vector<16x320xf32>, vector<16x320xf32>, vector<16x320xf32>, vector<16x320xf32>, vector<16x320xf32>, vector<16x320xf32> -> vector<144x320xf32>
    %175 = vector.extract_strided_slice %2 {offsets = [5, 32], sizes = [1, 320], strides = [1, 1]} : vector<6x384xf32> to vector<1x320xf32>
    %c0_14 = arith.constant 0 : index
    %c0_15 = arith.constant 0 : index
    %176 = vector.load %arg7[%c0_14, %c0_15] : memref<24x144xf32, #tpu.memory_space<vmem>>, vector<24x144xf32>
    %cst_16 = arith.constant dense<0.000000e+00> : vector<24x320xf32>
    %177 = tpu.matmul %176, %174, %cst_16 {dimension_numbers = #tpu.dot_dimension_numbers<[1], [0], [0], [1], [0, 0, 1, 1], [], []>} : vector<24x144xf32>, vector<144x320xf32>, vector<24x320xf32> -> vector<24x320xf32>
    %c0_17 = arith.constant 0 : index
    %c0_18 = arith.constant 0 : index
    %178 = vector.load %arg8[%c0_17, %c0_18] : memref<24x1xf32, #tpu.memory_space<vmem>>, vector<24x1xf32>
    %179 = vector.broadcast %178 : vector<24x1xf32> to vector<24x320xf32>
    %180 = arith.addf %177, %179 : vector<24x320xf32>
    %181 = vector.broadcast %175 : vector<1x320xf32> to vector<24x320xf32>
    %182 = arith.mulf %180, %181 : vector<24x320xf32>
    %183 = vector.extract_strided_slice %182 {offsets = [0, 15], sizes = [24, 256], strides = [1, 1]} : vector<24x320xf32> to vector<24x256xf32>
    %184 = vector.extract_strided_slice %2 {offsets = [1, 0], sizes = [1, 256], strides = [1, 1]} : vector<6x384xf32> to vector<1x256xf32>
    %185 = vector.broadcast %184 : vector<1x256xf32> to vector<24x256xf32>
    %186 = arith.mulf %183, %185 : vector<24x256xf32>
    %187 = vector.extract_strided_slice %182 {offsets = [0, 16], sizes = [24, 256], strides = [1, 1]} : vector<24x320xf32> to vector<24x256xf32>
    %188 = vector.extract_strided_slice %182 {offsets = [0, 17], sizes = [24, 256], strides = [1, 1]} : vector<24x320xf32> to vector<24x256xf32>
    %189 = vector.extract_strided_slice %2 {offsets = [3, 0], sizes = [1, 256], strides = [1, 1]} : vector<6x384xf32> to vector<1x256xf32>
    %190 = vector.broadcast %189 : vector<1x256xf32> to vector<24x256xf32>
    %191 = arith.mulf %188, %190 : vector<24x256xf32>
    %192 = vector.extract_strided_slice %182 {offsets = [0, 31], sizes = [24, 256], strides = [1, 1]} : vector<24x320xf32> to vector<24x256xf32>
    %193 = vector.extract_strided_slice %2 {offsets = [1, 0], sizes = [1, 256], strides = [1, 1]} : vector<6x384xf32> to vector<1x256xf32>
    %194 = vector.broadcast %193 : vector<1x256xf32> to vector<24x256xf32>
    %195 = arith.mulf %192, %194 : vector<24x256xf32>
    %196 = vector.extract_strided_slice %182 {offsets = [0, 32], sizes = [24, 256], strides = [1, 1]} : vector<24x320xf32> to vector<24x256xf32>
    %197 = vector.extract_strided_slice %182 {offsets = [0, 33], sizes = [24, 256], strides = [1, 1]} : vector<24x320xf32> to vector<24x256xf32>
    %198 = vector.extract_strided_slice %2 {offsets = [3, 0], sizes = [1, 256], strides = [1, 1]} : vector<6x384xf32> to vector<1x256xf32>
    %199 = vector.broadcast %198 : vector<1x256xf32> to vector<24x256xf32>
    %200 = arith.mulf %197, %199 : vector<24x256xf32>
    %201 = vector.extract_strided_slice %182 {offsets = [0, 47], sizes = [24, 256], strides = [1, 1]} : vector<24x320xf32> to vector<24x256xf32>
    %202 = vector.extract_strided_slice %2 {offsets = [1, 0], sizes = [1, 256], strides = [1, 1]} : vector<6x384xf32> to vector<1x256xf32>
    %203 = vector.broadcast %202 : vector<1x256xf32> to vector<24x256xf32>
    %204 = arith.mulf %201, %203 : vector<24x256xf32>
    %205 = vector.extract_strided_slice %182 {offsets = [0, 48], sizes = [24, 256], strides = [1, 1]} : vector<24x320xf32> to vector<24x256xf32>
    %206 = vector.extract_strided_slice %182 {offsets = [0, 49], sizes = [24, 256], strides = [1, 1]} : vector<24x320xf32> to vector<24x256xf32>
    %207 = vector.extract_strided_slice %2 {offsets = [3, 0], sizes = [1, 256], strides = [1, 1]} : vector<6x384xf32> to vector<1x256xf32>
    %208 = vector.broadcast %207 : vector<1x256xf32> to vector<24x256xf32>
    %209 = arith.mulf %206, %208 : vector<24x256xf32>
    %210 = tpu.concatenate %186, %187, %191, %195, %196, %200, %204, %205, %209 in 0 : vector<24x256xf32>, vector<24x256xf32>, vector<24x256xf32>, vector<24x256xf32>, vector<24x256xf32>, vector<24x256xf32>, vector<24x256xf32>, vector<24x256xf32>, vector<24x256xf32> -> vector<216x256xf32>
    %c0_19 = arith.constant 0 : index
    %c0_20 = arith.constant 0 : index
    %211 = vector.load %arg9[%c0_19, %c0_20] : memref<24x216xf32, #tpu.memory_space<vmem>>, vector<24x216xf32>
    %cst_21 = arith.constant dense<0.000000e+00> : vector<24x256xf32>
    %212 = tpu.matmul %211, %210, %cst_21 {dimension_numbers = #tpu.dot_dimension_numbers<[1], [0], [0], [1], [0, 0, 1, 1], [], []>} : vector<24x216xf32>, vector<216x256xf32>, vector<24x256xf32> -> vector<24x256xf32>
    %c0_22 = arith.constant 0 : index
    %c0_23 = arith.constant 0 : index
    %213 = vector.load %arg10[%c0_22, %c0_23] : memref<24x1xf32, #tpu.memory_space<vmem>>, vector<24x1xf32>
    %214 = vector.broadcast %213 : vector<24x1xf32> to vector<24x256xf32>
    %215 = arith.addf %212, %214 : vector<24x256xf32>
    %216 = vector.extract_strided_slice %46 {offsets = [0, 64], sizes = [24, 256], strides = [1, 1]} : vector<72x384xf32> to vector<24x256xf32>
    %c0_24 = arith.constant 0 : index
    %c0_25 = arith.constant 0 : index
    %c0_26 = arith.constant 0 : index
    %217 = vector.load %arg11[%c0_24, %c0_25, %c0_26] : memref<1x88x256xf32, #tpu.memory_space<vmem>>, vector<1x24x256xf32>
    %218 = vector.shape_cast %217 : vector<1x24x256xf32> to vector<24x256xf32>
    %219 = vector.shape_cast %216 : vector<24x256xf32> to vector<1x24x256xf32>
    tpu.vector_store %arg11[%c0_24, %c0_25, %c0_26], %219 {strides = array<i32>} : memref<1x88x256xf32, #tpu.memory_space<vmem>>, vector<1x24x256xf32>,
    %220 = vector.extract_strided_slice %46 {offsets = [24, 64], sizes = [16, 256], strides = [1, 1]} : vector<72x384xf32> to vector<16x256xf32>
    %c0_27 = arith.constant 0 : index
    %c24 = arith.constant 24 : index
    %c0_28 = arith.constant 0 : index
    %221 = vector.load %arg11[%c0_27, %c24, %c0_28] : memref<1x88x256xf32, #tpu.memory_space<vmem>>, vector<1x16x256xf32>
    %222 = vector.shape_cast %221 : vector<1x16x256xf32> to vector<16x256xf32>
    %223 = vector.shape_cast %220 : vector<16x256xf32> to vector<1x16x256xf32>
    tpu.vector_store %arg11[%c0_27, %c24, %c0_28], %223 {strides = array<i32>} : memref<1x88x256xf32, #tpu.memory_space<vmem>>, vector<1x16x256xf32>,
    %c0_29 = arith.constant 0 : index
    %c40 = arith.constant 40 : index
    %c0_30 = arith.constant 0 : index
    %224 = vector.load %arg11[%c0_29, %c40, %c0_30] : memref<1x88x256xf32, #tpu.memory_space<vmem>>, vector<1x24x256xf32>
    %225 = vector.shape_cast %224 : vector<1x24x256xf32> to vector<24x256xf32>
    %226 = vector.shape_cast %146 : vector<24x256xf32> to vector<1x24x256xf32>
    tpu.vector_store %arg11[%c0_29, %c40, %c0_30], %226 {strides = array<i32>} : memref<1x88x256xf32, #tpu.memory_space<vmem>>, vector<1x24x256xf32>,
    %c0_31 = arith.constant 0 : index
    %c64 = arith.constant 64 : index
    %c0_32 = arith.constant 0 : index
    %227 = vector.load %arg11[%c0_31, %c64, %c0_32] : memref<1x88x256xf32, #tpu.memory_space<vmem>>, vector<1x24x256xf32>
    %228 = vector.shape_cast %227 : vector<1x24x256xf32> to vector<24x256xf32>
    %229 = vector.shape_cast %215 : vector<24x256xf32> to vector<1x24x256xf32>
    tpu.vector_store %arg11[%c0_31, %c64, %c0_32], %229 {strides = array<i32>} : memref<1x88x256xf32, #tpu.memory_space<vmem>>, vector<1x24x256xf32>,
    return
  }
  func.func @transform_0(%arg0: i32) -> (i32, i32, i32) {
    %c0_i32 = arith.constant 0 : i32
    %c0_i32_0 = arith.constant 0 : i32
    %c0_i32_1 = arith.constant 0 : i32
    return %arg0, %c0_i32, %c0_i32_0 : i32, i32, i32
  }
  func.func @transform_1(%arg0: i32) -> (i32, i32) {
    %c0_i32 = arith.constant 0 : i32
    %c0_i32_0 = arith.constant 0 : i32
    %c0_i32_1 = arith.constant 0 : i32
    return %c0_i32, %c0_i32_0 : i32, i32
  }
  func.func @transform_2(%arg0: i32) -> (i32, i32) {
    %c0_i32 = arith.constant 0 : i32
    %c0_i32_0 = arith.constant 0 : i32
    %c0_i32_1 = arith.constant 0 : i32
    return %c0_i32, %c0_i32_0 : i32, i32
  }
  func.func @transform_3(%arg0: i32) -> (i32, i32) {
    %c0_i32 = arith.constant 0 : i32
    %c0_i32_0 = arith.constant 0 : i32
    %c0_i32_1 = arith.constant 0 : i32
    return %c0_i32, %c0_i32_0 : i32, i32
  }
  func.func @transform_4(%arg0: i32) -> (i32, i32) {
    %c0_i32 = arith.constant 0 : i32
    %c0_i32_0 = arith.constant 0 : i32
    %c0_i32_1 = arith.constant 0 : i32
    return %c0_i32, %c0_i32_0 : i32, i32
  }
  func.func @transform_5(%arg0: i32) -> (i32, i32) {
    %c0_i32 = arith.constant 0 : i32
    %c0_i32_0 = arith.constant 0 : i32
    %c0_i32_1 = arith.constant 0 : i32
    return %c0_i32, %c0_i32_0 : i32, i32
  }
  func.func @transform_6(%arg0: i32) -> (i32, i32) {
    %c0_i32 = arith.constant 0 : i32
    %c0_i32_0 = arith.constant 0 : i32
    %c0_i32_1 = arith.constant 0 : i32
    return %c0_i32, %c0_i32_0 : i32, i32
  }
  func.func @transform_7(%arg0: i32) -> (i32, i32) {
    %c0_i32 = arith.constant 0 : i32
    %c0_i32_0 = arith.constant 0 : i32
    %c0_i32_1 = arith.constant 0 : i32
    return %c0_i32, %c0_i32_0 : i32, i32
  }
  func.func @transform_8(%arg0: i32) -> (i32, i32) {
    %c0_i32 = arith.constant 0 : i32
    %c0_i32_0 = arith.constant 0 : i32
    %c0_i32_1 = arith.constant 0 : i32
    return %c0_i32, %c0_i32_0 : i32, i32
  }
  func.func @transform_9(%arg0: i32) -> (i32, i32) {
    %c0_i32 = arith.constant 0 : i32
    %c0_i32_0 = arith.constant 0 : i32
    %c0_i32_1 = arith.constant 0 : i32
    return %c0_i32, %c0_i32_0 : i32, i32
  }
  func.func @transform_10(%arg0: i32) -> (i32, i32, i32) {
    %c0_i32 = arith.constant 0 : i32
    %c0_i32_0 = arith.constant 0 : i32
    %c0_i32_1 = arith.constant 0 : i32
    return %arg0, %c0_i32, %c0_i32_0 : i32, i32, i32
  }
}

</mosaic_0001>

<bundles_post_ra>
// kernel: inception_forward.1
= control target key start
LH: loop header
LB: loop body
LE: loop exit
PB: predicated region body
PF: predicated region fallthrough
CT: control target
= control target key end

     0   :  { %s4389_s13 = smov 0   ;;  %s8330_s0 = inlined_call_operand.vmem [shape: f32[2,4,448], index: 0, kind: input, shape index: {}]   ;;  %s8331_s1 = inlined_call_operand.vmem [shape: f32[6,384], index: 1, kind: input, shape index: {}]   ;;  %s8332_s2 = inlined_call_operand.vmem [shape: f32[72,8], index: 2, kind: input, shape index: {}]   ;;  %s8333_s3 = inlined_call_operand.vmem [shape: f32[72,1], index: 3, kind: input, shape index: {}]   ;;  %s8334_s4 = inlined_call_operand.vmem [shape: f32[24,400], index: 4, kind: input, shape index: {}]   ;;  %s8335_s5 = inlined_call_operand.vmem [shape: f32[24,1], index: 5, kind: input, shape index: {}]   ;;  %s8336_s6 = inlined_call_operand.vmem [shape: f32[24,144], index: 6, kind: input, shape index: {}]   ;;  %s8337_s7 = inlined_call_operand.vmem [shape: f32[24,1], index: 7, kind: input, shape index: {}]   ;;  %s8338_s8 = inlined_call_operand.vmem [shape: f32[24,216], index: 8, kind: input, shape index: {}]   ;;  %s8339_s9 = inlined_call_operand.vmem [shape: f32[24,1], index: 9, kind: input, shape index: {}]   ;;  %s8340_s10 = inlined_call_operand.vmem [shape: f32[2,88,256], index: 10, kind: output, shape index: {}]  }
   0x1 LB: > { %s4153_s14 = sadd.s32 4294967295, %s4292_s13   ;;  %p4157_p0 = scmp.ge.s32.totalorder %s4292_s13, 1  ;;  %s4292_s13 = sphi %s4389_s13, %s20_s13  }
   0x2   : > { %p312_p1 = scmp.lt.s32.totalorder %s4292_s13, 3 }
   0x4   : > { %p313_p2 = pnand %p4157_p0, %p312_p1 }
   0x6   : > { %316 = sbr.rel (%p313_p2) target bundleno = 2588 (0xa1c), region = 60 }
   0xb   : > { %v365_v0 = vlaneseq  ;;  %v4294_v2 = vmov 0   ;;  %v364_v3 = vld [vmem:[%s8331_s1 + $0x10] sm:$0x3f]  ;;  %v4405_v4 = vld [vmem:[%s8331_s1] sm:$0x3f]  ;;  %s4295_s21 = smov 17  }
   0xc   : > { %4283 = vset.pattern.permute.xlu1 %v4294_v2  ;;  %4282 = vset.pattern.permute.xlu0 %v4294_v2  ;;  %v4414_v7 = vld [vmem:[%s8331_s1 + $0x8] sm:$0x3f]  ;;  %s4296_s22 = smov 15   ;;  %s4297_s23 = smov 31   ;;  %v644_v21 = vld [vmem:[%s8333_s3] sm:$0xff]  ;;  %v646_v22 = vld [vmem:[%s8333_s3 + $0x10] sm:$0xff] }
   0xd   : > { %v4397_v1 = vshrl.u32 %v365_v0, 7  ;;  %p350_p3 = scmp.lt.s32.totalorder %s4153_s14, 1  ;;  %s4298_s24 = smov 33   ;;  %v645_v20 = vld [vmem:[%s8333_s3 + $0x8] sm:$0xff]  ;;  %v647_v23 = vld [vmem:[%s8333_s3 + $0x18] sm:$0xff]  ;;  %v648_v24 = vld [vmem:[%s8333_s3 + $0x20] sm:$0xff] }
   0xe   : > { %s4299_s26 = smov 47   ;;  %s4300_s30 = smov 49   ;;  %v649_v25 = vld [vmem:[%s8333_s3 + $0x28] sm:$0xff]  ;;  %v650_v26 = vld [vmem:[%s8333_s3 + $0x30] sm:$0xff]  ;;  %v651_v27 = vld [vmem:[%s8333_s3 + $0x38] sm:$0xff]  ;;  %vm418_vm0 = vcmask 138240  }
   0xf   : > { %v398_v5 = vsub.s32 3, %v4397_v1  ;;  %v4409_v6 = vsub.s32 5, %v4397_v1  ;;  %v367_v8 = vsub.s32 1, %v4397_v1  ;;  %s9150_s14 = smov (!%p350_p3, %s4153_s14), 1  ;;  %s4301_s11 = smov 127   ;;  %v999_v28 = vsub.s32 0, %v4397_v1 }
  0x10   : > { %s4193_s25 = sshll.u32 %s9150_s14, 4  ;;  %s8341_s12 = smov 111   ;;  %v652_v29 = vld [vmem:[%s8333_s3 + $0x40] sm:$0xff]  ;;  %v1052_v32 = vsub.s32 4, %v4397_v1  ;;  %vm389_vm1 = vcmask 1043456   ;;  %vm432_vm2 = vcmask 252928  }
  0x11   : > { %v407_v9 = vrot.slane %v364_v3, %v398_v5  ;;  %v4418_v10 = vrot.slane %v364_v3, %v4409_v6  ;;  %v376_v11 = vrot.slane %v364_v3, %v367_v8  ;;  %v4421_v12 = vrot.slane %v4405_v4, %v367_v8  ;;  %s354_s29 = scalar_lea.vmem %s8330_s0, %s4193_s25  ;;  %s4303_s15 = smov 95  }
  0x12   : > { %v4424_v13 = vrot.slane %v4414_v7, %v367_v8  ;;  %v4428_v14 = vrot.slane %v4405_v4, %v398_v5  ;;  %v4431_v15 = vrot.slane %v4414_v7, %v398_v5  ;;  %v4458_v18 = vld [vmem:[%s354_s29 + $0x8] sm:$0xff]  ;;  %v4460_v19 = vld [vmem:[%s354_s29] sm:$0xff]  ;;  %v4503_v30 = vrot.slane %v4405_v4, %v999_v28  ;;  %s4304_s28 = smov 30   ;;  %s4305_s29 = smov 34  }
  0x13   : > { %8525 = vst [vmem:[#allocation2_spill] sm:$0xff] %v4418_v10  ;;  %414 = vrot.lane.b32.xlu1 %v407_v9, %s4295_s21  ;;  %383 = vrot.lane.b32.xlu0 %v376_v11, %s4296_s22  ;;  %v4506_v31 = vrot.slane %v4414_v7, %v999_v28  ;;  %v4518_v33 = vrot.slane %v4405_v4, %v1052_v32  ;;  %s4306_s16 = smov 46   ;;  %s4309_s17 = smov 63   ;;  %vm446_vm3 = vcmask 269312   ;;  %vm460_vm4 = vcmask 384000  }
  0x14   : > { %v380_v16 = vcombine.low %v4421_v12, %v4424_v13  ;;  %v411_v17 = vcombine.low %v4428_v14, %v4431_v15  ;;  %v4523_v34 = vrot.slane %v4414_v7, %v1052_v32  ;;  %s4312_s18 = smov 78   ;;  %s4313_s19 = smov 79   ;;  %vm474_vm5 = vcmask 400384  }
  0x15   : > { %s4314_s20 = smov 126   ;;  %s4315_s25 = smov 112   ;;  %vm8362_vm6 = vcmask 121856   ;;  %vm491_vm7 = vcmask 1039360   ;;  %vm507_vm8 = vcmask 1031168   ;;  %vm523_vm9 = vcmask 916480  }
  0x16   : > { %s4317_s27 = smov 96   ;;  %vm537_vm10 = vcmask 908288   ;;  %vm553_vm11 = vcmask 900096   ;;  %vm569_vm12 = vcmask 785408   ;;  %vm8507_vm13 = vcmask 777216  }
  0x17   : > { %428 = vrot.lane.b32.xlu1 %v376_v11, %s4297_s23  ;;  %381 = vrot.lane.b32.xlu0 %v380_v16, %s4296_s22  ;;  %vm599_vm14 = vcmask 769024   ;;  %vm4324_vm15 = vmmov 0  }
  0x1b   : > { %412 = vrot.lane.b32.xlu1 %v411_v17, %s4295_s21  ;;  %426 = vrot.lane.b32.xlu0 %v380_v16, %s4297_s23 }
  0x1f   : > { %442 = vrot.lane.b32.xlu1 %v407_v9, %s4298_s24  ;;  %440 = vrot.lane.b32.xlu0 %v411_v17, %s4298_s24 }
  0x23   : > { %456 = vrot.lane.b32.xlu1 %v376_v11, %s4299_s26  ;;  %454 = vrot.lane.b32.xlu0 %v380_v16, %s4299_s26 }
  0x27   : > { %470 = vrot.lane.b32.xlu1 %v407_v9, %s4300_s30  ;;  %468 = vrot.lane.b32.xlu0 %v411_v17, %s4300_s30 }
  0x2b   : > { %486 = vrot.lane.b32.xlu1 %v4458_v18, %s4301_s11  ;;  %484 = vrot.lane.b32.xlu0 %v4460_v19, %s4301_s11 }
  0x2f   : > { %532 = vrot.lane.b32.xlu1 %v4458_v18, %s8341_s12  ;;  %530 = vrot.lane.b32.xlu0 %v4460_v19, %s8341_s12  ;;  %s4316_s12 = smov 110  }
  0x33   : > { %578 = vrot.lane.b32.xlu1 %v4458_v18, %s4303_s15  ;;  %576 = vrot.lane.b32.xlu0 %v4460_v19, %s4303_s15 }
  0x37   : > { %660 = vperm.xlu1 %4283, %v645_v20   ;;  %655 = vperm.xlu0 %4282, %v644_v21  }
  0x3b   : > { %665 = vperm.xlu1 %4283, %v646_v22   ;;  %670 = vperm.xlu0 %4282, %v647_v23  }
  0x3f   : > { %675 = vperm.xlu1 %4283, %v648_v24   ;;  %680 = vperm.xlu0 %4282, %v649_v25  }
  0x43   : > { %685 = vperm.xlu1 %4283, %v650_v26   ;;  %690 = vperm.xlu0 %4282, %v651_v27  }
  0x47   : > { %695 = vperm.xlu1 %4283, %v652_v29   ;;  %1007 = vrot.lane.b32.xlu0 %v4503_v30, %s4304_s28 }
  0x4b   : > { %1009 = vrot.lane.b32.xlu1 %v4506_v31, %s4304_s28  ;;  %1022 = vrot.lane.b32.xlu0 %v4421_v12, %s4297_s23  ;;  %s4318_s28 = smov 94  }
  0x4f   : > { %1024 = vrot.lane.b32.xlu1 %v4424_v13, %s4297_s23  ;;  %1036 = vrot.lane.b32.xlu0 %v4428_v14, %s4298_s24  ;;  %s4307_s23 = smov 50  }
  0x53   : > { %1038 = vrot.lane.b32.xlu1 %v4431_v15, %s4298_s24  ;;  %1060 = vrot.lane.b32.xlu0 %v4518_v33, %s4305_s29  ;;  %s4308_s24 = smov 62  }
  0x57   : > { %1062 = vrot.lane.b32.xlu1 %v4523_v34, %s4305_s29  ;;  %1075 = vrot.lane.b32.xlu0 %v4503_v30, %s4306_s16  ;;  %s4319_s29 = smov 81  }
  0x5b   : > { %1077 = vrot.lane.b32.xlu1 %v4506_v31, %s4306_s16  ;;  %1090 = vrot.lane.b32.xlu0 %v4421_v12, %s4299_s26  ;;  %s4320_s16 = smov 82  }
  0x5f   : > { %1092 = vrot.lane.b32.xlu1 %v4424_v13, %s4299_s26  ;;  %1104 = vrot.lane.b32.xlu0 %v4428_v14, %s4300_s30  ;;  %s4310_s26 = smov 65  }
  0x63   : > { %1106 = vrot.lane.b32.xlu1 %v4431_v15, %s4300_s30  ;;  %1118 = vrot.lane.b32.xlu0 %v4518_v33, %s4307_s23  ;;  %s4311_s30 = smov 66  }
  0x67   : > { %1120 = vrot.lane.b32.xlu1 %v4523_v34, %s4307_s23  ;;  %1133 = vrot.lane.b32.xlu0 %v4503_v30, %s4308_s24  ;;  %s4321_s23 = smov 97  }
  0x6b   : > { %1135 = vrot.lane.b32.xlu1 %v4506_v31, %s4308_s24  ;;  %1148 = vrot.lane.b32.xlu0 %v4421_v12, %s4309_s17  ;;  %s4322_s24 = smov 98  }
  0x6f   : > { %1150 = vrot.lane.b32.xlu1 %v4424_v13, %s4309_s17  ;;  %1163 = vrot.lane.b32.xlu0 %v4428_v14, %s4310_s26  ;;  %s4327_s17 = smov 109  }
  0x73   : > { %1165 = vrot.lane.b32.xlu1 %v4431_v15, %s4310_s26  ;;  %1178 = vrot.lane.b32.xlu0 %v4518_v33, %s4311_s30  ;;  %s4328_s26 = smov 108  }
  0x77   : > { %1180 = vrot.lane.b32.xlu1 %v4523_v34, %s4311_s30  ;;  %1193 = vrot.lane.b32.xlu0 %v4503_v30, %s4312_s18  ;;  %s4329_s30 = smov 93  }
  0x7b   : > { %1195 = vrot.lane.b32.xlu1 %v4506_v31, %s4312_s18  ;;  %1208 = vrot.lane.b32.xlu0 %v4421_v12, %s4313_s19  ;;  %s4330_s18 = smov 92  }
  0x7f   : > { %1210 = vrot.lane.b32.xlu1 %v4424_v13, %s4313_s19 }
  0x85   : > { %v4553_v35 = vpop.permute.xlu1 %414  ;;  %v4555_v36 = vpop.permute.xlu0 %383 }
  0x86   : > { %8526 = vst [vmem:[#allocation3_spill] sm:$0xff] %v4553_v35  ;;  %8527 = vst [vmem:[#allocation4_spill] sm:$0xff] %v4555_v36  ;;  %v417_v40 = vrot.slane %v4553_v35, 4 }
  0x89   : > { %v4557_v37 = vpop.permute.xlu1 %428  ;;  %v4559_v38 = vpop.permute.xlu0 %381 }
  0x8a   : > { %8528 = vst [vmem:[#allocation5_spill] sm:$0xff] %v4557_v37  ;;  %v431_v43 = vrot.slane %v4557_v37, 4 }
  0x8d   : > { %v413_v39 = vpop.permute.xlu1 %412  ;;  %v427_v42 = vpop.permute.xlu0 %426 }
  0x8e   : > { %v416_v41 = vrot.slane %v413_v39, 4  ;;  %v430_v44 = vrot.slane %v427_v42, 4 }
  0x90   : > { %v419_v45 = vsel %vm418_vm0, %v416_v41, %v413_v39  ;;  %v420_v46 = vsel %vm389_vm1, %v416_v41, %v417_v40  ;;  %v434_v50 = vsel %vm389_vm1, %v430_v44, %v431_v43  ;;  %v433_v51 = vsel %vm432_vm2, %v430_v44, %v427_v42 }
  0x91   : > { %v4565_v47 = vpop.permute.xlu1 %442  ;;  %v424_v48 = vmul.f32 %v419_v45, %v4460_v19  ;;  %v421_v49 = vsel %vm418_vm0, %v420_v46, %v4553_v35  ;;  %v441_v53 = vpop.permute.xlu0 %440  ;;  %v435_v56 = vsel %vm432_vm2, %v434_v50, %v4557_v37  ;;  %v438_v58 = vmul.f32 %v433_v51, %v4460_v19  ;;  %v1963_v46 = vld [vmem:[%s8335_s5] sm:$0xff] }
  0x92   : > { %8529 = vst [vmem:[#allocation6_spill] sm:$0xff] %v4565_v47  ;;  %v445_v52 = vrot.slane %v4565_v47, 4  ;;  %v425_v54 = vmul.f32 %v421_v49, %v4458_v18  ;;  %v444_v55 = vrot.slane %v441_v53, 4  ;;  %v439_v63 = vmul.f32 %v435_v56, %v4458_v18 }
  0x93   : > { %500 = vrot.lane.b32.xlu0 %v424_v48, %s4314_s20  ;;  %v1964_v48 = vld [vmem:[%s8335_s5 + $0x8] sm:$0xff] }
  0x94   : > { %502 = vrot.lane.b32.xlu1 %v425_v54, %s4314_s20  ;;  %v448_v59 = vsel %vm389_vm1, %v444_v55, %v445_v52  ;;  %v447_v60 = vsel %vm446_vm3, %v444_v55, %v441_v53 }
  0x95   : > { %v4578_v57 = vpop.permute.xlu1 %456  ;;  %v455_v62 = vpop.permute.xlu0 %454  ;;  %v449_v1 = vsel %vm446_vm3, %v448_v59, %v4565_v47  ;;  %v452_v3 = vmul.f32 %v447_v60, %v4460_v19 }
  0x96   : > { %8530 = vst [vmem:[#allocation7_spill] sm:$0xff] %v4578_v57  ;;  %v459_v61 = vrot.slane %v4578_v57, 4  ;;  %v458_v0 = vrot.slane %v455_v62, 4  ;;  %v453_v16 = vmul.f32 %v449_v1, %v4458_v18 }
  0x97   : > { %516 = vrot.lane.b32.xlu0 %v438_v58, %s4315_s25 }
  0x98   : > { %518 = vrot.lane.b32.xlu1 %v439_v63, %s4315_s25  ;;  %v462_v5 = vsel %vm389_vm1, %v458_v0, %v459_v61  ;;  %v461_v8 = vsel %vm460_vm4, %v458_v0, %v455_v62 }
  0x99   : > { %v4589_v2 = vpop.permute.xlu1 %470  ;;  %v469_v11 = vpop.permute.xlu0 %468  ;;  %v463_v20 = vsel %vm460_vm4, %v462_v5, %v4578_v57  ;;  %v466_v21 = vmul.f32 %v461_v8, %v4460_v19 }
  0x9a   : > { %8531 = vst [vmem:[#allocation8_spill] sm:$0xff] %v4589_v2  ;;  %v473_v9 = vrot.slane %v4589_v2, 4  ;;  %v472_v17 = vrot.slane %v469_v11, 4  ;;  %v467_v24 = vmul.f32 %v463_v20, %v4458_v18 }
  0x9b   : > { %546 = vrot.lane.b32.xlu0 %v452_v3, %s4316_s12 }
  0x9c   : > { %548 = vrot.lane.b32.xlu1 %v453_v16, %s4316_s12  ;;  %v476_v22 = vsel %vm389_vm1, %v472_v17, %v473_v9  ;;  %v475_v23 = vsel %vm474_vm5, %v472_v17, %v469_v11 }
  0x9d   : > { %v477_v25 = vsel %vm474_vm5, %v476_v22, %v4589_v2  ;;  %v480_v26 = vmul.f32 %v475_v23, %v4460_v19  ;;  %v4611_v28 = vpop.permute.xlu1 %486  ;;  %v4614_v29 = vpop.permute.xlu0 %484  ;;  %v385_v22 = vrot.slane %v4559_v38, 4 }
  0x9e   : > { %v481_v27 = vmul.f32 %v477_v25, %v4458_v18  ;;  %v489_v25 = vrot.slane %v4611_v28, 4 }
  0x9f   : > { %562 = vrot.lane.b32.xlu0 %v466_v21, %s4317_s27  ;;  %v386_v21 = vrot.slane %v4555_v36, 4 }
  0xa0   : > { %564 = vrot.lane.b32.xlu1 %v467_v24, %s4317_s27 }
  0xa1   : > { %v4617_v32 = vpop.permute.xlu1 %532  ;;  %v4620_v39 = vpop.permute.xlu0 %530 }
  0xa3   : > { %592 = vrot.lane.b32.xlu0 %v480_v26, %s4318_s28  ;;  %v488_v26 = vrot.slane %v4614_v29, 4 }
  0xa4   : > { %594 = vrot.lane.b32.xlu1 %v481_v27, %s4318_s28  ;;  %v390_v27 = vsel %vm389_vm1, %v385_v22, %v386_v21 }
  0xa5   : > { %v4624_v40 = vpop.permute.xlu1 %578  ;;  %v4626_v41 = vpop.permute.xlu0 %576 }
  0xa7   : > { %1223 = vrot.lane.b32.xlu0 %v4428_v14, %s4319_s29 }
  0xa8   : > { %1225 = vrot.lane.b32.xlu1 %v4431_v15, %s4319_s29  ;;  %s4331_s29 = smov 80  }
  0xab   : > { %1238 = vrot.lane.b32.xlu0 %v4518_v33, %s4320_s16 }
  0xac   : > { %1240 = vrot.lane.b32.xlu1 %v4523_v34, %s4320_s16  ;;  %s4332_s16 = smov 113  }
  0xaf   : > { %1253 = vrot.lane.b32.xlu0 %v4503_v30, %s4318_s28 }
  0xb0   : > { %1255 = vrot.lane.b32.xlu1 %v4506_v31, %s4318_s28 }
  0xb2   : > { %v4632_v42 = vpop.permute.xlu1 %660  ;;  %v4636_v43 = vpop.permute.xlu0 %655 }
  0xb3   : > { %8532 = vst [vmem:[#allocation9_spill] sm:$0xff] %v4632_v42  ;;  %1267 = vrot.lane.b32.xlu0 %v4421_v12, %s4303_s15  ;;  %8533 = vst [vmem:[#allocation10_spill] sm:$0xff] %v4636_v43  ;;  %v493_v42 = vsel %vm491_vm7, %v4611_v28, %v489_v25 }
  0xb4   : > { %1269 = vrot.lane.b32.xlu1 %v4424_v13, %s4303_s15 }
  0xb6   : > { %v4640_v44 = vpop.permute.xlu1 %665  ;;  %v4643_v45 = vpop.permute.xlu0 %670 }
  0xb7   : > { %8534 = vst [vmem:[#allocation11_spill] sm:$0xff] %v4640_v44  ;;  %1281 = vrot.lane.b32.xlu0 %v4428_v14, %s4321_s23  ;;  %8535 = vst [vmem:[#allocation12_spill] sm:$0xff] %v4643_v45 }
  0xb8   : > { %1283 = vrot.lane.b32.xlu1 %v4431_v15, %s4321_s23  ;;  %s4326_s23 = smov 124  }
  0xba   : > { %v4646_v30 = vpop.permute.xlu1 %675  ;;  %v4650_v31 = vpop.permute.xlu0 %680 }
  0xbb   : > { %8536 = vst [vmem:[#allocation13_spill] sm:$0xff] %v4646_v30  ;;  %1296 = vrot.lane.b32.xlu0 %v4518_v33, %s4322_s24  ;;  %v1965_v33 = vld [vmem:[%s8335_s5 + $0x10] sm:$0xff]  ;;  %v388_v30 = vsel %vm8362_vm6, %v385_v22, %v4559_v38 }
  0xbc   : > { %1298 = vrot.lane.b32.xlu1 %v4523_v34, %s4322_s24 }
  0xbe   : > { %v4660_v49 = vpop.permute.xlu1 %685  ;;  %v4662_v50 = vpop.permute.xlu0 %690 }
  0xbf   : > { %1968 = vperm.xlu0 %4282, %v1963_v46   ;;  %v391_v46 = vsel %vm8362_vm6, %v390_v27, %v4555_v36  ;;  %v394_v27 = vmul.f32 %v388_v30, %v4460_v19  ;;  %vm716_vm6 = vcmask 64512  }
  0xc0   : > { %1973 = vperm.xlu1 %4283, %v1964_v48   ;;  %v490_v48 = vsel %vm389_vm1, %v488_v26, %v489_v25  ;;  %v395_v35 = vmul.f32 %v391_v46, %v4458_v18  ;;  %v534_v26 = vrot.slane %v4620_v39, 4  ;;  %v535_v46 = vrot.slane %v4617_v32, 4 }
  0xc1   : > { %v492_v21 = vsel %vm491_vm7, %v4614_v29, %v490_v48 }
  0xc2   : > { %v4667_v51 = vpop.permute.xlu1 %695  ;;  %v4669_v34 = vpop.permute.xlu0 %1007  ;;  %v497_v37 = vadd.f32 %v493_v42, %v395_v35  ;;  %v496_v25 = vadd.f32 %v492_v21, %v394_v27  ;;  %v536_v30 = vsel %vm389_vm1, %v534_v26, %v535_v46  ;;  %v539_v21 = vsel %vm537_vm10, %v4617_v32, %v535_v46 }
  0xc3   : > { %8537 = vst [vmem:[#allocation14_spill] sm:$0xff] %v4667_v51  ;;  %1978 = vperm.xlu0 %4282, %v1965_v33   ;;  %v581_v32 = vrot.slane %v4624_v40, 4 }
  0xc4   : > { %2680 = vrot.lane.b32.xlu1 %v4431_v15, %s4295_s21 }
  0xc6   : > { %v4673_v52 = vpop.permute.xlu1 %1009  ;;  %v4677_v53 = vpop.permute.xlu0 %1022 }
  0xc7   : > { %2678 = vrot.lane.b32.xlu0 %v4428_v14, %s4295_s21  ;;  %8538 = vst [vmem:[#allocation15_spill] sm:$0xff] %v4677_v53 }
  0xc8   : > { %2663 = vrot.lane.b32.xlu1 %v4421_v12, %s4296_s22 }
  0xca   : > { %v4681_v54 = vpop.permute.xlu1 %1024  ;;  %v4685_v55 = vpop.permute.xlu0 %1036 }
  0xcb   : > { %8539 = vst [vmem:[#allocation16_spill] sm:$0xff] %v4681_v54  ;;  %2665 = vrot.lane.b32.xlu0 %v4424_v13, %s4296_s22  ;;  %8540 = vst [vmem:[#allocation17_spill] sm:$0xff] %v4685_v55  ;;  %s4325_s22 = smov 125  }
  0xce   : > { %v4687_v56 = vpop.permute.xlu1 %1038  ;;  %v4689_v15 = vpop.permute.xlu0 %1060 }
  0xcf   : > { %8541 = vst [vmem:[#allocation18_spill] sm:$0xff] %v4687_v56 }
  0xd2   : > { %v4691_v58 = vpop.permute.xlu1 %1062  ;;  %v4693_v59 = vpop.permute.xlu0 %1075 }
  0xd6   : > { %v4695_v14 = vpop.permute.xlu1 %1077  ;;  %v4697_v60 = vpop.permute.xlu0 %1090 }
  0xd7   : > { %8542 = vst [vmem:[#allocation19_spill] sm:$0xff] %v4697_v60 }
  0xda   : > { %v4699_v12 = vpop.permute.xlu1 %1092  ;;  %v4701_v61 = vpop.permute.xlu0 %1104 }
  0xdb   : > { %8543 = vst [vmem:[#allocation20_spill] sm:$0xff] %v4699_v12  ;;  %8544 = vst [vmem:[#allocation21_spill] sm:$0xff] %v4701_v61 }
  0xde   : > { %v4703_v62 = vpop.permute.xlu1 %1106  ;;  %v4705_v13 = vpop.permute.xlu0 %1118 }
  0xdf   : > { %8545 = vst [vmem:[#allocation22_spill] sm:$0xff] %v4703_v62 }
  0xe2   : > { %v4707_v63 = vpop.permute.xlu1 %1120  ;;  %v4709_v0 = vpop.permute.xlu0 %1133 }
  0xe6   : > { %v4711_v1 = vpop.permute.xlu1 %1135  ;;  %v4713_v3 = vpop.permute.xlu0 %1148 }
  0xea   : > { %v4715_v5 = vpop.permute.xlu1 %1150  ;;  %v4717_v8 = vpop.permute.xlu0 %1163 }
  0xee   : > { %v4719_v9 = vpop.permute.xlu1 %1165  ;;  %v4721_v11 = vpop.permute.xlu0 %1178 }
  0xf2   : > { %v4723_v16 = vpop.permute.xlu1 %1180  ;;  %v4725_v17 = vpop.permute.xlu0 %1193 }
  0xf6   : > { %v4727_v20 = vpop.permute.xlu1 %1195  ;;  %v4731_v23 = vpop.permute.xlu0 %1208 }
  0xfa   : > { %v4733_v24 = vpop.permute.xlu1 %1210 }
 0x105   : > { %v501_v33 = vpop.permute.xlu0 %500 }
 0x106   : > { %v504_v45 = vrot.slane %v501_v33, 4  ;;  %v503_v44 = vpop.permute.xlu1 %502 }
 0x107   : > { %v505_v43 = vrot.slane %v503_v44, 4 }
 0x109   : > { %v506_v36 = vsel %vm389_vm1, %v504_v45, %v505_v43  ;;  %v509_v38 = vsel %vm507_vm8, %v503_v44, %v505_v43  ;;  %v517_v22 = vpop.permute.xlu0 %516 }
 0x10a   : > { %v508_v47 = vsel %vm507_vm8, %v501_v33, %v506_v36  ;;  %v520_v51 = vrot.slane %v517_v22, 4  ;;  %v519_v28 = vpop.permute.xlu1 %518  ;;  %v513_v29 = vadd.f32 %v509_v38, %v497_v37  ;;  %v538_v37 = vsel %vm537_vm10, %v4620_v39, %v536_v30 }
 0x10b   : > { %v521_v2 = vrot.slane %v519_v28, 4  ;;  %v512_v48 = vadd.f32 %v508_v47, %v496_v25 }
 0x10d   : > { %v522_v45 = vsel %vm389_vm1, %v520_v51, %v521_v2  ;;  %v525_v43 = vsel %vm523_vm9, %v519_v28, %v521_v2  ;;  %v547_v44 = vpop.permute.xlu0 %546  ;;  %v580_v51 = vrot.slane %v4626_v41, 4 }
 0x10e   : > { %v524_v35 = vsel %vm523_vm9, %v517_v22, %v522_v45  ;;  %v529_v36 = vadd.f32 %v525_v43, %v513_v29  ;;  %v550_v42 = vrot.slane %v547_v44, 4  ;;  %v549_v33 = vpop.permute.xlu1 %548 }
 0x10f   : > { %v528_v27 = vadd.f32 %v524_v35, %v512_v48  ;;  %v551_v57 = vrot.slane %v549_v33, 4  ;;  %v582_v39 = vsel %vm389_vm1, %v580_v51, %v581_v32 }
 0x110   : > { %v543_v47 = vadd.f32 %v539_v21, %v529_v36 }
 0x111   : > { %v552_v2 = vsel %vm389_vm1, %v550_v42, %v551_v57  ;;  %v555_v26 = vsel %vm553_vm11, %v549_v33, %v551_v57  ;;  %v563_v38 = vpop.permute.xlu0 %562  ;;  %v542_v22 = vadd.f32 %v538_v37, %v528_v27  ;;  %v585_v33 = vsel %vm8507_vm13, %v4624_v40, %v581_v32 }
 0x112   : > { %v554_v28 = vsel %vm553_vm11, %v547_v44, %v552_v2  ;;  %v566_v25 = vrot.slane %v563_v38, 4  ;;  %v565_v29 = vpop.permute.xlu1 %564  ;;  %v559_v48 = vadd.f32 %v555_v26, %v543_v47  ;;  %v584_v37 = vsel %vm8507_vm13, %v4626_v41, %v582_v39 }
 0x113   : > { %v567_v46 = vrot.slane %v565_v29, 4  ;;  %v558_v57 = vadd.f32 %v554_v28, %v542_v22 }
 0x115   : > { %v568_v30 = vsel %vm389_vm1, %v566_v25, %v567_v46  ;;  %v571_v45 = vsel %vm569_vm12, %v565_v29, %v567_v46  ;;  %v593_v43 = vpop.permute.xlu0 %592 }
 0x116   : > { %v575_v35 = vadd.f32 %v571_v45, %v559_v48  ;;  %v596_v36 = vrot.slane %v593_v43, 4  ;;  %v595_v44 = vpop.permute.xlu1 %594  ;;  %v570_v42 = vsel %vm569_vm12, %v563_v38, %v568_v30 }
 0x117   : > { %v597_v21 = vrot.slane %v595_v44, 4  ;;  %v574_v27 = vadd.f32 %v570_v42, %v558_v57 }
 0x118   : > { %v589_v47 = vadd.f32 %v585_v33, %v575_v35 }
 0x119   : > { %v601_v51 = vsel %vm599_vm14, %v595_v44, %v597_v21  ;;  %v588_v2 = vadd.f32 %v584_v37, %v574_v27  ;;  %v598_v26 = vsel %vm389_vm1, %v596_v36, %v597_v21  ;;  %v4782_v32 = vpop.permute.xlu0 %1223 }
 0x11a   : > { %v605_v22 = vadd.f32 %v601_v51, %v589_v47  ;;  %v600_v28 = vsel %vm599_vm14, %v593_v43, %v598_v26  ;;  %v4784_v46 = vpop.permute.xlu1 %1225  ;;  %v8359_v26 = vmov 0.0  }
 0x11b   : > { %v604_v25 = vadd.f32 %v600_v28, %v588_v2  ;;  %4204 = vmatprep.subr.mxu1 %v8359_v26  ;;  %808 = vmatprep.mubr.f32.mxu0 %v8359_v26  ;;  %v609_v28 = vcombine.high %v4458_v18, %v4458_v18 }
 0x11c   : > { %v607_v29 = vmul.f32 0.11111111, %v605_v22  ;;  %4206 = vmatprep.mubr.msk.f32.mxu1 %vm4324_vm15, %v8359_v26 }
 0x11d   : > { %v606_v40 = vmul.f32 0.11111111, %v604_v25  ;;  %v4786_v48 = vpop.permute.xlu0 %1238 }
 0x11e   : > { %622 = vrot.lane.b32.xlu1 %v607_v29, %s4295_s21  ;;  %v615_v38 = vcombine.low %v607_v29, %v607_v29  ;;  %v4788_v39 = vpop.permute.xlu1 %1240 }
 0x11f   : > { %v614_v41 = vcombine.low %v606_v40, %v606_v40 }
 0x120   : > { %620 = vrot.lane.b32.xlu0 %v615_v38, %s4295_s21 }
 0x121   : > { %v4790_v30 = vpop.permute.xlu0 %1253 }
 0x122   : > { %618 = vrot.lane.b32.xlu1 %v606_v40, %s4295_s21  ;;  %v4792_v45 = vpop.permute.xlu1 %1255  ;;  %v608_v40 = vcombine.high %v4460_v19, %v4460_v19 }
 0x124   : > { %616 = vrot.lane.b32.xlu0 %v614_v41, %s4295_s21  ;;  %s8570_s21 = smov 111  }
 0x125   : > { %v4794_v43 = vpop.permute.xlu0 %1267 }
 0x126   : > { %v4796_v57 = vpop.permute.xlu1 %1269 }
 0x129   : > { %v4798_v35 = vpop.permute.xlu0 %1281 }
 0x12a   : > { %v4800_v36 = vpop.permute.xlu1 %1283 }
 0x12d   : > { %v4802_v44 = vpop.permute.xlu0 %1296 }
 0x12e   : > { %v4804_v42 = vpop.permute.xlu1 %1298 }
 0x13a   : > { %v4806_v33 = vpop.permute.xlu0 %1968 }
 0x13b   : > { %8546 = vst [vmem:[#allocation23_spill] sm:$0xff] %v4806_v33  ;;  %v4808_v21 = vpop.permute.xlu1 %1973 }
 0x13c   : > { %8547 = vst [vmem:[#allocation24_spill] sm:$0xff] %v4808_v21 }
 0x13e   : > { %v4810_v27 = vpop.permute.xlu0 %1978 }
 0x13f   : > { %8548 = vst [vmem:[#allocation25_spill] sm:$0xff] %v4810_v27  ;;  %v4812_v37 = vpop.permute.xlu1 %2680 }
 0x140   : > { %8549 = vst [vmem:[#allocation26_spill] sm:$0xff] %v4812_v37 }
 0x142   : > { %v4814_v47 = vpop.permute.xlu0 %2678 }
 0x143   : > { %8550 = vst [vmem:[#allocation27_spill] sm:$0xff] %v4814_v47  ;;  %v4816_v51 = vpop.permute.xlu1 %2663 }
 0x144   : > { %8551 = vst [vmem:[#allocation28_spill] sm:$0xff] %v4816_v51 }
 0x146   : > { %v4818_v2 = vpop.permute.xlu0 %2665 }
 0x147   : > { %8552 = vst [vmem:[#allocation29_spill] sm:$0xff] %v4818_v2 }
 0x190   : > { %v623_v22 = vpop.permute.xlu1 %622 }
 0x192   : > { %v621_v25 = vpop.permute.xlu0 %620 }
 0x193   : > { %v626_v29 = vsel %vm418_vm0, %v621_v25, %v623_v22 }
 0x194   : > { %v634_v38 = vsel %vm389_vm1, %v609_v28, %v626_v29  ;;  %v619_v41 = vpop.permute.xlu1 %618 }
 0x195   : > { %708 = vrot.lane.b32.xlu1 %v634_v38, %s4317_s27  ;;  %v625_v51 = vsel %vm418_vm0, %v619_v41, %v621_v25  ;;  %v639_v25 = vld [vmem:[%s8332_s2 + $0x20] sm:$0xff] }
 0x196   : > { %v617_v27 = vpop.permute.xlu0 %616  ;;  %v633_v28 = vsel %vm389_vm1, %v4458_v18, %v625_v51  ;;  %v8553_v18 = vmov 0.0   ;;  %v636_v51 = vld [vmem:[%s8332_s2 + $0x8] sm:$0xff] }
 0x197   : > { %v624_v21 = vsel %vm418_vm0, %v617_v27, %v619_v41  ;;  %v631_v33 = vsel %vm389_vm1, %v4460_v19, %v617_v27  ;;  %v635_v19 = vld [vmem:[%s8332_s2] sm:$0xff]  ;;  %v641_v41 = vld [vmem:[%s8332_s2 + $0x30] sm:$0xff] }
 0x198   : > { %702 = vrot.lane.b32.xlu0 %v631_v33, %s4317_s27  ;;  %v632_v22 = vsel %vm389_vm1, %v608_v40, %v624_v21  ;;  %v640_v40 = vld [vmem:[%s8332_s2 + $0x28] sm:$0xff]  ;;  %vm1064_vm1 = vcmask 277504  }
 0x199   : > { %704 = vrot.lane.b32.xlu1 %v632_v22, %s4317_s27  ;;  %v642_v22 = vld [vmem:[%s8332_s2 + $0x38] sm:$0xff] }
 0x19c   : > { %706 = vrot.lane.b32.xlu0 %v633_v28, %s4317_s27  ;;  %v643_v28 = vld [vmem:[%s8332_s2 + $0x40] sm:$0xff] }
 0x207   : > { %v709_v29 = vpop.permute.xlu1 %708 }
 0x20a   : > { %v703_v38 = vpop.permute.xlu0 %702 }
 0x20b   : > { %v705_v26 = vpop.permute.xlu1 %704 }
 0x20c   : > { %v710_v27 = vsel %vm569_vm12, %v703_v38, %v705_v26 }
 0x20e   : > { %v707_v2 = vpop.permute.xlu0 %706 }
 0x20f   : > { %v711_v33 = vsel %vm569_vm12, %v705_v26, %v707_v2  ;;  %v712_v21 = vsel %vm569_vm12, %v707_v2, %v709_v29  ;;  %v637_v2 = vld [vmem:[%s8332_s2 + $0x10] sm:$0xff]  ;;  %v638_v26 = vld [vmem:[%s8332_s2 + $0x18] sm:$0xff] }
 0x210   : > { %774 = vmatprep.subr.mxu0 %v711_v33  ;;  %4205 = vmatpush3.msra.mxu1 %v712_v21 }
 0x211   : > { %775 = vmatpush1.msra.mxu0 %v710_v27  ;;  %4207 = vmatmul.mubr.msk.f32.vlgmr.msra.gmra.mxu1 %vm716_vm6, %v635_v19 }
 0x212   : > { %4161 = vmatmul.mubr.msk.f32.vlgmr.msra.gmra.mxu0 %vm716_vm6, %v635_v19  ;;  %4209 = vmatprep.mubr.msk.f32.mxu1 %vm4324_vm15, %v8553_v18 }
 0x213   : > { %814 = vmatprep.mubr.f32.mxu0 %v8553_v18 }
 0x215   : > { %4210 = vmatmul.mubr.msk.f32.gmra.mxu1 %vm716_vm6, %v636_v51 }
 0x216   : > { %4162 = vmatmul.mubr.msk.f32.gmra.mxu0 %vm716_vm6, %v636_v51  ;;  %4212 = vmatprep.mubr.msk.f32.mxu1 %vm4324_vm15, %v8553_v18 }
 0x217   : > { %820 = vmatprep.mubr.f32.mxu0 %v8553_v18 }
 0x219   : > { %4213 = vmatmul.mubr.msk.f32.gmra.mxu1 %vm716_vm6, %v637_v2 }
 0x21a   : > { %4163 = vmatmul.mubr.msk.f32.gmra.mxu0 %vm716_vm6, %v637_v2  ;;  %4215 = vmatprep.mubr.msk.f32.mxu1 %vm4324_vm15, %v8553_v18 }
 0x21b   : > { %826 = vmatprep.mubr.f32.mxu0 %v8553_v18 }
 0x21d   : > { %4216 = vmatmul.mubr.msk.f32.gmra.mxu1 %vm716_vm6, %v638_v26 }
 0x21e   : > { %4164 = vmatmul.mubr.msk.f32.gmra.mxu0 %vm716_vm6, %v638_v26  ;;  %4218 = vmatprep.mubr.msk.f32.mxu1 %vm4324_vm15, %v8553_v18 }
 0x21f   : > { %832 = vmatprep.mubr.f32.mxu0 %v8553_v18 }
 0x221   : > { %4219 = vmatmul.mubr.msk.f32.gmra.mxu1 %vm716_vm6, %v639_v25 }
 0x222   : > { %4165 = vmatmul.mubr.msk.f32.gmra.mxu0 %vm716_vm6, %v639_v25  ;;  %4221 = vmatprep.mubr.msk.f32.mxu1 %vm4324_vm15, %v8553_v18 }
 0x223   : > { %838 = vmatprep.mubr.f32.mxu0 %v8553_v18 }
 0x225   : > { %4222 = vmatmul.mubr.msk.f32.gmra.mxu1 %vm716_vm6, %v640_v40 }
 0x226   : > { %4166 = vmatmul.mubr.msk.f32.gmra.mxu0 %vm716_vm6, %v640_v40  ;;  %4224 = vmatprep.mubr.msk.f32.mxu1 %vm4324_vm15, %v8553_v18 }
 0x227   : > { %844 = vmatprep.mubr.f32.mxu0 %v8553_v18 }
 0x229   : > { %4225 = vmatmul.mubr.msk.f32.gmra.mxu1 %vm716_vm6, %v641_v41 }
 0x22a   : > { %4167 = vmatmul.mubr.msk.f32.gmra.mxu0 %vm716_vm6, %v641_v41  ;;  %4227 = vmatprep.mubr.msk.f32.mxu1 %vm4324_vm15, %v8553_v18 }
 0x22b   : > { %850 = vmatprep.mubr.f32.mxu0 %v8553_v18 }
 0x22d   : > { %4228 = vmatmul.mubr.msk.f32.gmra.mxu1 %vm716_vm6, %v642_v22 }
 0x22e   : > { %4168 = vmatmul.mubr.msk.f32.gmra.mxu0 %vm716_vm6, %v642_v22  ;;  %4230 = vmatprep.mubr.msk.f32.mxu1 %vm4324_vm15, %v8553_v18  ;;  %vm1122_vm15 = vcmask 408576  }
 0x22f   : > { %856 = vmatprep.mubr.f32.mxu0 %v8553_v18 }
 0x231   : > { %4231 = vmatmul.mubr.msk.f32.gmra.mxu1 %vm716_vm6, %v643_v28 }
 0x232   : > { %4169 = vmatmul.mubr.msk.f32.gmra.mxu0 %vm716_vm6, %v643_v28  ;;  %vm1079_vm6 = vcmask 375808  }
 0x2d1   : > { %v4913_v29 = vpop.f32.mrf.mxu1 }
 0x2d2   : > { %8554 = vst [vmem:[#allocation30_spill] sm:$0xff] %v4913_v29  ;;  %v4915_v38 = vpop.f32.mrf.mxu0 }
 0x2d3   : > { %8555 = vst [vmem:[#allocation31_spill] sm:$0xff] %v4915_v38  ;;  %v4208_v19 = vpop.f32.mrf.mxu1 }
 0x2d4   : > { %v4917_v33 = vpop.f32.mrf.mxu0 }
 0x2d5   : > { %8556 = vst [vmem:[#allocation32_spill] sm:$0xff] %v4917_v33  ;;  %v4919_v21 = vpop.f32.mrf.mxu1 }
 0x2d6   : > { %8557 = vst [vmem:[#allocation33_spill] sm:$0xff] %v4919_v21  ;;  %v4921_v27 = vpop.f32.mrf.mxu0 }
 0x2d7   : > { %8558 = vst [vmem:[#allocation34_spill] sm:$0xff] %v4921_v27  ;;  %v4211_v51 = vpop.f32.mrf.mxu1 }
 0x2d8   : > { %v4923_v2 = vpop.f32.mrf.mxu0 }
 0x2d9   : > { %8559 = vst [vmem:[#allocation35_spill] sm:$0xff] %v4923_v2  ;;  %v4925_v26 = vpop.f32.mrf.mxu1 }
 0x2da   : > { %8560 = vst [vmem:[#allocation36_spill] sm:$0xff] %v4925_v26  ;;  %v4927_v25 = vpop.f32.mrf.mxu0 }
 0x2db   : > { %8561 = vst [vmem:[#allocation37_spill] sm:$0xff] %v4927_v25  ;;  %v4214_v40 = vpop.f32.mrf.mxu1 }
 0x2dc   : > { %v4929_v41 = vpop.f32.mrf.mxu0 }
 0x2dd   : > { %8562 = vst [vmem:[#allocation38_spill] sm:$0xff] %v4929_v41  ;;  %v4931_v22 = vpop.f32.mrf.mxu1 }
 0x2de   : > { %8563 = vst [vmem:[#allocation39_spill] sm:$0xff] %v4931_v22  ;;  %v4933_v28 = vpop.f32.mrf.mxu0 }
 0x2df   : > { %8564 = vst [vmem:[#allocation40_spill] sm:$0xff] %v4933_v28  ;;  %v4217_v19 = vpop.f32.mrf.mxu1 }
 0x2e0   : > { %v4935_v29 = vpop.f32.mrf.mxu0 }
 0x2e1   : > { %8565 = vst [vmem:[#allocation41_spill] sm:$0xff] %v4935_v29  ;;  %v4937_v21 = vpop.f32.mrf.mxu1  ;;  %v5088_v29 = vsel %vm1079_vm6, %v4693_v59, %v4695_v14  ;;  %vm1152_vm6 = vcmask 515072  }
 0x2e2   : > { %8566 = vst [vmem:[#allocation42_spill] sm:$0xff] %v4937_v21  ;;  %v4939_v27 = vpop.f32.mrf.mxu0  ;;  %v4950_v21 = vrot.slane %v4414_v7, %v4409_v6 }
 0x2e3   : > { %8567 = vst [vmem:[#allocation43_spill] sm:$0xff] %v4939_v27  ;;  %v4220_v51 = vpop.f32.mrf.mxu1 }
 0x2e4   : > { %v4941_v2 = vpop.f32.mrf.mxu0  ;;  %8569 = vst [vmem:[#allocation45_spill] sm:$0xff] %v4950_v21 }
 0x2e5   : > { %8568 = vst [vmem:[#allocation44_spill] sm:$0xff] %v4941_v2  ;;  %v954_v26 = vpop.f32.mrf.mxu1 }
 0x2e6   : > { %v955_v25 = vadd.f32 %v954_v26, %v4650_v31  ;;  %v840_v40 = vpop.f32.mrf.mxu0 }
 0x2e7   : > { %v4223_v38 = vpop.f32.mrf.mxu1 }
 0x2e8   : > { %v4945_v41 = vmul.f32 %v4418_v10, %v955_v25  ;;  %v842_v22 = vpop.f32.mrf.mxu0 }
 0x2e9   : > { %v959_v28 = vpop.f32.mrf.mxu1  ;;  %v843_v19 = vadd.f32 %v842_v22, %v4650_v31 }
 0x2ea   : > { %1343 = vrot.lane.b32.xlu0 %v4945_v41, %s4314_s20  ;;  %v1018_v51 = vmul.f32 %v4673_v52, %v4945_v41  ;;  %v960_v22 = vadd.f32 %v959_v28, %v4660_v49  ;;  %v841_v28 = vadd.f32 %v840_v40, %v4650_v31  ;;  %v1086_v31 = vmul.f32 %v4695_v14, %v4945_v41 }
 0x2eb   : > { %v4226_v26 = vpop.f32.mrf.mxu1  ;;  %v4960_v25 = vmul.f32 %v4950_v21, %v843_v19  ;;  %v4985_v19 = vrot.slane %v4405_v4, %v4409_v6  ;;  %v1046_v4 = vmul.f32 %v4687_v56, %v4945_v41  ;;  %v1071_v6 = vmul.f32 %v4691_v58, %v4945_v41 }
 0x2ec   : > { %1991 = vrot.lane.b32.xlu1 %v1018_v51, %s4322_s24  ;;  %v4970_v26 = vmul.f32 %v4418_v10, %v960_v22  ;;  %v1032_v22 = vmul.f32 %v4681_v54, %v4945_v41  ;;  %v1100_v40 = vmul.f32 %v4699_v12, %v4945_v41  ;;  %v1307_v33 = vmul.f32 %v4804_v42, %v4945_v41 }
 0x2ed   : > { %v4957_v38 = vpop.f32.mrf.mxu1  ;;  %8571 = vst [vmem:[#allocation46_spill] sm:$0xff] %v4985_v19  ;;  %v1219_v18 = vmul.f32 %v4733_v24, %v4945_v41 }
 0x2ee   : > { %1449 = vrot.lane.b32.xlu0 %v4945_v41, %s4316_s12 }
 0x2ef   : > { %v4229_v7 = vpop.f32.mrf.mxu1 }
 0x2f0   : > { %1341 = vrot.lane.b32.xlu1 %v4960_v25, %s4314_s20  ;;  %v4993_v7 = vmul.f32 %v4985_v19, %v841_v28  ;;  %v1114_v28 = vmul.f32 %v4703_v62, %v4945_v41 }
 0x2f1   : > { %v4967_v27 = vpop.f32.mrf.mxu1 }
 0x2f2   : > { %1555 = vrot.lane.b32.xlu0 %v4945_v41, %s4318_s28 }
 0x2f3   : > { %v4232_v51 = vpop.f32.mrf.mxu1 }
 0x2f4   : > { %1349 = vrot.lane.b32.xlu1 %v4970_v26, %s4314_s20  ;;  %v1016_v51 = vmul.f32 %v4669_v34, %v4993_v7 }
 0x2f6   : > { %1640 = vrot.lane.b32.xlu0 %v4945_v41, %s4301_s11 }
 0x2f8   : > { %1447 = vrot.lane.b32.xlu1 %v4960_v25, %s4316_s12 }
 0x2fa   : > { %1745 = vrot.lane.b32.xlu0 %v4945_v41, %s8570_s21 }
 0x2fc   : > { %1455 = vrot.lane.b32.xlu1 %v4970_v26, %s4316_s12 }
 0x2fe   : > { %1321 = vrot.lane.b32.xlu0 %v1032_v22, %s4301_s11  ;;  %v5031_v22 = vsel %vm432_vm2, %v4677_v53, %v4681_v54 }
 0x2ff   : > { %8572 = vst [vmem:[#allocation47_spill] sm:$0xff] %v5031_v22 }
 0x300   : > { %1553 = vrot.lane.b32.xlu1 %v4960_v25, %s4318_s28 }
 0x302   : > { %1339 = vrot.lane.b32.xlu0 %v4993_v7, %s4314_s20 }
 0x304   : > { %1561 = vrot.lane.b32.xlu1 %v4970_v26, %s4318_s28 }
 0x306   : > { %1365 = vrot.lane.b32.xlu0 %v1046_v4, %s4325_s22  ;;  %v1031_v4 = vmul.f32 %v5031_v22, %v4960_v25 }
 0x308   : > { %1638 = vrot.lane.b32.xlu1 %v4960_v25, %s4301_s11 }
 0x30a   : > { %1388 = vrot.lane.b32.xlu0 %v1071_v6, %s4326_s23  ;;  %v846_v6 = vpop.f32.mrf.mxu0 }
 0x30c   : > { %1646 = vrot.lane.b32.xlu1 %v4970_v26, %s4301_s11 }
 0x30e   : > { %1411 = vrot.lane.b32.xlu0 %v1086_v31, %s4315_s25  ;;  %v1129_v31 = vmul.f32 %v4707_v63, %v4945_v41 }
 0x310   : > { %1743 = vrot.lane.b32.xlu1 %v4960_v25, %s8570_s21 }
 0x312   : > { %1433 = vrot.lane.b32.xlu0 %v1100_v40, %s8570_s21  ;;  %v847_v40 = vadd.f32 %v846_v6, %v4660_v49  ;;  %v5057_v6 = vsel %vm446_vm3, %v4685_v55, %v4687_v56 }
 0x313   : > { %8573 = vst [vmem:[#allocation48_spill] sm:$0xff] %v5057_v6 }
 0x314   : > { %1751 = vrot.lane.b32.xlu1 %v4970_v26, %s8570_s21  ;;  %v5047_v2 = vmul.f32 %v4985_v19, %v847_v40  ;;  %v1049_v40 = vmul.f32 %v4687_v56, %v4970_v26 }
 0x316   : > { %1445 = vrot.lane.b32.xlu0 %v4993_v7, %s4316_s12 }
 0x318   : > { %1987 = vrot.lane.b32.xlu1 %v1016_v51, %s4322_s24  ;;  %v1035_v51 = vmul.f32 %v4681_v54, %v4970_v26 }
 0x31a   : > { %1471 = vrot.lane.b32.xlu0 %v1114_v28, %s4327_s17  ;;  %v1144_v28 = vmul.f32 %v4711_v1, %v4945_v41 }
 0x31c   : > { %1319 = vrot.lane.b32.xlu1 %v1031_v4, %s4301_s11  ;;  %v1159_v4 = vmul.f32 %v4715_v5, %v4945_v41 }
 0x31e   : > { %1494 = vrot.lane.b32.xlu0 %v1129_v31, %s4328_s26  ;;  %v1045_v31 = vmul.f32 %v5057_v6, %v4960_v25 }
 0x320   : > { %1327 = vrot.lane.b32.xlu1 %v1035_v51, %s4301_s11  ;;  %v1174_v51 = vmul.f32 %v4719_v9, %v4945_v41 }
 0x322   : > { %1517 = vrot.lane.b32.xlu0 %v1144_v28, %s4317_s27  ;;  %v5072_v28 = vsel %vm1064_vm1, %v4689_v15, %v4691_v58  ;;  %vm1137_vm1 = vcmask 506880  }
 0x324   : > { %1345 = vrot.lane.b32.xlu1 %v5047_v2, %s4314_s20 }
 0x326   : > { %1539 = vrot.lane.b32.xlu0 %v1159_v4, %s4303_s15  ;;  %v1070_v4 = vmul.f32 %v5072_v28, %v4960_v25 }
 0x328   : > { %1363 = vrot.lane.b32.xlu1 %v1045_v31, %s4325_s22  ;;  %v1189_v31 = vmul.f32 %v4723_v16, %v4945_v41 }
 0x32a   : > { %1551 = vrot.lane.b32.xlu0 %v4993_v7, %s4318_s28 }
 0x32c   : > { %1371 = vrot.lane.b32.xlu1 %v1049_v40, %s4325_s22  ;;  %v1074_v40 = vmul.f32 %v4691_v58, %v4970_v26  ;;  %v1089_v58 = vmul.f32 %v4695_v14, %v4970_v26  ;;  %v1249_v14 = vmul.f32 %v4788_v39, %v4945_v41 }
 0x32e   : > { %1577 = vrot.lane.b32.xlu0 %v1174_v51, %s4329_s30  ;;  %v1204_v51 = vmul.f32 %v4727_v20, %v4945_v41 }
 0x330   : > { %1386 = vrot.lane.b32.xlu1 %v1070_v4, %s4326_s23  ;;  %v1085_v4 = vmul.f32 %v5088_v29, %v4960_v25 }
 0x332   : > { %1600 = vrot.lane.b32.xlu0 %v1189_v31, %s4330_s18  ;;  %v1234_v31 = vmul.f32 %v4784_v46, %v4945_v41 }
 0x334   : > { %1394 = vrot.lane.b32.xlu1 %v1074_v40, %s4326_s23  ;;  %v5104_v40 = vsel %vm460_vm4, %v4697_v60, %v4699_v12 }
 0x335   : > { %8574 = vst [vmem:[#allocation49_spill] sm:$0xff] %v5104_v40 }
 0x336   : > { %1623 = vrot.lane.b32.xlu0 %v1204_v51, %s4331_s29  ;;  %v1099_v51 = vmul.f32 %v5104_v40, %v4960_v25 }
 0x338   : > { %1409 = vrot.lane.b32.xlu1 %v1085_v4, %s4315_s25  ;;  %v1103_v4 = vmul.f32 %v4699_v12, %v4970_v26 }
 0x33a   : > { %1636 = vrot.lane.b32.xlu0 %v4993_v7, %s4301_s11 }
 0x33c   : > { %1417 = vrot.lane.b32.xlu1 %v1089_v58, %s4315_s25  ;;  %v1263_v58 = vmul.f32 %v4792_v45, %v4945_v41 }
 0x33e   : > { %1662 = vrot.lane.b32.xlu0 %v1234_v31, %s4314_s20  ;;  %v1277_v31 = vmul.f32 %v4796_v57, %v4945_v41 }
 0x340   : > { %1431 = vrot.lane.b32.xlu1 %v1099_v51, %s8570_s21  ;;  %v5126_v51 = vsel %vm474_vm5, %v4701_v61, %v4703_v62 }
 0x341   : > { %8575 = vst [vmem:[#allocation50_spill] sm:$0xff] %v5126_v51 }
 0x342   : > { %1684 = vrot.lane.b32.xlu0 %v1249_v14, %s4325_s22  ;;  %v1113_v14 = vmul.f32 %v5126_v51, %v4960_v25 }
 0x344   : > { %1439 = vrot.lane.b32.xlu1 %v1103_v4, %s8570_s21  ;;  %v1117_v4 = vmul.f32 %v4703_v62, %v4970_v26 }
 0x346   : > { %1706 = vrot.lane.b32.xlu0 %v1263_v58, %s4332_s16  ;;  %v1292_v58 = vmul.f32 %v4800_v36, %v4945_v41  ;;  %v1147_v41 = vmul.f32 %v4711_v1, %v4970_v26 }
 0x348   : > { %1451 = vrot.lane.b32.xlu1 %v5047_v2, %s4316_s12 }
 0x34a   : > { %1729 = vrot.lane.b32.xlu0 %v1277_v31, %s4315_s25  ;;  %v5141_v31 = vsel %vm1122_vm15, %v4705_v13, %v4707_v63  ;;  %vm1167_vm15 = vcmask 531456  }
 0x34c   : > { %1469 = vrot.lane.b32.xlu1 %v1113_v14, %s4327_s17  ;;  %v1128_v14 = vmul.f32 %v5141_v31, %v4960_v25 }
 0x34e   : > { %1741 = vrot.lane.b32.xlu0 %v4993_v7, %s8570_s21 }
 0x350   : > { %1477 = vrot.lane.b32.xlu1 %v1117_v4, %s4327_s17  ;;  %v1132_v4 = vmul.f32 %v4707_v63, %v4970_v26  ;;  %v1030_v63 = vmul.f32 %v4677_v53, %v4993_v7 }
 0x352   : > { %1767 = vrot.lane.b32.xlu0 %v1292_v58, %s4316_s12  ;;  %v5157_v58 = vsel %vm1137_vm1, %v4709_v0, %v4711_v1  ;;  %v1069_v1 = vmul.f32 %v4689_v15, %v4993_v7  ;;  %vm1182_vm1 = vcmask 539648  }
 0x354   : > { %1492 = vrot.lane.b32.xlu1 %v1128_v14, %s4328_s26  ;;  %v1143_v14 = vmul.f32 %v5157_v58, %v4960_v25 }
 0x356   : > { %1789 = vrot.lane.b32.xlu0 %v1307_v33, %s4327_s17 }
 0x358   : > { %1500 = vrot.lane.b32.xlu1 %v1132_v4, %s4328_s26 }
 0x35a   : > { %1811 = vrot.lane.b32.xlu0 %v1219_v18, %s4313_s19  ;;  %v1044_v18 = vmul.f32 %v4685_v55, %v4993_v7 }
 0x35c   : > { %v5162_v47 = vpop.permute.xlu0 %1343  ;;  %1515 = vrot.lane.b32.xlu1 %v1143_v14, %s4317_s27  ;;  %v5179_v14 = vsel %vm1152_vm6, %v4713_v3, %v4715_v5  ;;  %vm1197_vm6 = vcmask 637952  }
 0x35d   : > { %8576 = vst [vmem:[#allocation51_spill] sm:$0xff] %v5162_v47 }
 0x35e   : > { %1317 = vrot.lane.b32.xlu0 %v1030_v63, %s4301_s11  ;;  %v5168_v33 = vpop.permute.xlu1 %1991  ;;  %v1158_v63 = vmul.f32 %v5179_v14, %v4960_v25 }
 0x35f   : > { %8577 = vst [vmem:[#allocation52_spill] sm:$0xff] %v5168_v33 }
 0x360   : > { %v5172_v4 = vpop.permute.xlu0 %1449  ;;  %1523 = vrot.lane.b32.xlu1 %v1147_v41, %s4317_s27 }
 0x361   : > { %8578 = vst [vmem:[#allocation53_spill] sm:$0xff] %v5172_v4  ;;  %v1162_v4 = vmul.f32 %v4715_v5, %v4970_v26  ;;  %v1098_v5 = vmul.f32 %v4697_v60, %v4993_v7 }
 0x362   : > { %1361 = vrot.lane.b32.xlu0 %v1044_v18, %s4325_s22  ;;  %v5182_v47 = vpop.permute.xlu1 %1341 }
 0x363   : > { %8579 = vst [vmem:[#allocation54_spill] sm:$0xff] %v5182_v47  ;;  %v1084_v47 = vmul.f32 %v4693_v59, %v4993_v7 }
 0x364   : > { %v5186_v33 = vpop.permute.xlu0 %1555  ;;  %1537 = vrot.lane.b32.xlu1 %v1158_v63, %s4303_s15 }
 0x365   : > { %8580 = vst [vmem:[#allocation55_spill] sm:$0xff] %v5186_v33 }
 0x366   : > { %1384 = vrot.lane.b32.xlu0 %v1069_v1, %s4326_s23  ;;  %v5192_v41 = vpop.permute.xlu1 %1349  ;;  %v5212_v1 = vsel %vm1167_vm15, %v4717_v8, %v4719_v9  ;;  %vm1227_vm15 = vcmask 662528  }
 0x367   : > { %8581 = vst [vmem:[#allocation56_spill] sm:$0xff] %v5192_v41  ;;  %v1112_v41 = vmul.f32 %v4701_v61, %v4993_v7 }
 0x368   : > { %v5196_v18 = vpop.permute.xlu0 %1640  ;;  %1545 = vrot.lane.b32.xlu1 %v1162_v4, %s4303_s15 }
 0x369   : > { %8582 = vst [vmem:[#allocation57_spill] sm:$0xff] %v5196_v18 }
 0x36a   : > { %1407 = vrot.lane.b32.xlu0 %v1084_v47, %s4315_s25  ;;  %v5202_v63 = vpop.permute.xlu1 %1447  ;;  %v1173_v47 = vmul.f32 %v5212_v1, %v4960_v25 }
 0x36b   : > { %8583 = vst [vmem:[#allocation58_spill] sm:$0xff] %v5202_v63 }
 0x36c   : > { %v5204_v33 = vpop.permute.xlu0 %1745  ;;  %1557 = vrot.lane.b32.xlu1 %v5047_v2, %s4318_s28 }
 0x36d   : > { %8584 = vst [vmem:[#allocation59_spill] sm:$0xff] %v5204_v33 }
 0x36e   : > { %1429 = vrot.lane.b32.xlu0 %v1098_v5, %s8570_s21  ;;  %v5215_v4 = vpop.permute.xlu1 %1455  ;;  %v1177_v5 = vmul.f32 %v4719_v9, %v4970_v26  ;;  %v1142_v9 = vmul.f32 %v4709_v0, %v4993_v7 }
 0x36f   : > { %8585 = vst [vmem:[#allocation60_spill] sm:$0xff] %v5215_v4  ;;  %v1127_v4 = vmul.f32 %v4705_v13, %v4993_v7 }
 0x370   : > { %v5219_v63 = vpop.permute.xlu0 %1321  ;;  %1575 = vrot.lane.b32.xlu1 %v1173_v47, %s4329_s30  ;;  %v5236_v47 = vsel %vm1182_vm1, %v4721_v11, %v4723_v16  ;;  %vm1242_vm1 = vcmask 670720  }
 0x371   : > { %8586 = vst [vmem:[#allocation61_spill] sm:$0xff] %v5219_v63 }
 0x372   : > { %1467 = vrot.lane.b32.xlu0 %v1112_v41, %s4327_s17  ;;  %v5225_v33 = vpop.permute.xlu1 %1553  ;;  %v1188_v41 = vmul.f32 %v5236_v47, %v4960_v25 }
 0x373   : > { %8587 = vst [vmem:[#allocation62_spill] sm:$0xff] %v5225_v33 }
 0x374   : > { %v5229_v18 = vpop.permute.xlu0 %1339  ;;  %1583 = vrot.lane.b32.xlu1 %v1177_v5, %s4329_s30 }
 0x375   : > { %8588 = vst [vmem:[#allocation63_spill] sm:$0xff] %v5229_v18 }
 0x376   : > { %1490 = vrot.lane.b32.xlu0 %v1127_v4, %s4328_s26  ;;  %v5239_v63 = vpop.permute.xlu1 %1561  ;;  %v1192_v4 = vmul.f32 %v4723_v16, %v4970_v26  ;;  %v1172_v16 = vmul.f32 %v4717_v8, %v4993_v7 }
 0x377   : > { %8589 = vst [vmem:[#allocation64_spill] sm:$0xff] %v5239_v63  ;;  %v1157_v63 = vmul.f32 %v4713_v3, %v4993_v7 }
 0x378   : > { %v5243_v33 = vpop.permute.xlu0 %1365  ;;  %1598 = vrot.lane.b32.xlu1 %v1188_v41, %s4330_s18  ;;  %v5260_v41 = vsel %vm1197_vm6, %v4725_v17, %v4727_v20  ;;  %vm1011_vm6 = vcmask 244736  }
 0x379   : > { %8590 = vst [vmem:[#allocation65_spill] sm:$0xff] %v5243_v33 }
 0x37a   : > { %1513 = vrot.lane.b32.xlu0 %v1142_v9, %s4317_s27  ;;  %v5249_v5 = vpop.permute.xlu1 %1638  ;;  %v1203_v9 = vmul.f32 %v5260_v41, %v4960_v25 }
 0x37b   : > { %8591 = vst [vmem:[#allocation66_spill] sm:$0xff] %v5249_v5 }
 0x37c   : > { %v5253_v18 = vpop.permute.xlu0 %1388  ;;  %1606 = vrot.lane.b32.xlu1 %v1192_v4, %s4330_s18 }
 0x37d   : > { %8592 = vst [vmem:[#allocation67_spill] sm:$0xff] %v5253_v18  ;;  %v1207_v18 = vmul.f32 %v4727_v20, %v4970_v26  ;;  %v1202_v20 = vmul.f32 %v4725_v17, %v4993_v7 }
 0x37e   : > { %1535 = vrot.lane.b32.xlu0 %v1157_v63, %s4303_s15  ;;  %v5263_v33 = vpop.permute.xlu1 %1646 }
 0x37f   : > { %8593 = vst [vmem:[#allocation68_spill] sm:$0xff] %v5263_v33  ;;  %v1187_v33 = vmul.f32 %v4721_v11, %v4993_v7 }
 0x380   : > { %v5267_v5 = vpop.permute.xlu0 %1411  ;;  %1621 = vrot.lane.b32.xlu1 %v1203_v9, %s4331_s29 }
 0x381   : > { %8594 = vst [vmem:[#allocation69_spill] sm:$0xff] %v5267_v5 }
 0x382   : > { %1573 = vrot.lane.b32.xlu0 %v1172_v16, %s4329_s30  ;;  %v5273_v4 = vpop.permute.xlu1 %1743  ;;  %v5293_v16 = vsel %vm1227_vm15, %v4782_v32, %v4784_v46  ;;  %vm1285_vm15 = vcmask 793600  }
 0x383   : > { %8595 = vst [vmem:[#allocation70_spill] sm:$0xff] %v5273_v4 }
 0x384   : > { %v5277_v63 = vpop.permute.xlu0 %1433  ;;  %1629 = vrot.lane.b32.xlu1 %v1207_v18, %s4331_s29 }
 0x385   : > { %8596 = vst [vmem:[#allocation71_spill] sm:$0xff] %v5277_v63 }
 0x386   : > { %1596 = vrot.lane.b32.xlu0 %v1187_v33, %s4330_s18  ;;  %v5283_v9 = vpop.permute.xlu1 %1751  ;;  %v1233_v33 = vmul.f32 %v5293_v16, %v4960_v25 }
 0x387   : > { %8597 = vst [vmem:[#allocation72_spill] sm:$0xff] %v5283_v9 }
 0x388   : > { %v5285_v5 = vpop.permute.xlu0 %1445  ;;  %1642 = vrot.lane.b32.xlu1 %v5047_v2, %s4301_s11 }
 0x389   : > { %8598 = vst [vmem:[#allocation73_spill] sm:$0xff] %v5285_v5  ;;  %v1232_v5 = vmul.f32 %v4782_v32, %v4993_v7 }
 0x38a   : > { %1619 = vrot.lane.b32.xlu0 %v1202_v20, %s4331_s29  ;;  %v5296_v18 = vpop.permute.xlu1 %1987  ;;  %v1237_v20 = vmul.f32 %v4784_v46, %v4970_v26  ;;  %v1261_v46 = vmul.f32 %v4790_v30, %v4993_v7 }
 0x38b   : > { %8599 = vst [vmem:[#allocation74_spill] sm:$0xff] %v5296_v18  ;;  %v1247_v18 = vmul.f32 %v4786_v48, %v4993_v7 }
 0x38c   : > { %v5300_v9 = vpop.permute.xlu0 %1471  ;;  %1660 = vrot.lane.b32.xlu1 %v1233_v33, %s4314_s20  ;;  %v5317_v33 = vsel %vm1242_vm1, %v4786_v48, %v4788_v39  ;;  %vm8506_vm1 = vcmask 801792  }
 0x38d   : > { %8600 = vst [vmem:[#allocation75_spill] sm:$0xff] %v5300_v9 }
 0x38e   : > { %1658 = vrot.lane.b32.xlu0 %v1232_v5, %s4314_s20  ;;  %v5306_v4 = vpop.permute.xlu1 %1319  ;;  %v1248_v5 = vmul.f32 %v5317_v33, %v4960_v25 }
 0x38f   : > { %8601 = vst [vmem:[#allocation76_spill] sm:$0xff] %v5306_v4 }
 0x390   : > { %v5310_v63 = vpop.permute.xlu0 %1494  ;;  %1668 = vrot.lane.b32.xlu1 %v1237_v20, %s4314_s20 }
 0x391   : > { %8602 = vst [vmem:[#allocation77_spill] sm:$0xff] %v5310_v63  ;;  %v1252_v63 = vmul.f32 %v4788_v39, %v4970_v26 }
 0x392   : > { %1680 = vrot.lane.b32.xlu0 %v1247_v18, %s4325_s22  ;;  %v5320_v9 = vpop.permute.xlu1 %1327 }
 0x393   : > { %8603 = vst [vmem:[#allocation78_spill] sm:$0xff] %v5320_v9  ;;  %v1275_v9 = vmul.f32 %v4794_v43, %v4993_v7 }
 0x394   : > { %v5324_v4 = vpop.permute.xlu0 %1517  ;;  %1682 = vrot.lane.b32.xlu1 %v1248_v5, %s4325_s22  ;;  %v5342_v5 = vsel %vm599_vm14, %v4790_v30, %v4792_v45 }
 0x395   : > { %8604 = vst [vmem:[#allocation79_spill] sm:$0xff] %v5324_v4  ;;  %v1266_v4 = vmul.f32 %v4792_v45, %v4970_v26 }
 0x396   : > { %1702 = vrot.lane.b32.xlu0 %v1261_v46, %s4332_s16  ;;  %v5330_v20 = vpop.permute.xlu1 %1345 }
 0x397   : > { %8605 = vst [vmem:[#allocation80_spill] sm:$0xff] %v5330_v20  ;;  %v1262_v20 = vmul.f32 %v5342_v5, %v4960_v25 }
 0x398   : > { %v5334_v18 = vpop.permute.xlu0 %1539  ;;  %1690 = vrot.lane.b32.xlu1 %v1252_v63, %s4325_s22  ;;  %v1290_v63 = vmul.f32 %v4798_v35, %v4993_v7 }
 0x399   : > { %8606 = vst [vmem:[#allocation81_spill] sm:$0xff] %v5334_v18 }
 0x39a   : > { %1725 = vrot.lane.b32.xlu0 %v1275_v9, %s4315_s25  ;;  %v5345_v46 = vpop.permute.xlu1 %1363 }
 0x39b   : > { %8607 = vst [vmem:[#allocation82_spill] sm:$0xff] %v5345_v46  ;;  %v1305_v46 = vmul.f32 %v4802_v44, %v4993_v7 }
 0x39c   : > { %v5349_v39 = vpop.permute.xlu0 %1551  ;;  %1704 = vrot.lane.b32.xlu1 %v1262_v20, %s4332_s16  ;;  %v5367_v20 = vsel %vm8507_vm13, %v4794_v43, %v4796_v57 }
 0x39d   : > { %8608 = vst [vmem:[#allocation83_spill] sm:$0xff] %v5349_v39  ;;  %v1276_v39 = vmul.f32 %v5367_v20, %v4960_v25 }
 0x39e   : > { %1763 = vrot.lane.b32.xlu0 %v1290_v63, %s4316_s12  ;;  %v5355_v18 = vpop.permute.xlu1 %1371 }
 0x39f   : > { %8609 = vst [vmem:[#allocation84_spill] sm:$0xff] %v5355_v18 }
 0x3a0   : > { %v5359_v9 = vpop.permute.xlu0 %1577  ;;  %1712 = vrot.lane.b32.xlu1 %v1266_v4, %s4332_s16  ;;  %v1217_v4 = vmul.f32 %v4731_v23, %v4993_v7 }
 0x3a1   : > { %8610 = vst [vmem:[#allocation85_spill] sm:$0xff] %v5359_v9 }
 0x3a2   : > { %1785 = vrot.lane.b32.xlu0 %v1305_v46, %s4327_s17  ;;  %v5370_v63 = vpop.permute.xlu1 %1386  ;;  %v1280_v46 = vmul.f32 %v4796_v57, %v4970_v26 }
 0x3a3   : > { %8611 = vst [vmem:[#allocation86_spill] sm:$0xff] %v5370_v63  ;;  %v5386_v63 = vsel %vm1011_vm6, %v4669_v34, %v4673_v52  ;;  %vm1212_vm6 = vcmask 646144  }
 0x3a4   : > { %v5374_v45 = vpop.permute.xlu0 %1600  ;;  %1727 = vrot.lane.b32.xlu1 %v1276_v39, %s4315_s25  ;;  %v1017_v39 = vmul.f32 %v5386_v63, %v4960_v25 }
 0x3a5   : > { %8612 = vst [vmem:[#allocation87_spill] sm:$0xff] %v5374_v45  ;;  %v848_v45 = vpop.f32.mrf.mxu0 }
 0x3a6   : > { %1807 = vrot.lane.b32.xlu0 %v1217_v4, %s4313_s19  ;;  %v5380_v18 = vpop.permute.xlu1 %1394  ;;  %v849_v4 = vadd.f32 %v848_v45, %v4660_v49 }
 0x3a7   : > { %8613 = vst [vmem:[#allocation88_spill] sm:$0xff] %v5380_v18  ;;  %v1021_v18 = vmul.f32 %v4673_v52, %v4970_v26 }
 0x3a8   : > { %v5388_v9 = vpop.permute.xlu0 %1623  ;;  %1735 = vrot.lane.b32.xlu1 %v1280_v46, %s4315_s25  ;;  %v5405_v46 = vsel %vm1285_vm15, %v4798_v35, %v4800_v36  ;;  %v5413_v49 = vmul.f32 %v4950_v21, %v849_v4  ;;  %v5430_v4 = vsel %vm8506_vm1, %v4802_v44, %v4804_v42  ;;  %vm1631_vm15 = vcmask 654336  }
 0x3a9   : > { %8614 = vst [vmem:[#allocation89_spill] sm:$0xff] %v5388_v9  ;;  %vm1608_vm1 = vcmask 752640  }
 0x3aa   : > { %1989 = vrot.lane.b32.xlu0 %v1017_v39, %s4322_s24  ;;  %v5394_v7 = vpop.permute.xlu1 %1409  ;;  %v1291_v39 = vmul.f32 %v5405_v46, %v4960_v25 }
 0x3ab   : > { %8615 = vst [vmem:[#allocation90_spill] sm:$0xff] %v5394_v7 }
 0x3ac   : > { %v5397_v57 = vpop.permute.xlu0 %1636  ;;  %1747 = vrot.lane.b32.xlu1 %v5047_v2, %s8570_s21 }
 0x3ad   : > { %8616 = vst [vmem:[#allocation91_spill] sm:$0xff] %v5397_v57 }
 0x3ae   : > { %1997 = vrot.lane.b32.xlu0 %v1021_v18, %s4322_s24  ;;  %v5408_v9 = vpop.permute.xlu1 %1417  ;;  %v1295_v18 = vmul.f32 %v4800_v36, %v4970_v26 }
 0x3af   : > { %8617 = vst [vmem:[#allocation92_spill] sm:$0xff] %v5408_v9 }
 0x3b0   : > { %v5415_v45 = vpop.permute.xlu0 %1662  ;;  %1765 = vrot.lane.b32.xlu1 %v1291_v39, %s4316_s12 }
 0x3b2   : > { %1347 = vrot.lane.b32.xlu0 %v5413_v49, %s4314_s20  ;;  %v5420_v52 = vpop.permute.xlu1 %1431 }
 0x3b3   : > { %8618 = vst [vmem:[#allocation93_spill] sm:$0xff] %v5420_v52  ;;  %v1306_v52 = vmul.f32 %v5430_v4, %v4960_v25 }
 0x3b4   : > { %v5424_v7 = vpop.permute.xlu0 %1684  ;;  %1773 = vrot.lane.b32.xlu1 %v1295_v18, %s4316_s12  ;;  %v1310_v18 = vmul.f32 %v4804_v42, %v4970_v26 }
 0x3b5   : > { %8619 = vst [vmem:[#allocation94_spill] sm:$0xff] %v5424_v7 }
 0x3b6   : > { %1453 = vrot.lane.b32.xlu0 %v5413_v49, %s4316_s12  ;;  %v5434_v39 = vpop.permute.xlu1 %1439 }
 0x3b7   : > { %8620 = vst [vmem:[#allocation95_spill] sm:$0xff] %v5434_v39  ;;  %v5453_v39 = vsel %vm1212_vm6, %v4731_v23, %v4733_v24 }
 0x3b8   : > { %v5438_v9 = vpop.permute.xlu0 %1706  ;;  %1787 = vrot.lane.b32.xlu1 %v1306_v52, %s4327_s17 }
 0x3b9   : > { %8621 = vst [vmem:[#allocation96_spill] sm:$0xff] %v5438_v9 }
 0x3ba   : > { %1559 = vrot.lane.b32.xlu0 %v5413_v49, %s4318_s28  ;;  %v5443_v36 = vpop.permute.xlu1 %1451 }
 0x3bb   : > { %8622 = vst [vmem:[#allocation97_spill] sm:$0xff] %v5443_v36  ;;  %v1218_v36 = vmul.f32 %v5453_v39, %v4960_v25  ;;  %v1019_v25 = vmul.f32 %v4669_v34, %v5047_v2  ;;  %v1047_v34 = vmul.f32 %v4685_v55, %v5047_v2 }
 0x3bc   : > { %v5447_v57 = vpop.permute.xlu0 %1729  ;;  %1795 = vrot.lane.b32.xlu1 %v1310_v18, %s4327_s17  ;;  %v1222_v18 = vmul.f32 %v4733_v24, %v4970_v26 }
 0x3bd   : > { %8623 = vst [vmem:[#allocation98_spill] sm:$0xff] %v5447_v57  ;;  %v965_v57 = vadd.f32 %v4957_v38, %v4662_v50 }
 0x3be   : > { %1644 = vrot.lane.b32.xlu0 %v5413_v49, %s4301_s11  ;;  %v5457_v52 = vpop.permute.xlu1 %1469 }
 0x3bf   : > { %8624 = vst [vmem:[#allocation99_spill] sm:$0xff] %v5457_v52  ;;  %v1033_v52 = vmul.f32 %v4677_v53, %v5047_v2 }
 0x3c0   : > { %v5461_v9 = vpop.permute.xlu0 %1741  ;;  %1809 = vrot.lane.b32.xlu1 %v1218_v36, %s4313_s19 }
 0x3c2   : > { %1749 = vrot.lane.b32.xlu0 %v5413_v49, %s8570_s21  ;;  %v5466_v42 = vpop.permute.xlu1 %1477 }
 0x3c3   : > { %8625 = vst [vmem:[#allocation100_spill] sm:$0xff] %v5466_v42  ;;  %v5483_v42 = vmul.f32 %v4418_v10, %v965_v57 }
 0x3c4   : > { %v5472_v7 = vpop.permute.xlu0 %1767  ;;  %1817 = vrot.lane.b32.xlu1 %v1222_v18, %s4313_s19 }
 0x3c5   : > { %8627 = vst [vmem:[#allocation102_spill] sm:$0xff] %v5483_v42 }
 0x3c6   : > { %1993 = vrot.lane.b32.xlu0 %v1019_v25, %s4322_s24  ;;  %v5478_v36 = vpop.permute.xlu1 %1492 }
 0x3c7   : > { %8626 = vst [vmem:[#allocation101_spill] sm:$0xff] %v5478_v36 }
 0x3c8   : > { %v5485_v24 = vpop.permute.xlu0 %1789  ;;  %1323 = vrot.lane.b32.xlu1 %v1033_v52, %s4301_s11  ;;  %v1072_v52 = vmul.f32 %v4689_v15, %v5047_v2 }
 0x3ca   : > { %2855 = vrot.lane.b32.xlu0 %v5483_v42, %s4303_s15  ;;  %v5490_v38 = vpop.permute.xlu1 %1500 }
 0x3cc   : > { %v5494_v26 = vpop.permute.xlu0 %1811  ;;  %1367 = vrot.lane.b32.xlu1 %v1047_v34, %s4325_s22  ;;  %v1087_v34 = vmul.f32 %v4693_v59, %v5047_v2  ;;  %v1048_v59 = vmul.f32 %v5057_v6, %v5413_v49 }
 0x3cd   : > { %8628 = vst [vmem:[#allocation103_spill] sm:$0xff] %v5494_v26 }
 0x3ce   : > { %2795 = vrot.lane.b32.xlu0 %v5483_v42, %s8570_s21  ;;  %v5499_v57 = vpop.permute.xlu1 %1515 }
 0x3cf   : > { %8629 = vst [vmem:[#allocation104_spill] sm:$0xff] %v5499_v57  ;;  %v1034_v57 = vmul.f32 %v5031_v22, %v5413_v49 }
 0x3d0   : > { %v5503_v18 = vpop.permute.xlu0 %1317  ;;  %1390 = vrot.lane.b32.xlu1 %v1072_v52, %s4326_s23  ;;  %v1101_v52 = vmul.f32 %v4697_v60, %v5047_v2 }
 0x3d2   : > { %2735 = vrot.lane.b32.xlu0 %v5483_v42, %s4301_s11  ;;  %v5508_v25 = vpop.permute.xlu1 %1523 }
 0x3d4   : > { %v5512_v26 = vpop.permute.xlu0 %1361  ;;  %1413 = vrot.lane.b32.xlu1 %v1087_v34, %s4315_s25 }
 0x3d5   : > { %8630 = vst [vmem:[#allocation105_spill] sm:$0xff] %v5512_v26  ;;  %v1115_v26 = vmul.f32 %v4701_v61, %v5047_v2 }
 0x3d6   : > { %1325 = vrot.lane.b32.xlu0 %v1034_v57, %s4301_s11  ;;  %v5518_v15 = vpop.permute.xlu1 %1537 }
 0x3d7   : > { %8631 = vst [vmem:[#allocation106_spill] sm:$0xff] %v5518_v15  ;;  %v1073_v15 = vmul.f32 %v5072_v28, %v5413_v49  ;;  %v1145_v28 = vmul.f32 %v4709_v0, %v5047_v2  ;;  %v1116_v0 = vmul.f32 %v5126_v51, %v5413_v49 }
 0x3d8   : > { %v5522_v36 = vpop.permute.xlu0 %1384  ;;  %1435 = vrot.lane.b32.xlu1 %v1101_v52, %s8570_s21 }
 0x3d9   : > { %8632 = vst [vmem:[#allocation107_spill] sm:$0xff] %v5522_v36  ;;  %v1130_v36 = vmul.f32 %v4705_v13, %v5047_v2  ;;  %v1102_v13 = vmul.f32 %v5104_v40, %v5413_v49 }
 0x3da   : > { %1369 = vrot.lane.b32.xlu0 %v1048_v59, %s4325_s22  ;;  %v5528_v34 = vpop.permute.xlu1 %1545 }
 0x3db   : > { %8633 = vst [vmem:[#allocation108_spill] sm:$0xff] %v5528_v34  ;;  %v1088_v34 = vmul.f32 %v5088_v29, %v5413_v49  ;;  %v1160_v29 = vmul.f32 %v4713_v3, %v5047_v2  ;;  %v1131_v3 = vmul.f32 %v5141_v31, %v5413_v49  ;;  %v1205_v31 = vmul.f32 %v4725_v17, %v5047_v2 }
 0x3dc   : > { %v5532_v57 = vpop.permute.xlu0 %1407  ;;  %1473 = vrot.lane.b32.xlu1 %v1115_v26, %s4327_s17  ;;  %v1176_v17 = vmul.f32 %v5212_v1, %v5413_v49  ;;  %v1264_v1 = vmul.f32 %v4790_v30, %v5047_v2  ;;  %v1236_v30 = vmul.f32 %v5293_v16, %v5413_v49  ;;  %v1308_v16 = vmul.f32 %v4802_v44, %v5047_v2 }
 0x3dd   : > { %v1279_v44 = vmul.f32 %v5367_v20, %v5413_v49 }
 0x3de   : > { %1392 = vrot.lane.b32.xlu0 %v1073_v15, %s4326_s23  ;;  %v5538_v52 = vpop.permute.xlu1 %1557 }
 0x3df   : > { %8634 = vst [vmem:[#allocation109_spill] sm:$0xff] %v5538_v52  ;;  %v1175_v52 = vmul.f32 %v4717_v8, %v5047_v2  ;;  %v1146_v8 = vmul.f32 %v5157_v58, %v5413_v49  ;;  %v1235_v58 = vmul.f32 %v4782_v32, %v5047_v2  ;;  %v1191_v32 = vmul.f32 %v5236_v47, %v5413_v49 }
 0x3e0   : > { %v5542_v59 = vpop.permute.xlu0 %1429  ;;  %1496 = vrot.lane.b32.xlu1 %v1130_v36, %s4328_s26  ;;  %v1278_v47 = vmul.f32 %v4794_v43, %v5047_v2  ;;  %v1251_v43 = vmul.f32 %v5317_v33, %v5413_v49  ;;  %v1220_v33 = vmul.f32 %v4731_v23, %v5047_v2  ;;  %v1294_v23 = vmul.f32 %v5405_v46, %v5413_v49 }
 0x3e2   : > { %1415 = vrot.lane.b32.xlu0 %v1088_v34, %s4315_s25  ;;  %v5548_v26 = vpop.permute.xlu1 %1575 }
 0x3e3   : > { %8635 = vst [vmem:[#allocation110_spill] sm:$0xff] %v5548_v26  ;;  %v1190_v26 = vmul.f32 %v4721_v11, %v5047_v2  ;;  %v1161_v11 = vmul.f32 %v5179_v14, %v5413_v49  ;;  %v1250_v14 = vmul.f32 %v4786_v48, %v5047_v2  ;;  %v1206_v48 = vmul.f32 %v5260_v41, %v5413_v49 }
 0x3e4   : > { %v5552_v15 = vpop.permute.xlu0 %1467  ;;  %1519 = vrot.lane.b32.xlu1 %v1145_v28, %s4317_s27  ;;  %v1293_v41 = vmul.f32 %v4798_v35, %v5047_v2  ;;  %v1265_v35 = vmul.f32 %v5342_v5, %v5413_v49 }
 0x3e6   : > { %1437 = vrot.lane.b32.xlu0 %v1102_v13, %s8570_s21  ;;  %v5558_v36 = vpop.permute.xlu1 %1583 }
 0x3e8   : > { %v5562_v34 = vpop.permute.xlu0 %1490  ;;  %1541 = vrot.lane.b32.xlu1 %v1160_v29, %s4303_s15 }
 0x3ea   : > { %1475 = vrot.lane.b32.xlu0 %v1116_v0, %s4327_s17  ;;  %v5568_v28 = vpop.permute.xlu1 %1598 }
 0x3eb   : > { %8636 = vst [vmem:[#allocation111_spill] sm:$0xff] %v5568_v28 }
 0x3ec   : > { %v5572_v13 = vpop.permute.xlu0 %1513  ;;  %1579 = vrot.lane.b32.xlu1 %v1175_v52, %s4329_s30 }
 0x3ee   : > { %1498 = vrot.lane.b32.xlu0 %v1131_v3, %s4328_s26  ;;  %v5578_v29 = vpop.permute.xlu1 %1606 }
 0x3f0   : > { %v5582_v0 = vpop.permute.xlu0 %1535  ;;  %1602 = vrot.lane.b32.xlu1 %v1190_v26, %s4330_s18 }
 0x3f2   : > { %1521 = vrot.lane.b32.xlu0 %v1146_v8, %s4317_s27  ;;  %v5588_v52 = vpop.permute.xlu1 %1621 }
 0x3f4   : > { %v5592_v3 = vpop.permute.xlu0 %1573  ;;  %1625 = vrot.lane.b32.xlu1 %v1205_v31, %s4331_s29 }
 0x3f5   : > { %8637 = vst [vmem:[#allocation112_spill] sm:$0xff] %v5592_v3 }
 0x3f6   : > { %1543 = vrot.lane.b32.xlu0 %v1161_v11, %s4303_s15  ;;  %v5598_v26 = vpop.permute.xlu1 %1629 }
 0x3f8   : > { %v5602_v8 = vpop.permute.xlu0 %1596  ;;  %1664 = vrot.lane.b32.xlu1 %v1235_v58, %s4314_s20 }
 0x3f9   : > { %8638 = vst [vmem:[#allocation113_spill] sm:$0xff] %v5602_v8 }
 0x3fa   : > { %1581 = vrot.lane.b32.xlu0 %v1176_v17, %s4329_s30  ;;  %v5608_v31 = vpop.permute.xlu1 %1642  ;;  %s4233_s30 = smul.u32 176, %s9150_s14 }
 0x3fb   : > { %8639 = vst [vmem:[#allocation114_spill] sm:$0xff] %v5608_v31 }
 0x3fc   : > { %v5612_v11 = vpop.permute.xlu0 %1619  ;;  %1686 = vrot.lane.b32.xlu1 %v1250_v14, %s4325_s22 }
 0x3fd   : > { %8640 = vst [vmem:[#allocation115_spill] sm:$0xff] %v5612_v11  ;;  %v8652_v11 = vld [vmem:[#allocation5_spill] sm:$0xff] }
 0x3fe   : > { %1604 = vrot.lane.b32.xlu0 %v1191_v32, %s4330_s18  ;;  %v5618_v58 = vpop.permute.xlu1 %1660 }
 0x400   : > { %v5622_v17 = vpop.permute.xlu0 %1658  ;;  %1708 = vrot.lane.b32.xlu1 %v1264_v1, %s4332_s16 }
 0x402   : > { %1627 = vrot.lane.b32.xlu0 %v1206_v48, %s4331_s29  ;;  %v5628_v14 = vpop.permute.xlu1 %1668 }
 0x404   : > { %v5632_v32 = vpop.permute.xlu0 %1680  ;;  %1731 = vrot.lane.b32.xlu1 %v1278_v47, %s4315_s25 }
 0x406   : > { %1666 = vrot.lane.b32.xlu0 %v1236_v30, %s4314_s20  ;;  %v5638_v1 = vpop.permute.xlu1 %1682 }
 0x408   : > { %v5642_v48 = vpop.permute.xlu0 %1702  ;;  %1769 = vrot.lane.b32.xlu1 %v1293_v41, %s4316_s12 }
 0x40a   : > { %1688 = vrot.lane.b32.xlu0 %v1251_v43, %s4325_s22  ;;  %v5648_v47 = vpop.permute.xlu1 %1690  ;;  %v852_v43 = vpop.f32.mrf.mxu0 }
 0x40c   : > { %v5652_v30 = vpop.permute.xlu0 %1725  ;;  %1791 = vrot.lane.b32.xlu1 %v1308_v16, %s4327_s17  ;;  %v853_v16 = vadd.f32 %v852_v43, %v4662_v50 }
 0x40e   : > { %1710 = vrot.lane.b32.xlu0 %v1265_v35, %s4332_s16  ;;  %v5658_v41 = vpop.permute.xlu1 %1704  ;;  %v1020_v35 = vmul.f32 %v5386_v63, %v5413_v49  ;;  %v5679_v2 = vmul.f32 %v4985_v19, %v853_v16  ;;  %v1309_v63 = vmul.f32 %v5430_v4, %v5413_v49 }
 0x410   : > { %v5662_v3 = vpop.permute.xlu0 %1763  ;;  %1813 = vrot.lane.b32.xlu1 %v1220_v33, %s4313_s19  ;;  %8641 = vst [vmem:[#allocation116_spill] sm:$0xff] %v5679_v2 }
 0x412   : > { %1733 = vrot.lane.b32.xlu0 %v1279_v44, %s4315_s25  ;;  %v5669_v5 = vpop.permute.xlu1 %1712  ;;  %v1221_v44 = vmul.f32 %v5453_v39, %v5413_v49  ;;  %v8648_v39 = vld [vmem:[#allocation14_spill] sm:$0xff] }
 0x414   : > { %v5673_v31 = vpop.permute.xlu0 %1785  ;;  %1995 = vrot.lane.b32.xlu1 %v1020_v35, %s4322_s24  ;;  %v8645_v35 = vld [vmem:[#allocation7_spill] sm:$0xff] }
 0x415   : > { %v5705_v4 = vsel %vm460_vm4, %v4699_v12, %v8645_v35  ;;  %v854_v12 = vpop.f32.mrf.mxu0  ;;  %vm1396_vm4 = vcmask 1014784  }
 0x416   : > { %1771 = vrot.lane.b32.xlu0 %v1294_v23, %s4316_s12  ;;  %v5682_v20 = vpop.permute.xlu1 %1727 }
 0x418   : > { %v5684_v33 = vpop.permute.xlu0 %1807  ;;  %2851 = vrot.lane.b32.xlu1 %v5679_v2, %s4303_s15 }
 0x419   : > { %8642 = vst [vmem:[#allocation117_spill] sm:$0xff] %v5684_v33 }
 0x41a   : > { %1793 = vrot.lane.b32.xlu0 %v1309_v63, %s4327_s17  ;;  %v5691_v43 = vpop.permute.xlu1 %1735  ;;  %v2713_v63 = vmul.f32 %v5705_v4, %v5483_v42 }
 0x41c   : > { %v5693_v46 = vpop.permute.xlu0 %1989  ;;  %2791 = vrot.lane.b32.xlu1 %v5679_v2, %s8570_s21 }
 0x41d   : > { %8643 = vst [vmem:[#allocation118_spill] sm:$0xff] %v5693_v46  ;;  %v8647_v46 = vld [vmem:[#allocation8_spill] sm:$0xff] }
 0x41e   : > { %1815 = vrot.lane.b32.xlu0 %v1221_v44, %s4313_s19  ;;  %v5700_v16 = vpop.permute.xlu1 %1747  ;;  %v2717_v49 = vsel %vm474_vm5, %v4703_v62, %v8647_v46  ;;  %v970_v44 = vadd.f32 %v4967_v27, %v8648_v39  ;;  %v855_v27 = vadd.f32 %v854_v12, %v4662_v50  ;;  %vm1502_vm5 = vcmask 883712  }
 0x41f   : > { %8644 = vst [vmem:[#allocation119_spill] sm:$0xff] %v5700_v16  ;;  %v2721_v35 = vmul.f32 %v2717_v49, %v5483_v42 }
 0x420   : > { %v5707_v23 = vpop.permute.xlu0 %1997  ;;  %2731 = vrot.lane.b32.xlu1 %v5679_v2, %s4301_s11  ;;  %v5751_v12 = vmul.f32 %v4950_v21, %v855_v27 }
 0x421   : > { %8646 = vst [vmem:[#allocation7_spill] sm:$0xff] %v5707_v23  ;;  %v8649_v23 = vld [vmem:[#allocation6_spill] sm:$0xff] }
 0x422   : > { %2839 = vrot.lane.b32.xlu0 %v2713_v63, %s4317_s27  ;;  %v5719_v33 = vpop.permute.xlu1 %1765  ;;  %v5725_v16 = vsel %vm446_vm3, %v4687_v56, %v8649_v23  ;;  %v5734_v63 = vmul.f32 %v4418_v10, %v970_v44  ;;  %v5742_v23 = vsel %vm432_vm2, %v4681_v54, %v8652_v11  ;;  %8654 = vst [vmem:[#allocation5_spill] sm:$0xff] %v5751_v12  ;;  %vm1714_vm2 = vcmask 924672  }
 0x423   : > { %v2705_v46 = vmul.f32 %v5725_v16, %v5483_v42  ;;  %v2697_v50 = vmul.f32 %v5742_v23, %v5483_v42  ;;  %vm1479_vm3 = vcmask 891904  }
 0x424   : > { %v5727_v8 = vpop.permute.xlu0 %1347  ;;  %2877 = vrot.lane.b32.xlu1 %v2721_v35, %s4318_s28  ;;  %8651 = vst [vmem:[#allocation14_spill] sm:$0xff] %v5734_v63  ;;  %v8655_v35 = vld [vmem:[#allocation3_spill] sm:$0xff] }
 0x425   : > { %8650 = vst [vmem:[#allocation8_spill] sm:$0xff] %v5727_v8  ;;  %v5759_v11 = vsel %vm418_vm0, %v4812_v37, %v8655_v35  ;;  %v858_v35 = vpop.f32.mrf.mxu0  ;;  %v2719_v8 = vmul.f32 %v4701_v61, %v5679_v2 }
 0x426   : > { %2817 = vrot.lane.b32.xlu0 %v2705_v46, %s4316_s12  ;;  %v5737_v62 = vpop.permute.xlu1 %1773  ;;  %v2689_v54 = vmul.f32 %v5759_v11, %v5483_v42  ;;  %v2703_v42 = vmul.f32 %v4685_v55, %v5679_v2 }
 0x428   : > { %v5744_v56 = vpop.permute.xlu0 %1453  ;;  %2861 = vrot.lane.b32.xlu1 %v5734_v63, %s4303_s15 }
 0x429   : > { %8653 = vst [vmem:[#allocation6_spill] sm:$0xff] %v5744_v56 }
 0x42a   : > { %2779 = vrot.lane.b32.xlu0 %v2697_v50, %s4315_s25  ;;  %v5754_v44 = vpop.permute.xlu1 %1787  ;;  %v2711_v50 = vmul.f32 %v4697_v60, %v5679_v2 }
 0x42c   : > { %v5761_v46 = vpop.permute.xlu0 %1559  ;;  %2853 = vrot.lane.b32.xlu1 %v5751_v12, %s4303_s15 }
 0x42d   : > { %8656 = vst [vmem:[#allocation3_spill] sm:$0xff] %v5761_v46 }
 0x42e   : > { %2757 = vrot.lane.b32.xlu0 %v2689_v54, %s4314_s20  ;;  %v5768_v27 = vpop.permute.xlu1 %1795  ;;  %v859_v54 = vadd.f32 %v858_v35, %v8648_v39 }
 0x430   : > { %v5772_v10 = vpop.permute.xlu0 %1644  ;;  %2835 = vrot.lane.b32.xlu1 %v2711_v50, %s4317_s27 }
 0x431   : > { %8657 = vst [vmem:[#allocation120_spill] sm:$0xff] %v5772_v10  ;;  %v5791_v10 = vmul.f32 %v4985_v19, %v859_v54  ;;  %v2695_v54 = vmul.f32 %v4677_v53, %v5679_v2 }
 0x432   : > { %2741 = vrot.lane.b32.xlu0 %v5734_v63, %s4301_s11  ;;  %v5777_v46 = vpop.permute.xlu1 %1809 }
 0x433   : > { %8658 = vst [vmem:[#allocation121_spill] sm:$0xff] %v5777_v46  ;;  %8661 = vst [vmem:[#allocation124_spill] sm:$0xff] %v5791_v10 }
 0x434   : > { %v5782_v56 = vpop.permute.xlu0 %1749  ;;  %2813 = vrot.lane.b32.xlu1 %v2703_v42, %s4316_s12 }
 0x435   : > { %8659 = vst [vmem:[#allocation122_spill] sm:$0xff] %v5782_v56 }
 0x436   : > { %2873 = vrot.lane.b32.xlu0 %v2719_v8, %s4318_s28  ;;  %v5788_v50 = vpop.permute.xlu1 %1817 }
 0x437   : > { %8660 = vst [vmem:[#allocation123_spill] sm:$0xff] %v5788_v50  ;;  %v860_v50 = vpop.f32.mrf.mxu0 }
 0x438   : > { %v5793_v46 = vpop.permute.xlu0 %1993  ;;  %2801 = vrot.lane.b32.xlu1 %v5734_v63, %s8570_s21  ;;  %v861_v28 = vadd.f32 %v860_v50, %v8648_v39 }
 0x439   : > { %8662 = vst [vmem:[#allocation125_spill] sm:$0xff] %v5793_v46  ;;  %v2724_v46 = vmul.f32 %v2717_v49, %v5734_v63 }
 0x43a   : > { %2857 = vrot.lane.b32.xlu0 %v5791_v10, %s4303_s15  ;;  %v5799_v35 = vpop.permute.xlu1 %1323 }
 0x43b   : > { %8663 = vst [vmem:[#allocation126_spill] sm:$0xff] %v5799_v35  ;;  %v8668_v35 = vld [vmem:[#allocation27_spill] sm:$0xff] }
 0x43c   : > { %v5801_v42 = vpop.permute.xlu0 %2855  ;;  %2793 = vrot.lane.b32.xlu1 %v5751_v12, %s8570_s21  ;;  %v2687_v56 = vmul.f32 %v8668_v35, %v5679_v2 }
 0x43d   : > { %8664 = vst [vmem:[#allocation127_spill] sm:$0xff] %v5801_v42 }
 0x43e   : > { %2797 = vrot.lane.b32.xlu0 %v5791_v10, %s8570_s21  ;;  %v5807_v8 = vpop.permute.xlu1 %1367 }
 0x43f   : > { %8665 = vst [vmem:[#allocation128_spill] sm:$0xff] %v5807_v8 }
 0x440   : > { %v5811_v19 = vpop.permute.xlu0 %2795  ;;  %2775 = vrot.lane.b32.xlu1 %v2695_v54, %s4315_s25 }
 0x441   : > { %8666 = vst [vmem:[#allocation129_spill] sm:$0xff] %v5811_v19  ;;  %v2720_v19 = vmul.f32 %v5126_v51, %v5751_v12 }
 0x442   : > { %2883 = vrot.lane.b32.xlu0 %v2724_v46, %s4318_s28  ;;  %v5816_v42 = vpop.permute.xlu1 %1390  ;;  %v5830_v46 = vmul.f32 %v4950_v21, %v861_v28  ;;  %v2712_v21 = vmul.f32 %v5104_v40, %v5751_v12 }
 0x443   : > { %8667 = vst [vmem:[#allocation130_spill] sm:$0xff] %v5816_v42  ;;  %v8720_v42 = vld [vmem:[#allocation69_spill] sm:$0xff] }
 0x444   : > { %v5821_v8 = vpop.permute.xlu0 %2735  ;;  %2753 = vrot.lane.b32.xlu1 %v2687_v56, %s4314_s20  ;;  %8671 = vst [vmem:[#allocation133_spill] sm:$0xff] %v5830_v46  ;;  %v2716_v56 = vmul.f32 %v5705_v4, %v5734_v63  ;;  %v2706_v4 = vmul.f32 %v4685_v55, %v5791_v10 }
 0x445   : > { %8669 = vst [vmem:[#allocation131_spill] sm:$0xff] %v5821_v8 }
 0x446   : > { %2875 = vrot.lane.b32.xlu0 %v2720_v19, %s4318_s28  ;;  %v5827_v49 = vpop.permute.xlu1 %1413  ;;  %v2714_v19 = vmul.f32 %v4697_v60, %v5791_v10  ;;  %v2708_v60 = vmul.f32 %v5725_v16, %v5734_v63 }
 0x447   : > { %8670 = vst [vmem:[#allocation132_spill] sm:$0xff] %v5827_v49  ;;  %v8717_v49 = vld [vmem:[#allocation67_spill] sm:$0xff] }
 0x448   : > { %v5832_v54 = vpop.permute.xlu0 %1325  ;;  %2733 = vrot.lane.b32.xlu1 %v5751_v12, %s4301_s11 }
 0x449   : > { %8672 = vst [vmem:[#allocation134_spill] sm:$0xff] %v5832_v54 }
 0x44a   : > { %2859 = vrot.lane.b32.xlu0 %v5830_v46, %s4303_s15  ;;  %v5838_v39 = vpop.permute.xlu1 %1435 }
 0x44b   : > { %8673 = vst [vmem:[#allocation135_spill] sm:$0xff] %v5838_v39  ;;  %v8714_v39 = vld [vmem:[#allocation65_spill] sm:$0xff] }
 0x44c   : > { %v5842_v50 = vpop.permute.xlu0 %1369  ;;  %2845 = vrot.lane.b32.xlu1 %v2716_v56, %s4317_s27 }
 0x44d   : > { %8674 = vst [vmem:[#allocation136_spill] sm:$0xff] %v5842_v50  ;;  %v8724_v50 = vld [vmem:[#allocation71_spill] sm:$0xff] }
 0x44e   : > { %2841 = vrot.lane.b32.xlu0 %v2714_v19, %s4317_s27  ;;  %v5848_v28 = vpop.permute.xlu1 %1473 }
 0x44f   : > { %8675 = vst [vmem:[#allocation137_spill] sm:$0xff] %v5848_v28 }
 0x450   : > { %v5852_v2 = vpop.permute.xlu0 %1392  ;;  %2837 = vrot.lane.b32.xlu1 %v2712_v21, %s4317_s27  ;;  %v2704_v21 = vmul.f32 %v5057_v6, %v5751_v12 }
 0x451   : > { %8676 = vst [vmem:[#allocation138_spill] sm:$0xff] %v5852_v2  ;;  %v8721_v2 = vld [vmem:[#allocation89_spill] sm:$0xff] }
 0x452   : > { %2819 = vrot.lane.b32.xlu0 %v2706_v4, %s4316_s12  ;;  %v5858_v56 = vpop.permute.xlu1 %1496  ;;  %v2698_v4 = vmul.f32 %v4677_v53, %v5791_v10  ;;  %v2696_v53 = vmul.f32 %v5031_v22, %v5751_v12 }
 0x453   : > { %8677 = vst [vmem:[#allocation139_spill] sm:$0xff] %v5858_v56 }
 0x454   : > { %v5862_v19 = vpop.permute.xlu0 %1415  ;;  %2823 = vrot.lane.b32.xlu1 %v2708_v60, %s4316_s12  ;;  %v2700_v60 = vmul.f32 %v5742_v23, %v5734_v63  ;;  %v2715_v23 = vmul.f32 %v5104_v40, %v5830_v46 }
 0x455   : > { %8678 = vst [vmem:[#allocation140_spill] sm:$0xff] %v5862_v19 }
 0x456   : > { %2799 = vrot.lane.b32.xlu0 %v5830_v46, %s8570_s21  ;;  %v5867_v8 = vpop.permute.xlu1 %1519 }
 0x457   : > { %8679 = vst [vmem:[#allocation141_spill] sm:$0xff] %v5867_v8  ;;  %v2690_v8 = vmul.f32 %v8668_v35, %v5791_v10 }
 0x458   : > { %v5871_v55 = vpop.permute.xlu0 %1437  ;;  %2815 = vrot.lane.b32.xlu1 %v2704_v21, %s4316_s12 }
 0x459   : > { %8680 = vst [vmem:[#allocation142_spill] sm:$0xff] %v5871_v55 }
 0x45a   : > { %2781 = vrot.lane.b32.xlu0 %v2698_v4, %s4315_s25  ;;  %v5877_v16 = vpop.permute.xlu1 %1541 }
 0x45b   : > { %8681 = vst [vmem:[#allocation143_spill] sm:$0xff] %v5877_v16  ;;  %v2692_v16 = vmul.f32 %v5759_v11, %v5734_v63 }
 0x45c   : > { %v5881_v56 = vpop.permute.xlu0 %1475  ;;  %2785 = vrot.lane.b32.xlu1 %v2700_v60, %s4315_s25 }
 0x45d   : > { %8682 = vst [vmem:[#allocation144_spill] sm:$0xff] %v5881_v56 }
 0x45e   : > { %2759 = vrot.lane.b32.xlu0 %v2690_v8, %s4314_s20  ;;  %v5887_v21 = vpop.permute.xlu1 %1579 }
 0x45f   : > { %8683 = vst [vmem:[#allocation145_spill] sm:$0xff] %v5887_v21  ;;  %v2707_v21 = vmul.f32 %v5057_v6, %v5830_v46 }
 0x460   : > { %v5891_v4 = vpop.permute.xlu0 %1498  ;;  %2777 = vrot.lane.b32.xlu1 %v2696_v53, %s4315_s25  ;;  %v5909_v53 = vsel %vm418_vm0, %v8668_v35, %v4812_v37  ;;  %vm1373_vm0 = vcmask 1022976  }
 0x461   : > { %8684 = vst [vmem:[#allocation146_spill] sm:$0xff] %v5891_v4  ;;  %8687 = vst [vmem:[#allocation149_spill] sm:$0xff] %v5909_v53  ;;  %v2688_v40 = vmul.f32 %v5909_v53, %v5751_v12  ;;  %v2722_v12 = vmul.f32 %v4701_v61, %v5791_v10  ;;  %v8711_v4 = vld [vmem:[#allocation98_spill] sm:$0xff] }
 0x462   : > { %2843 = vrot.lane.b32.xlu0 %v2715_v23, %s4317_s27  ;;  %v5897_v60 = vpop.permute.xlu1 %1602 }
 0x463   : > { %8685 = vst [vmem:[#allocation147_spill] sm:$0xff] %v5897_v60 }
 0x464   : > { %v5901_v8 = vpop.permute.xlu0 %1521  ;;  %2763 = vrot.lane.b32.xlu1 %v2692_v16, %s4314_s20  ;;  %v2699_v16 = vmul.f32 %v5031_v22, %v5830_v46 }
 0x465   : > { %8686 = vst [vmem:[#allocation148_spill] sm:$0xff] %v5901_v8  ;;  %v8710_v8 = vld [vmem:[#allocation61_spill] sm:$0xff] }
 0x466   : > { %2821 = vrot.lane.b32.xlu0 %v2707_v21, %s4316_s12  ;;  %v5912_v23 = vpop.permute.xlu1 %1625  ;;  %v2691_v21 = vmul.f32 %v5909_v53, %v5830_v46 }
 0x467   : > { %8688 = vst [vmem:[#allocation150_spill] sm:$0xff] %v5912_v23  ;;  %v8703_v23 = vld [vmem:[#allocation94_spill] sm:$0xff] }
 0x468   : > { %v5916_v11 = vpop.permute.xlu0 %1543  ;;  %2755 = vrot.lane.b32.xlu1 %v2688_v40, %s4314_s20 }
 0x469   : > { %8689 = vst [vmem:[#allocation151_spill] sm:$0xff] %v5916_v11  ;;  %v2723_v11 = vmul.f32 %v5126_v51, %v5830_v46 }
 0x46a   : > { %2783 = vrot.lane.b32.xlu0 %v2699_v16, %s4315_s25  ;;  %v5922_v6 = vpop.permute.xlu1 %1664  ;;  %v8694_v16 = vld [vmem:[#allocation57_spill] sm:$0xff] }
 0x46b   : > { %8690 = vst [vmem:[#allocation152_spill] sm:$0xff] %v5922_v6 }
 0x46c   : > { %v5924_v35 = vpop.permute.xlu0 %1581  ;;  %2737 = vrot.lane.b32.xlu1 %v5791_v10, %s4301_s11 }
 0x46d   : > { %8691 = vst [vmem:[#allocation153_spill] sm:$0xff] %v5924_v35 }
 0x46e   : > { %2761 = vrot.lane.b32.xlu0 %v2691_v21, %s4314_s20  ;;  %v5931_v37 = vpop.permute.xlu1 %1686  ;;  %v8697_v21 = vld [vmem:[#allocation59_spill] sm:$0xff] }
 0x46f   : > { %8692 = vst [vmem:[#allocation154_spill] sm:$0xff] %v5931_v37  ;;  %v8737_v37 = vld [vmem:[#allocation66_spill] sm:$0xff] }
 0x470   : > { %v5933_v40 = vpop.permute.xlu0 %1604  ;;  %2739 = vrot.lane.b32.xlu1 %v5830_v46, %s4301_s11  ;;  %v8706_v46 = vld [vmem:[#allocation53_spill] sm:$0xff] }
 0x471   : > { %8693 = vst [vmem:[#allocation155_spill] sm:$0xff] %v5933_v40 }
 0x472   : > { %1823 = vrot.lane.b32.xlu0 %v8694_v16, %s4313_s19  ;;  %v5939_v22 = vpop.permute.xlu1 %1708 }
 0x473   : > { %8695 = vst [vmem:[#allocation57_spill] sm:$0xff] %v5939_v22  ;;  %v8733_v22 = vld [vmem:[#allocation60_spill] sm:$0xff] }
 0x474   : > { %v5943_v63 = vpop.permute.xlu0 %1627  ;;  %2879 = vrot.lane.b32.xlu1 %v2722_v12, %s4318_s28  ;;  %v8702_v12 = vld [vmem:[#allocation51_spill] sm:$0xff] }
 0x475   : > { %8696 = vst [vmem:[#allocation156_spill] sm:$0xff] %v5943_v63 }
 0x476   : > { %1883 = vrot.lane.b32.xlu0 %v8697_v21, %s4313_s19  ;;  %v5948_v53 = vpop.permute.xlu1 %1731 }
 0x477   : > { %8698 = vst [vmem:[#allocation59_spill] sm:$0xff] %v5948_v53  ;;  %v8729_v53 = vld [vmem:[#allocation56_spill] sm:$0xff] }
 0x478   : > { %v5952_v35 = vpop.permute.xlu0 %1666  ;;  %2881 = vrot.lane.b32.xlu1 %v2723_v11, %s4318_s28  ;;  %v8707_v11 = vld [vmem:[#allocation96_spill] sm:$0xff] }
 0x479   : > { %8699 = vst [vmem:[#allocation157_spill] sm:$0xff] %v5952_v35 }
 0x47a   : > { %1835 = vrot.lane.b32.xlu0 %v5415_v45, %s4313_s19  ;;  %v5957_v61 = vpop.permute.xlu1 %1769 }
 0x47b   : > { %8700 = vst [vmem:[#allocation158_spill] sm:$0xff] %v5957_v61  ;;  %v8725_v61 = vld [vmem:[#allocation85_spill] sm:$0xff] }
 0x47c   : > { %v5959_v10 = vpop.permute.xlu0 %1688  ;;  %2015 = vrot.lane.b32.xlu1 %v8702_v12, %s4322_s24 }
 0x47d   : > { %8701 = vst [vmem:[#allocation159_spill] sm:$0xff] %v5959_v10 }
 0x47e   : > { %1847 = vrot.lane.b32.xlu0 %v8703_v23, %s4313_s19  ;;  %v5965_v63 = vpop.permute.xlu1 %1791 }
 0x47f   : > { %8704 = vst [vmem:[#allocation51_spill] sm:$0xff] %v5965_v63 }
 0x480   : > { %v5967_v51 = vpop.permute.xlu0 %1710  ;;  %2075 = vrot.lane.b32.xlu1 %v8706_v46, %s4322_s24 }
 0x481   : > { %8705 = vst [vmem:[#allocation94_spill] sm:$0xff] %v5967_v51  ;;  %v8741_v51 = vld [vmem:[#allocation81_spill] sm:$0xff] }
 0x482   : > { %1859 = vrot.lane.b32.xlu0 %v8707_v11, %s4313_s19  ;;  %v5973_v60 = vpop.permute.xlu1 %1813 }
 0x483   : > { %8708 = vst [vmem:[#allocation53_spill] sm:$0xff] %v5973_v60 }
 0x484   : > { %v5975_v40 = vpop.permute.xlu0 %1733  ;;  %2003 = vrot.lane.b32.xlu1 %v8710_v8, %s4322_s24 }
 0x485   : > { %8709 = vst [vmem:[#allocation96_spill] sm:$0xff] %v5975_v40  ;;  %v8738_v40 = vld [vmem:[#allocation91_spill] sm:$0xff] }
 0x486   : > { %1871 = vrot.lane.b32.xlu0 %v8711_v4, %s4313_s19  ;;  %v5981_v28 = vpop.permute.xlu1 %1995  ;;  %v1648_v6 = vsel %vm491_vm7, %v8738_v40, %v8737_v37  ;;  %v8745_v40 = vld [vmem:[#allocation87_spill] sm:$0xff] }
 0x487   : > { %8712 = vst [vmem:[#allocation61_spill] sm:$0xff] %v5981_v28 }
 0x488   : > { %v5983_v56 = vpop.permute.xlu0 %1771  ;;  %2027 = vrot.lane.b32.xlu1 %v8714_v39, %s4322_s24 }
 0x489   : > { %8713 = vst [vmem:[#allocation98_spill] sm:$0xff] %v5983_v56 }
 0x48a   : > { %1895 = vrot.lane.b32.xlu0 %v5472_v7, %s4313_s19  ;;  %v5989_v55 = vpop.permute.xlu1 %2851 }
 0x48b   : > { %8715 = vst [vmem:[#allocation65_spill] sm:$0xff] %v5989_v55 }
 0x48c   : > { %v5991_v60 = vpop.permute.xlu0 %1793  ;;  %2039 = vrot.lane.b32.xlu1 %v8717_v49, %s4322_s24 }
 0x48d   : > { %8716 = vst [vmem:[#allocation160_spill] sm:$0xff] %v5991_v60 }
 0x48e   : > { %1907 = vrot.lane.b32.xlu0 %v5485_v24, %s4313_s19  ;;  %v5997_v19 = vpop.permute.xlu1 %2791 }
 0x48f   : > { %8718 = vst [vmem:[#allocation67_spill] sm:$0xff] %v5997_v19 }
 0x490   : > { %v5999_v28 = vpop.permute.xlu0 %1815  ;;  %2051 = vrot.lane.b32.xlu1 %v8720_v42, %s4322_s24 }
 0x491   : > { %8719 = vst [vmem:[#allocation161_spill] sm:$0xff] %v5999_v28  ;;  %v8728_v28 = vld [vmem:[#allocation75_spill] sm:$0xff] }
 0x492   : > { %2171 = vrot.lane.b32.xlu0 %v8721_v2, %s4322_s24  ;;  %v6005_v63 = vpop.permute.xlu1 %2731 }
 0x493   : > { %8722 = vst [vmem:[#allocation69_spill] sm:$0xff] %v6005_v63 }
 0x494   : > { %v6007_v55 = vpop.permute.xlu0 %2839  ;;  %2063 = vrot.lane.b32.xlu1 %v8724_v50, %s4322_s24 }
 0x495   : > { %8723 = vst [vmem:[#allocation89_spill] sm:$0xff] %v6007_v55  ;;  %v8732_v55 = vld [vmem:[#allocation77_spill] sm:$0xff] }
 0x496   : > { %2147 = vrot.lane.b32.xlu0 %v8725_v61, %s4322_s24  ;;  %v6013_v54 = vpop.permute.xlu1 %2877 }
 0x497   : > { %8726 = vst [vmem:[#allocation71_spill] sm:$0xff] %v6013_v54 }
 0x498   : > { %v6015_v19 = vpop.permute.xlu0 %2817  ;;  %2087 = vrot.lane.b32.xlu1 %v8728_v28, %s4322_s24 }
 0x499   : > { %8727 = vst [vmem:[#allocation162_spill] sm:$0xff] %v6015_v19  ;;  %v8736_v19 = vld [vmem:[#allocation79_spill] sm:$0xff] }
 0x49a   : > { %2021 = vrot.lane.b32.xlu0 %v8729_v53, %s4322_s24  ;;  %v6021_v60 = vpop.permute.xlu1 %2861 }
 0x49b   : > { %8730 = vst [vmem:[#allocation75_spill] sm:$0xff] %v6021_v60 }
 0x49c   : > { %v6023_v63 = vpop.permute.xlu0 %2779  ;;  %2099 = vrot.lane.b32.xlu1 %v8732_v55, %s4322_s24 }
 0x49d   : > { %8731 = vst [vmem:[#allocation163_spill] sm:$0xff] %v6023_v63 }
 0x49e   : > { %2081 = vrot.lane.b32.xlu0 %v8733_v22, %s4322_s24  ;;  %v6029_v56 = vpop.permute.xlu1 %2853  ;;  %v8742_v22 = vld [vmem:[#allocation70_spill] sm:$0xff] }
 0x49f   : > { %8734 = vst [vmem:[#allocation77_spill] sm:$0xff] %v6029_v56 }
 0x4a0   : > { %v6031_v54 = vpop.permute.xlu0 %2757  ;;  %2111 = vrot.lane.b32.xlu1 %v8736_v19, %s4322_s24 }
 0x4a1   : > { %8735 = vst [vmem:[#allocation164_spill] sm:$0xff] %v6031_v54  ;;  %v1753_v54 = vsel %vm537_vm10, %v5461_v9, %v8742_v22  ;;  %v8749_v9 = vld [vmem:[#allocation68_spill] sm:$0xff] }
 0x4a2   : > { %1819 = vrot.lane.b32.xlu0 %v1648_v6, %s4313_s19  ;;  %v6039_v63 = vpop.permute.xlu1 %2835  ;;  %v8746_v6 = vld [vmem:[#allocation54_spill] sm:$0xff] }
 0x4a3   : > { %8739 = vst [vmem:[#allocation79_spill] sm:$0xff] %v6039_v63 }
 0x4a4   : > { %v6041_v60 = vpop.permute.xlu0 %2741  ;;  %2123 = vrot.lane.b32.xlu1 %v8741_v51, %s4322_s24 }
 0x4a5   : > { %8740 = vst [vmem:[#allocation66_spill] sm:$0xff] %v6041_v60  ;;  %v1352_v60 = vsel %vm507_vm8, %v8746_v6, %v8702_v12  ;;  %v8753_v12 = vld [vmem:[#allocation72_spill] sm:$0xff] }
 0x4a6   : > { %1879 = vrot.lane.b32.xlu0 %v1753_v54, %s4313_s19  ;;  %v6049_v56 = vpop.permute.xlu1 %2813  ;;  %v8750_v54 = vld [vmem:[#allocation58_spill] sm:$0xff] }
 0x4a7   : > { %8743 = vst [vmem:[#allocation91_spill] sm:$0xff] %v6049_v56 }
 0x4a8   : > { %v6051_v10 = vpop.permute.xlu0 %2873  ;;  %2159 = vrot.lane.b32.xlu1 %v8745_v40, %s4322_s24 }
 0x4a9   : > { %8744 = vst [vmem:[#allocation81_spill] sm:$0xff] %v6051_v10  ;;  %v1458_v10 = vsel %vm553_vm11, %v8750_v54, %v8706_v46 }
 0x4aa   : > { %2013 = vrot.lane.b32.xlu0 %v1352_v60, %s4322_s24  ;;  %v6059_v63 = vpop.permute.xlu1 %2801  ;;  %v8754_v60 = vld [vmem:[#allocation78_spill] sm:$0xff] }
 0x4ab   : > { %8747 = vst [vmem:[#allocation70_spill] sm:$0xff] %v6059_v63 }
 0x4ac   : > { %v6061_v53 = vpop.permute.xlu0 %2857  ;;  %1829 = vrot.lane.b32.xlu1 %v8749_v9, %s4313_s19 }
 0x4ad   : > { %8748 = vst [vmem:[#allocation87_spill] sm:$0xff] %v6061_v53  ;;  %v1649_v53 = vsel %vm491_vm7, %v8737_v37, %v8694_v16 }
 0x4ae   : > { %2073 = vrot.lane.b32.xlu0 %v1458_v10, %s4322_s24  ;;  %v6069_v56 = vpop.permute.xlu1 %2793  ;;  %v8757_v10 = vld [vmem:[#allocation84_spill] sm:$0xff] }
 0x4af   : > { %8751 = vst [vmem:[#allocation54_spill] sm:$0xff] %v6069_v56 }
 0x4b0   : > { %v6071_v35 = vpop.permute.xlu0 %2797  ;;  %1889 = vrot.lane.b32.xlu1 %v8753_v12, %s4313_s19 }
 0x4b1   : > { %8752 = vst [vmem:[#allocation68_spill] sm:$0xff] %v6071_v35  ;;  %v1754_v35 = vsel %vm537_vm10, %v8742_v22, %v8697_v21 }
 0x4b2   : > { %2009 = vrot.lane.b32.xlu0 %v8754_v60, %s4322_s24  ;;  %v6077_v63 = vpop.permute.xlu1 %2775 }
 0x4b3   : > { %8755 = vst [vmem:[#allocation58_spill] sm:$0xff] %v6077_v63  ;;  %v8760_v63 = vld [vmem:[#allocation88_spill] sm:$0xff] }
 0x4b4   : > { %v6082_v61 = vpop.permute.xlu0 %2883  ;;  %1821 = vrot.lane.b32.xlu1 %v1649_v53, %s4313_s19  ;;  %v8762_v53 = vld [vmem:[#allocation63_spill] sm:$0xff] }
 0x4b5   : > { %8756 = vst [vmem:[#allocation72_spill] sm:$0xff] %v6082_v61  ;;  %v1351_v16 = vsel %vm507_vm8, %v8762_v53, %v8746_v6 }
 0x4b6   : > { %2033 = vrot.lane.b32.xlu0 %v8757_v10, %s4322_s24  ;;  %v6087_v46 = vpop.permute.xlu1 %2753 }
 0x4b7   : > { %8758 = vst [vmem:[#allocation78_spill] sm:$0xff] %v6087_v46  ;;  %v8764_v46 = vld [vmem:[#allocation92_spill] sm:$0xff] }
 0x4b8   : > { %v6092_v56 = vpop.permute.xlu0 %2875  ;;  %1881 = vrot.lane.b32.xlu1 %v1754_v35, %s4313_s19  ;;  %v8766_v35 = vld [vmem:[#allocation73_spill] sm:$0xff] }
 0x4b9   : > { %8759 = vst [vmem:[#allocation84_spill] sm:$0xff] %v6092_v56  ;;  %v1457_v21 = vsel %vm553_vm11, %v8766_v35, %v8750_v54 }
 0x4ba   : > { %2045 = vrot.lane.b32.xlu0 %v8760_v63, %s4322_s24  ;;  %v6097_v37 = vpop.permute.xlu1 %2733 }
 0x4bb   : > { %8761 = vst [vmem:[#allocation88_spill] sm:$0xff] %v6097_v37  ;;  %v8768_v37 = vld [vmem:[#allocation95_spill] sm:$0xff] }
 0x4bc   : > { %v6102_v61 = vpop.permute.xlu0 %2859  ;;  %2011 = vrot.lane.b32.xlu1 %v1351_v16, %s4322_s24  ;;  %v8771_v16 = vld [vmem:[#allocation100_spill] sm:$0xff] }
 0x4bd   : > { %8763 = vst [vmem:[#allocation63_spill] sm:$0xff] %v6102_v61 }
 0x4be   : > { %2057 = vrot.lane.b32.xlu0 %v8764_v46, %s4322_s24  ;;  %v6107_v22 = vpop.permute.xlu1 %2845 }
 0x4bf   : > { %8765 = vst [vmem:[#allocation92_spill] sm:$0xff] %v6107_v22 }
 0x4c0   : > { %v6112_v56 = vpop.permute.xlu0 %2841  ;;  %2071 = vrot.lane.b32.xlu1 %v1457_v21, %s4322_s24 }
 0x4c1   : > { %8767 = vst [vmem:[#allocation73_spill] sm:$0xff] %v6112_v56 }
 0x4c2   : > { %2069 = vrot.lane.b32.xlu0 %v8768_v37, %s4322_s24  ;;  %v6117_v6 = vpop.permute.xlu1 %2837 }
 0x4c3   : > { %8769 = vst [vmem:[#allocation95_spill] sm:$0xff] %v6117_v6 }
 0x4c4   : > { %v6119_v53 = vpop.permute.xlu0 %2819  ;;  %1841 = vrot.lane.b32.xlu1 %v5628_v14, %s4313_s19 }
 0x4c5   : > { %8770 = vst [vmem:[#allocation165_spill] sm:$0xff] %v6119_v53 }
 0x4c6   : > { %2093 = vrot.lane.b32.xlu0 %v8771_v16, %s4322_s24  ;;  %v6125_v22 = vpop.permute.xlu1 %2823 }
 0x4c7   : > { %8772 = vst [vmem:[#allocation100_spill] sm:$0xff] %v6125_v22 }
 0x4c8   : > { %v6127_v54 = vpop.permute.xlu0 %2799  ;;  %1853 = vrot.lane.b32.xlu1 %v5648_v47, %s4313_s19 }
 0x4c9   : > { %8773 = vst [vmem:[#allocation166_spill] sm:$0xff] %v6127_v54 }
 0x4ca   : > { %2105 = vrot.lane.b32.xlu0 %v5490_v38, %s4322_s24  ;;  %v6133_v35 = vpop.permute.xlu1 %2815 }
 0x4cb   : > { %8774 = vst [vmem:[#allocation167_spill] sm:$0xff] %v6133_v35 }
 0x4cc   : > { %v6135_v21 = vpop.permute.xlu0 %2781  ;;  %1865 = vrot.lane.b32.xlu1 %v5669_v5, %s4313_s19 }
 0x4cd   : > { %8775 = vst [vmem:[#allocation168_spill] sm:$0xff] %v6135_v21 }
 0x4ce   : > { %2117 = vrot.lane.b32.xlu0 %v5508_v25, %s4322_s24  ;;  %v6141_v53 = vpop.permute.xlu1 %2785 }
 0x4cf   : > { %8776 = vst [vmem:[#allocation169_spill] sm:$0xff] %v6141_v53 }
 0x4d0   : > { %v6143_v22 = vpop.permute.xlu0 %2759  ;;  %1877 = vrot.lane.b32.xlu1 %v5691_v43, %s4313_s19 }
 0x4d1   : > { %8777 = vst [vmem:[#allocation170_spill] sm:$0xff] %v6143_v22 }
 0x4d2   : > { %2177 = vrot.lane.b32.xlu0 %v5598_v26, %s4322_s24  ;;  %v6149_v54 = vpop.permute.xlu1 %2777 }
 0x4d3   : > { %8778 = vst [vmem:[#allocation171_spill] sm:$0xff] %v6149_v54  ;;  %v1671_v54 = vsel %vm507_vm8, %v5618_v58, %v5415_v45  ;;  %v1692_v45 = vsel %vm1373_vm0, %v5632_v32, %v5638_v1  ;;  %v1738_v32 = vsel %vm523_vm9, %v5682_v20, %v8711_v4  ;;  %v1775_v4 = vsel %vm553_vm11, %v5662_v3, %v5719_v33 }
 0x4d4   : > { %v6151_v35 = vpop.permute.xlu0 %2843  ;;  %1901 = vrot.lane.b32.xlu1 %v5737_v62, %s4313_s19 }
 0x4d5   : > { %8779 = vst [vmem:[#allocation172_spill] sm:$0xff] %v6151_v35 }
 0x4d6   : > { %2165 = vrot.lane.b32.xlu0 %v5578_v29, %s4322_s24  ;;  %v6157_v21 = vpop.permute.xlu1 %2763 }
 0x4d7   : > { %8780 = vst [vmem:[#allocation173_spill] sm:$0xff] %v6157_v21  ;;  %v1670_v21 = vsel %vm507_vm8, %v5622_v17, %v5618_v58  ;;  %v1716_v17 = vsel %vm1714_vm2, %v5658_v41, %v8707_v11  ;;  %v1737_v11 = vsel %vm523_vm9, %v5652_v30, %v5682_v20  ;;  %v1798_v20 = vsel %vm1479_vm3, %v5754_v44, %v5485_v24 }
 0x4d8   : > { %v6159_v53 = vpop.permute.xlu0 %2821  ;;  %1913 = vrot.lane.b32.xlu1 %v5768_v27, %s4313_s19 }
 0x4d9   : > { %8781 = vst [vmem:[#allocation174_spill] sm:$0xff] %v6159_v53 }
 0x4da   : > { %2153 = vrot.lane.b32.xlu0 %v5558_v36, %s4322_s24  ;;  %v6165_v22 = vpop.permute.xlu1 %2755 }
 0x4db   : > { %8782 = vst [vmem:[#allocation175_spill] sm:$0xff] %v6165_v22  ;;  %v1693_v22 = vsel %vm1373_vm0, %v5638_v1, %v8703_v23  ;;  %v1715_v23 = vsel %vm1714_vm2, %v5642_v48, %v5658_v41  ;;  %v1776_v48 = vsel %vm553_vm11, %v5719_v33, %v5472_v7  ;;  %v1797_v7 = vsel %vm1479_vm3, %v5673_v31, %v5754_v44  ;;  %v8790_v33 = vld [vmem:[#allocation76_spill] sm:$0xff]  ;;  %v8792_v31 = vld [vmem:[#allocation82_spill] sm:$0xff]  ;;  %v8793_v44 = vld [vmem:[#allocation105_spill] sm:$0xff] }
 0x4dc   : > { %v6170_v56 = vpop.permute.xlu0 %2783  ;;  %1833 = vrot.lane.b32.xlu1 %v1671_v54, %s4313_s19  ;;  %v1330_v24 = vsel %vm491_vm7, %v8790_v33, %v8710_v8 }
 0x4dd   : > { %8783 = vst [vmem:[#allocation176_spill] sm:$0xff] %v6170_v56 }
 0x4de   : > { %1831 = vrot.lane.b32.xlu0 %v1670_v21, %s4313_s19  ;;  %v6177_v53 = vpop.permute.xlu1 %2737 }
 0x4df   : > { %8784 = vst [vmem:[#allocation177_spill] sm:$0xff] %v6177_v53 }
 0x4e0   : > { %v6182_v6 = vpop.permute.xlu0 %2761  ;;  %1845 = vrot.lane.b32.xlu1 %v1693_v22, %s4313_s19 }
 0x4e1   : > { %8785 = vst [vmem:[#allocation178_spill] sm:$0xff] %v6182_v6  ;;  %v8825_v6 = vld [vmem:[#allocation97_spill] sm:$0xff] }
 0x4e2   : > { %1843 = vrot.lane.b32.xlu0 %v1692_v45, %s4313_s19  ;;  %v6189_v58 = vpop.permute.xlu1 %2739 }
 0x4e3   : > { %8786 = vst [vmem:[#allocation179_spill] sm:$0xff] %v6189_v58 }
 0x4e4   : > { %v6194_v54 = vpop.permute.xlu0 %1823  ;;  %1857 = vrot.lane.b32.xlu1 %v1716_v17, %s4313_s19  ;;  %v1329_v17 = vsel %vm491_vm7, %v5503_v18, %v8790_v33  ;;  %v1375_v18 = vsel %vm1373_vm0, %v8792_v31, %v8714_v39 }
 0x4e6   : > { %1855 = vrot.lane.b32.xlu0 %v1715_v23, %s4313_s19  ;;  %v6201_v22 = vpop.permute.xlu1 %2879 }
 0x4e7   : > { %8787 = vst [vmem:[#allocation180_spill] sm:$0xff] %v6201_v22 }
 0x4e8   : > { %v6206_v1 = vpop.permute.xlu0 %1883  ;;  %1869 = vrot.lane.b32.xlu1 %v1738_v32, %s4313_s19 }
 0x4ea   : > { %1867 = vrot.lane.b32.xlu0 %v1737_v11, %s4313_s19  ;;  %v6213_v21 = vpop.permute.xlu1 %2881  ;;  %v1374_v11 = vsel %vm1373_vm0, %v8793_v44, %v8792_v31 }
 0x4eb   : > { %8788 = vst [vmem:[#allocation181_spill] sm:$0xff] %v6213_v21 }
 0x4ec   : > { %v6218_v41 = vpop.permute.xlu0 %1835  ;;  %1893 = vrot.lane.b32.xlu1 %v1776_v48, %s4313_s19 }
 0x4ee   : > { %1891 = vrot.lane.b32.xlu0 %v1775_v4, %s4313_s19  ;;  %v6225_v30 = vpop.permute.xlu1 %2015  ;;  %v8795_v4 = vld [vmem:[#allocation86_spill] sm:$0xff] }
 0x4ef   : > { %8789 = vst [vmem:[#allocation182_spill] sm:$0xff] %v6225_v30 }
 0x4f0   : > { %v6230_v45 = vpop.permute.xlu0 %1847  ;;  %1905 = vrot.lane.b32.xlu1 %v1798_v20, %s4313_s19  ;;  %v8796_v20 = vld [vmem:[#allocation107_spill] sm:$0xff] }
 0x4f2   : > { %1903 = vrot.lane.b32.xlu0 %v1797_v7, %s4313_s19  ;;  %v6237_v3 = vpop.permute.xlu1 %2075  ;;  %v1397_v7 = vsel %vm1396_vm4, %v8796_v20, %v8795_v4 }
 0x4f4   : > { %v6242_v23 = vpop.permute.xlu0 %1859  ;;  %1999 = vrot.lane.b32.xlu1 %v1329_v17, %s4322_s24  ;;  %v1398_v17 = vsel %vm1396_vm4, %v8795_v4, %v8717_v49  ;;  %v8798_v49 = vld [vmem:[#allocation93_spill] sm:$0xff] }
 0x4f5   : > { %v1441_v4 = vsel %vm537_vm10, %v5542_v59, %v8798_v49 }
 0x4f6   : > { %2001 = vrot.lane.b32.xlu0 %v1330_v24, %s4322_s24  ;;  %v6249_v32 = vpop.permute.xlu1 %2003  ;;  %v8797_v24 = vld [vmem:[#allocation90_spill] sm:$0xff] }
 0x4f7   : > { %8791 = vst [vmem:[#allocation76_spill] sm:$0xff] %v6249_v32  ;;  %v1419_v31 = vsel %vm523_vm9, %v5532_v57, %v8797_v24  ;;  %v1442_v57 = vsel %vm537_vm10, %v8798_v49, %v8724_v50 }
 0x4f8   : > { %v6254_v48 = vpop.permute.xlu0 %1871  ;;  %2023 = vrot.lane.b32.xlu1 %v1374_v11, %s4322_s24  ;;  %v1420_v11 = vsel %vm523_vm9, %v8797_v24, %v8720_v42  ;;  %v8800_v42 = vld [vmem:[#allocation99_spill] sm:$0xff] }
 0x4f9   : > { %v1481_v59 = vsel %vm1479_vm3, %v8800_v42, %v8728_v28 }
 0x4fa   : > { %2025 = vrot.lane.b32.xlu0 %v1375_v18, %s4322_s24  ;;  %v6261_v8 = vpop.permute.xlu1 %2027 }
 0x4fb   : > { %8794 = vst [vmem:[#allocation82_spill] sm:$0xff] %v6261_v8 }
 0x4fc   : > { %v6266_v33 = vpop.permute.xlu0 %1895  ;;  %2035 = vrot.lane.b32.xlu1 %v1397_v7, %s4322_s24 }
 0x4fe   : > { %2037 = vrot.lane.b32.xlu0 %v1398_v17, %s4322_s24  ;;  %v6273_v39 = vpop.permute.xlu1 %2039  ;;  %v1480_v17 = vsel %vm1479_vm3, %v5552_v15, %v8800_v42 }
 0x500   : > { %v6278_v44 = vpop.permute.xlu0 %1907  ;;  %2047 = vrot.lane.b32.xlu1 %v1419_v31, %s4322_s24  ;;  %v8803_v31 = vld [vmem:[#allocation101_spill] sm:$0xff] }
 0x501   : > { %v1504_v15 = vsel %vm1502_vm5, %v8803_v31, %v8732_v55  ;;  %v8808_v55 = vld [vmem:[#allocation106_spill] sm:$0xff] }
 0x502   : > { %2049 = vrot.lane.b32.xlu0 %v1420_v11, %s4322_s24  ;;  %v6285_v18 = vpop.permute.xlu1 %2051  ;;  %v1503_v11 = vsel %vm1502_vm5, %v5562_v34, %v8803_v31 }
 0x504   : > { %v6290_v20 = vpop.permute.xlu0 %2171  ;;  %2059 = vrot.lane.b32.xlu1 %v1441_v4, %s4322_s24  ;;  %v8806_v4 = vld [vmem:[#allocation104_spill] sm:$0xff] }
 0x505   : > { %8799 = vst [vmem:[#allocation105_spill] sm:$0xff] %v6290_v20  ;;  %v1526_v34 = vsel %vm569_vm12, %v8806_v4, %v8736_v19 }
 0x506   : > { %2061 = vrot.lane.b32.xlu0 %v1442_v57, %s4322_s24  ;;  %v6297_v7 = vpop.permute.xlu1 %2063  ;;  %v1525_v57 = vsel %vm569_vm12, %v5572_v13, %v8806_v4  ;;  %v1548_v13 = vsel %vm8507_vm13, %v8808_v55, %v8741_v51 }
 0x508   : > { %v6302_v24 = vpop.permute.xlu0 %2147  ;;  %2083 = vrot.lane.b32.xlu1 %v1480_v17, %s4322_s24 }
 0x509   : > { %8801 = vst [vmem:[#allocation86_spill] sm:$0xff] %v6302_v24 }
 0x50a   : > { %2085 = vrot.lane.b32.xlu0 %v1481_v59, %s4322_s24  ;;  %v6309_v50 = vpop.permute.xlu1 %2087  ;;  %v1547_v59 = vsel %vm8507_vm13, %v5582_v0, %v8808_v55  ;;  %v8810_v0 = vld [vmem:[#allocation111_spill] sm:$0xff]  ;;  %vm1585_vm13 = vcmask 760832  }
 0x50b   : > { %8802 = vst [vmem:[#allocation107_spill] sm:$0xff] %v6309_v50  ;;  %v1610_v4 = vsel %vm1608_vm1, %v8810_v0, %v8745_v40  ;;  %v8815_v40 = vld [vmem:[#allocation113_spill] sm:$0xff] }
 0x50c   : > { %v6314_v49 = vpop.permute.xlu0 %2021  ;;  %2095 = vrot.lane.b32.xlu1 %v1503_v11, %s4322_s24  ;;  %v1633_v11 = vsel %vm1631_vm15, %v5588_v52, %v8721_v2  ;;  %v8814_v2 = vld [vmem:[#allocation120_spill] sm:$0xff] }
 0x50d   : > { %8804 = vst [vmem:[#allocation90_spill] sm:$0xff] %v6314_v49  ;;  %v8877_v49 = vld [vmem:[#allocation103_spill] sm:$0xff] }
 0x50e   : > { %2097 = vrot.lane.b32.xlu0 %v1504_v15, %s4322_s24  ;;  %v6321_v28 = vpop.permute.xlu1 %2099 }
 0x50f   : > { %8805 = vst [vmem:[#allocation93_spill] sm:$0xff] %v6321_v28 }
 0x510   : > { %v6326_v42 = vpop.permute.xlu0 %2081  ;;  %2107 = vrot.lane.b32.xlu1 %v1525_v57, %s4322_s24  ;;  %v8812_v57 = vld [vmem:[#allocation115_spill] sm:$0xff] }
 0x512   : > { %2109 = vrot.lane.b32.xlu0 %v1526_v34, %s4322_s24  ;;  %v6333_v17 = vpop.permute.xlu1 %2111  ;;  %v1632_v34 = vsel %vm1631_vm15, %v8812_v57, %v5588_v52  ;;  %v8816_v52 = vld [vmem:[#allocation122_spill] sm:$0xff] }
 0x513   : > { %8807 = vst [vmem:[#allocation99_spill] sm:$0xff] %v6333_v17  ;;  %v1756_v57 = vsel %vm537_vm10, %v8816_v52, %v8753_v12  ;;  %v8822_v12 = vld [vmem:[#allocation114_spill] sm:$0xff] }
 0x514   : > { %v6338_v31 = vpop.permute.xlu0 %1819  ;;  %2119 = vrot.lane.b32.xlu1 %v1547_v59, %s4322_s24  ;;  %v1651_v59 = vsel %vm491_vm7, %v8814_v2, %v8749_v9 }
 0x516   : > { %2121 = vrot.lane.b32.xlu0 %v1548_v13, %s4322_s24  ;;  %v6345_v19 = vpop.permute.xlu1 %2123 }
 0x517   : > { %8809 = vst [vmem:[#allocation101_spill] sm:$0xff] %v6345_v19 }
 0x518   : > { %v6350_v15 = vpop.permute.xlu0 %1879  ;;  %2169 = vrot.lane.b32.xlu1 %v1633_v11, %s4322_s24  ;;  %v1609_v11 = vsel %vm1608_vm1, %v8815_v40, %v8810_v0  ;;  %v8820_v0 = vld [vmem:[#allocation8_spill] sm:$0xff] }
 0x519   : > { %v8821_v40 = vld [vmem:[#allocation80_spill] sm:$0xff] }
 0x51a   : > { %2157 = vrot.lane.b32.xlu0 %v1610_v4, %s4322_s24  ;;  %v6357_v51 = vpop.permute.xlu1 %2159 }
 0x51b   : > { %8811 = vst [vmem:[#allocation104_spill] sm:$0xff] %v6357_v51 }
 0x51c   : > { %v6362_v55 = vpop.permute.xlu0 %2013  ;;  %2167 = vrot.lane.b32.xlu1 %v1632_v34, %s4322_s24  ;;  %v8817_v34 = vld [vmem:[#allocation85_spill] sm:$0xff] }
 0x51d   : > { %8813 = vst [vmem:[#allocation106_spill] sm:$0xff] %v6362_v55  ;;  %v8876_v55 = vld [vmem:[#allocation123_spill] sm:$0xff] }
 0x51e   : > { %1827 = vrot.lane.b32.xlu0 %v1651_v59, %s4313_s19  ;;  %v6369_v13 = vpop.permute.xlu1 %1829  ;;  %v8818_v59 = vld [vmem:[#allocation110_spill] sm:$0xff] }
 0x51f   : > { %v1587_v22 = vsel %vm1585_vm13, %v8818_v59, %v8817_v34  ;;  %v8824_v34 = vld [vmem:[#allocation6_spill] sm:$0xff] }
 0x520   : > { %v6374_v4 = vpop.permute.xlu0 %2073  ;;  %2155 = vrot.lane.b32.xlu1 %v1609_v11, %s4322_s24  ;;  %v1353_v11 = vsel %vm507_vm8, %v8821_v40, %v8820_v0  ;;  %v8826_v40 = vld [vmem:[#allocation119_spill] sm:$0xff] }
 0x522   : > { %1887 = vrot.lane.b32.xlu0 %v1756_v57, %s4313_s19  ;;  %v6381_v9 = vpop.permute.xlu1 %1889  ;;  %v1650_v57 = vsel %vm491_vm7, %v8822_v12, %v8814_v2  ;;  %v8827_v2 = vld [vmem:[#allocation157_spill] sm:$0xff] }
 0x523   : > { %v1673_v12 = vsel %vm507_vm8, %v8827_v2, %v5628_v14  ;;  %v8831_v14 = vld [vmem:[#allocation60_spill] sm:$0xff] }
 0x524   : > { %v6386_v21 = vpop.permute.xlu0 %2009  ;;  %2145 = vrot.lane.b32.xlu1 %v1587_v22, %s4322_s24  ;;  %v1459_v22 = vsel %vm553_vm11, %v8825_v6, %v8824_v34  ;;  %v8829_v6 = vld [vmem:[#allocation56_spill] sm:$0xff] }
 0x525   : > { %8819 = vst [vmem:[#allocation111_spill] sm:$0xff] %v6386_v21 }
 0x526   : > { %2017 = vrot.lane.b32.xlu0 %v1353_v11, %s4322_s24  ;;  %v6393_v53 = vpop.permute.xlu1 %1821  ;;  %v1755_v11 = vsel %vm537_vm10, %v8826_v40, %v8816_v52  ;;  %v8830_v52 = vld [vmem:[#allocation159_spill] sm:$0xff] }
 0x527   : > { %v1695_v40 = vsel %vm1373_vm0, %v8830_v52, %v5648_v47  ;;  %v8833_v47 = vld [vmem:[#allocation152_spill] sm:$0xff] }
 0x528   : > { %v6398_v58 = vpop.permute.xlu0 %2033  ;;  %1825 = vrot.lane.b32.xlu1 %v1650_v57, %s4313_s19 }
 0x529   : > { %8823 = vst [vmem:[#allocation115_spill] sm:$0xff] %v6398_v58 }
 0x52a   : > { %2077 = vrot.lane.b32.xlu0 %v1459_v22, %s4322_s24  ;;  %v6405_v56 = vpop.permute.xlu1 %1881  ;;  %v1354_v22 = vsel %vm507_vm8, %v8820_v0, %v8829_v6  ;;  %v8832_v0 = vld [vmem:[#allocation94_spill] sm:$0xff] }
 0x52b   : > { %v1718_v6 = vsel %vm1714_vm2, %v8832_v0, %v5669_v5  ;;  %v8836_v5 = vld [vmem:[#allocation154_spill] sm:$0xff] }
 0x52c   : > { %v6410_v50 = vpop.permute.xlu0 %2045  ;;  %1885 = vrot.lane.b32.xlu1 %v1755_v11, %s4313_s19 }
 0x52e   : > { %1839 = vrot.lane.b32.xlu0 %v1673_v12, %s4313_s19  ;;  %v6417_v57 = vpop.permute.xlu1 %2011  ;;  %v1460_v12 = vsel %vm553_vm11, %v8824_v34, %v8831_v14  ;;  %v8835_v34 = vld [vmem:[#allocation96_spill] sm:$0xff] }
 0x52f   : > { %8828 = vst [vmem:[#allocation120_spill] sm:$0xff] %v6417_v57  ;;  %v1740_v14 = vsel %vm523_vm9, %v8835_v34, %v5691_v43  ;;  %v8839_v43 = vld [vmem:[#allocation57_spill] sm:$0xff] }
 0x530   : > { %v6422_v28 = vpop.permute.xlu0 %2057  ;;  %2019 = vrot.lane.b32.xlu1 %v1354_v22, %s4322_s24 }
 0x532   : > { %1851 = vrot.lane.b32.xlu0 %v1695_v40, %s4313_s19  ;;  %v6429_v11 = vpop.permute.xlu1 %2071  ;;  %v1672_v40 = vsel %vm507_vm8, %v8833_v47, %v8827_v2  ;;  %v8838_v2 = vld [vmem:[#allocation98_spill] sm:$0xff] }
 0x533   : > { %v1778_v47 = vsel %vm553_vm11, %v8838_v2, %v5737_v62  ;;  %v8842_v62 = vld [vmem:[#allocation59_spill] sm:$0xff] }
 0x534   : > { %v6434_v17 = vpop.permute.xlu0 %2069  ;;  %2079 = vrot.lane.b32.xlu1 %v1460_v12, %s4322_s24 }
 0x536   : > { %1863 = vrot.lane.b32.xlu0 %v1718_v6, %s4313_s19  ;;  %v6441_v22 = vpop.permute.xlu1 %1841  ;;  %v1694_v6 = vsel %vm1373_vm0, %v8836_v5, %v8830_v52  ;;  %v8841_v52 = vld [vmem:[#allocation160_spill] sm:$0xff] }
 0x537   : > { %v1800_v5 = vsel %vm1479_vm3, %v8841_v52, %v5768_v27  ;;  %v8846_v27 = vld [vmem:[#allocation158_spill] sm:$0xff] }
 0x538   : > { %v6446_v19 = vpop.permute.xlu0 %2093  ;;  %1837 = vrot.lane.b32.xlu1 %v1672_v40, %s4313_s19 }
 0x539   : > { %8834 = vst [vmem:[#allocation113_spill] sm:$0xff] %v6446_v19 }
 0x53a   : > { %1875 = vrot.lane.b32.xlu0 %v1740_v14, %s4313_s19  ;;  %v6453_v12 = vpop.permute.xlu1 %1853  ;;  %v1717_v14 = vsel %vm1714_vm2, %v8839_v43, %v8832_v0  ;;  %v8844_v0 = vld [vmem:[#allocation134_spill] sm:$0xff] }
 0x53b   : > { %v8845_v43 = vld [vmem:[#allocation126_spill] sm:$0xff] }
 0x53c   : > { %v6458_v35 = vpop.permute.xlu0 %2105  ;;  %1849 = vrot.lane.b32.xlu1 %v1694_v6, %s4313_s19 }
 0x53d   : > { %8837 = vst [vmem:[#allocation122_spill] sm:$0xff] %v6458_v35 }
 0x53e   : > { %1899 = vrot.lane.b32.xlu0 %v1778_v47, %s4313_s19  ;;  %v6465_v40 = vpop.permute.xlu1 %1865  ;;  %v1739_v47 = vsel %vm523_vm9, %v8842_v62, %v8835_v34  ;;  %v8848_v34 = vld [vmem:[#allocation136_spill] sm:$0xff] }
 0x53f   : > { %v8849_v62 = vld [vmem:[#allocation128_spill] sm:$0xff] }
 0x540   : > { %v6470_v19 = vpop.permute.xlu0 %2117  ;;  %1861 = vrot.lane.b32.xlu1 %v1717_v14, %s4313_s19  ;;  %v1331_v14 = vsel %vm491_vm7, %v8845_v43, %v8844_v0  ;;  %v8850_v43 = vld [vmem:[#allocation51_spill] sm:$0xff] }
 0x541   : > { %8840 = vst [vmem:[#allocation85_spill] sm:$0xff] %v6470_v19 }
 0x542   : > { %1911 = vrot.lane.b32.xlu0 %v1800_v5, %s4313_s19  ;;  %v6477_v6 = vpop.permute.xlu1 %1877  ;;  %v1777_v5 = vsel %vm553_vm11, %v8846_v27, %v8838_v2  ;;  %v8852_v2 = vld [vmem:[#allocation138_spill] sm:$0xff] }
 0x543   : > { %v8853_v27 = vld [vmem:[#allocation130_spill] sm:$0xff] }
 0x544   : > { %v6482_v35 = vpop.permute.xlu0 %2177  ;;  %1873 = vrot.lane.b32.xlu1 %v1739_v47, %s4313_s19  ;;  %v1376_v47 = vsel %vm1373_vm0, %v8849_v62, %v8848_v34  ;;  %v1332_v62 = vsel %vm491_vm7, %v8844_v0, %v8754_v60  ;;  %v8856_v60 = vld [vmem:[#allocation142_spill] sm:$0xff]  ;;  %v8857_v0 = vld [vmem:[#allocation135_spill] sm:$0xff] }
 0x545   : > { %8843 = vst [vmem:[#allocation110_spill] sm:$0xff] %v6482_v35 }
 0x546   : > { %2005 = vrot.lane.b32.xlu0 %v1331_v14, %s4322_s24  ;;  %v6489_v19 = vpop.permute.xlu1 %1901  ;;  %v1799_v14 = vsel %vm1479_vm3, %v8850_v43, %v8841_v52  ;;  %v8854_v52 = vld [vmem:[#allocation140_spill] sm:$0xff] }
 0x547   : > { %v8855_v43 = vld [vmem:[#allocation132_spill] sm:$0xff] }
 0x548   : > { %v6494_v24 = vpop.permute.xlu0 %2165  ;;  %1897 = vrot.lane.b32.xlu1 %v1777_v5, %s4313_s19  ;;  %v1399_v5 = vsel %vm1396_vm4, %v8853_v27, %v8852_v2  ;;  %v1377_v27 = vsel %vm1373_vm0, %v8848_v34, %v8757_v10  ;;  %v8858_v10 = vld [vmem:[#allocation144_spill] sm:$0xff]  ;;  %v8859_v34 = vld [vmem:[#allocation137_spill] sm:$0xff]  ;;  %vm8907_vm0 = vcmask 801792  }
 0x549   : > { %8847 = vst [vmem:[#allocation8_spill] sm:$0xff] %v6494_v24 }
 0x54a   : > { %2029 = vrot.lane.b32.xlu0 %v1376_v47, %s4322_s24  ;;  %v6501_v61 = vpop.permute.xlu1 %1913 }
 0x54c   : > { %v6506_v51 = vpop.permute.xlu0 %2153  ;;  %1909 = vrot.lane.b32.xlu1 %v1799_v14, %s4313_s19  ;;  %v1421_v14 = vsel %vm523_vm9, %v8855_v43, %v8854_v52  ;;  %v1400_v43 = vsel %vm1396_vm4, %v8852_v2, %v8760_v63  ;;  %v8860_v63 = vld [vmem:[#allocation146_spill] sm:$0xff]  ;;  %v8861_v2 = vld [vmem:[#allocation139_spill] sm:$0xff]  ;;  %vm8909_vm4 = vmmov %vm8907_vm0  ;;  %s7585_s19 = scalar_lea.vmem %s8340_s10, %s4233_s30 }
 0x54d   : > { %8851 = vst [vmem:[#allocation80_spill] sm:$0xff] %v6506_v51 }
 0x54e   : > { %2041 = vrot.lane.b32.xlu0 %v1399_v5, %s4322_s24  ;;  %v6513_v24 = vpop.permute.xlu1 %1833 }
 0x550   : > { %v6518_v47 = vpop.permute.xlu0 %1831  ;;  %2007 = vrot.lane.b32.xlu1 %v1332_v62, %s4322_s24  ;;  %v1443_v62 = vsel %vm537_vm10, %v8857_v0, %v8856_v60  ;;  %v1422_v0 = vsel %vm523_vm9, %v8854_v52, %v8764_v46  ;;  %v8862_v46 = vld [vmem:[#allocation148_spill] sm:$0xff]  ;;  %v8863_v52 = vld [vmem:[#allocation141_spill] sm:$0xff] }
 0x552   : > { %2053 = vrot.lane.b32.xlu0 %v1421_v14, %s4322_s24  ;;  %v6525_v51 = vpop.permute.xlu1 %1845 }
 0x554   : > { %v6530_v5 = vpop.permute.xlu0 %1843  ;;  %2031 = vrot.lane.b32.xlu1 %v1377_v27, %s4322_s24  ;;  %v1482_v27 = vsel %vm1479_vm3, %v8859_v34, %v8858_v10  ;;  %v1444_v34 = vsel %vm537_vm10, %v8856_v60, %v8768_v37  ;;  %v8865_v37 = vld [vmem:[#allocation155_spill] sm:$0xff] }
 0x555   : > { %v8866_v60 = vld [vmem:[#allocation147_spill] sm:$0xff] }
 0x556   : > { %2065 = vrot.lane.b32.xlu0 %v1443_v62, %s4322_s24  ;;  %v6537_v20 = vpop.permute.xlu1 %1857 }
 0x558   : > { %v6542_v14 = vpop.permute.xlu0 %1855  ;;  %2043 = vrot.lane.b32.xlu1 %v1400_v43, %s4322_s24  ;;  %v1505_v43 = vsel %vm1502_vm5, %v8861_v2, %v8860_v63  ;;  %v1483_v2 = vsel %vm1479_vm3, %v8858_v10, %v8771_v16  ;;  %v8869_v16 = vld [vmem:[#allocation64_spill] sm:$0xff]  ;;  %vm8908_vm3 = vmmov %vm8907_vm0 }
 0x55a   : > { %2089 = vrot.lane.b32.xlu0 %v1482_v27, %s4322_s24  ;;  %v6549_v35 = vpop.permute.xlu1 %1869 }
 0x55c   : > { %v6554_v62 = vpop.permute.xlu0 %1867  ;;  %2055 = vrot.lane.b32.xlu1 %v1422_v0, %s4322_s24  ;;  %v1527_v0 = vsel %vm569_vm12, %v8863_v52, %v8862_v46  ;;  %v1506_v52 = vsel %vm1502_vm5, %v8860_v63, %v5490_v38  ;;  %v8873_v63 = vld [vmem:[#allocation156_spill] sm:$0xff]  ;;  %vm8910_vm5 = vmmov %vm8907_vm0 }
 0x55e   : > { %2101 = vrot.lane.b32.xlu0 %v1505_v43, %s4322_s24  ;;  %v6561_v32 = vpop.permute.xlu1 %1893 }
 0x560   : > { %v6566_v27 = vpop.permute.xlu0 %1891  ;;  %2067 = vrot.lane.b32.xlu1 %v1444_v34, %s4322_s24  ;;  %v1611_v34 = vsel %vm1608_vm1, %v8866_v60, %v8865_v37 }
 0x562   : > { %2113 = vrot.lane.b32.xlu0 %v1527_v0, %s4322_s24  ;;  %v6573_v21 = vpop.permute.xlu1 %1905 }
 0x564   : > { %v6578_v43 = vpop.permute.xlu0 %1903  ;;  %2091 = vrot.lane.b32.xlu1 %v1483_v2, %s4322_s24  ;;  %v1528_v2 = vsel %vm569_vm12, %v8862_v46, %v5508_v25  ;;  %v8875_v46 = vld [vmem:[#allocation150_spill] sm:$0xff] }
 0x565   : > { %8864 = vst [vmem:[#allocation114_spill] sm:$0xff] %v6578_v43 }
 0x566   : > { %2161 = vrot.lane.b32.xlu0 %v1611_v34, %s4322_s24  ;;  %v6585_v57 = vpop.permute.xlu1 %1999  ;;  %v8872_v34 = vld [vmem:[#allocation55_spill] sm:$0xff] }
 0x567   : > { %8867 = vst [vmem:[#allocation6_spill] sm:$0xff] %v6585_v57  ;;  %v8874_v57 = vld [vmem:[#allocation108_spill] sm:$0xff] }
 0x568   : > { %v6590_v0 = vpop.permute.xlu0 %2001  ;;  %2103 = vrot.lane.b32.xlu1 %v1506_v52, %s4322_s24  ;;  %v1635_v52 = vsel %vm1631_vm15, %v8873_v63, %v5598_v26 }
 0x569   : > { %8868 = vst [vmem:[#allocation97_spill] sm:$0xff] %v6590_v0 }
 0x56a   : > { %2141 = vrot.lane.b32.xlu0 %v8869_v16, %s4322_s24  ;;  %v6595_v10 = vpop.permute.xlu1 %2023 }
 0x56b   : > { %8870 = vst [vmem:[#allocation119_spill] sm:$0xff] %v6595_v10  ;;  %v8878_v10 = vld [vmem:[#allocation121_spill] sm:$0xff] }
 0x56c   : > { %v6600_v60 = vpop.permute.xlu0 %2025  ;;  %2115 = vrot.lane.b32.xlu1 %v1528_v2, %s4322_s24  ;;  %v1634_v2 = vsel %vm1631_vm15, %v8875_v46, %v8873_v63  ;;  %v1916_v63 = vsel %vm1212_vm6, %v8878_v10, %v8877_v49  ;;  %vm8911_vm15 = vmmov %vm8907_vm0 }
 0x56d   : > { %8871 = vst [vmem:[#allocation157_spill] sm:$0xff] %v6600_v60 }
 0x56e   : > { %2135 = vrot.lane.b32.xlu0 %v8872_v34, %s4322_s24  ;;  %v6605_v38 = vpop.permute.xlu1 %2035 }
 0x570   : > { %v6610_v43 = vpop.permute.xlu0 %2037  ;;  %2175 = vrot.lane.b32.xlu1 %v1635_v52, %s4322_s24  ;;  %v1612_v52 = vsel %vm1608_vm1, %v8865_v37, %v5578_v29  ;;  %v8882_v29 = vld [vmem:[#allocation117_spill] sm:$0xff] }
 0x571   : > { %v1915_v37 = vsel %vm1212_vm6, %v8882_v29, %v8878_v10 }
 0x572   : > { %2129 = vrot.lane.b32.xlu0 %v8874_v57, %s4322_s24  ;;  %v6615_v25 = vpop.permute.xlu1 %2047 }
 0x574   : > { %v6620_v0 = vpop.permute.xlu0 %2049  ;;  %2173 = vrot.lane.b32.xlu1 %v1634_v2, %s4322_s24  ;;  %v8880_v2 = vld [vmem:[#allocation153_spill] sm:$0xff] }
 0x575   : > { %v1589_v60 = vsel %vm1585_vm13, %v8880_v2, %v5558_v36 }
 0x576   : > { %2189 = vrot.lane.b32.xlu0 %v8876_v55, %s4322_s24  ;;  %v6625_v26 = vpop.permute.xlu1 %2059 }
 0x578   : > { %v6630_v30 = vpop.permute.xlu0 %2061  ;;  %2163 = vrot.lane.b32.xlu1 %v1612_v52, %s4322_s24 }
 0x57a   : > { %2181 = vrot.lane.b32.xlu0 %v1916_v63, %s4322_s24  ;;  %v6637_v46 = vpop.permute.xlu1 %2083  ;;  %v8884_v63 = vld [vmem:[#allocation145_spill] sm:$0xff] }
 0x57b   : > { %8879 = vst [vmem:[#allocation56_spill] sm:$0xff] %v6637_v46  ;;  %v1588_v46 = vsel %vm1585_vm13, %v8884_v63, %v8880_v2 }
 0x57c   : > { %v6642_v8 = vpop.permute.xlu0 %2085  ;;  %2151 = vrot.lane.b32.xlu1 %v1589_v60, %s4322_s24  ;;  %v8887_v60 = vld [vmem:[#allocation112_spill] sm:$0xff] }
 0x57d   : > { %8881 = vst [vmem:[#allocation159_spill] sm:$0xff] %v6642_v8  ;;  %v1586_v10 = vsel %vm1585_vm13, %v8887_v60, %v8818_v59  ;;  %v8893_v60 = vld [vmem:[#allocation109_spill] sm:$0xff]  ;;  %vm8901_vm13 = vcmask 777216  }
 0x57e   : > { %2179 = vrot.lane.b32.xlu0 %v1915_v37, %s4322_s24  ;;  %v6649_v52 = vpop.permute.xlu1 %2095  ;;  %vm8903_vm1 = vmmov %vm8901_vm13 }
 0x57f   : > { %8883 = vst [vmem:[#allocation60_spill] sm:$0xff] %v6649_v52 }
 0x580   : > { %v6654_v58 = vpop.permute.xlu0 %2097  ;;  %2149 = vrot.lane.b32.xlu1 %v1588_v46, %s4322_s24  ;;  %v8890_v46 = vld [vmem:[#allocation3_spill] sm:$0xff] }
 0x581   : > { %8885 = vst [vmem:[#allocation94_spill] sm:$0xff] %v6654_v58  ;;  %v1566_v37 = vsel %vm599_vm14, %v8890_v46, %v8869_v16 }
 0x582   : > { %2255 = vrot.lane.b32.xlu0 %v6206_v1, %s4322_s24  ;;  %v6659_v36 = vpop.permute.xlu1 %2107 }
 0x583   : > { %8886 = vst [vmem:[#allocation152_spill] sm:$0xff] %v6659_v36 }
 0x584   : > { %v6664_v29 = vpop.permute.xlu0 %2109  ;;  %2143 = vrot.lane.b32.xlu1 %v1586_v10, %s4322_s24  ;;  %v1565_v10 = vsel %vm599_vm14, %v8893_v60, %v8890_v46  ;;  %v8898_v60 = vld [vmem:[#allocation83_spill] sm:$0xff] }
 0x585   : > { %8888 = vst [vmem:[#allocation96_spill] sm:$0xff] %v6664_v29 }
 0x586   : > { %2267 = vrot.lane.b32.xlu0 %v6266_v33, %s4322_s24  ;;  %v6669_v2 = vpop.permute.xlu1 %2119 }
 0x587   : > { %8889 = vst [vmem:[#allocation154_spill] sm:$0xff] %v6669_v2 }
 0x588   : > { %v6674_v63 = vpop.permute.xlu0 %2121  ;;  %2139 = vrot.lane.b32.xlu1 %v1566_v37, %s4322_s24  ;;  %v8896_v37 = vld [vmem:[#allocation62_spill] sm:$0xff] }
 0x589   : > { %8891 = vst [vmem:[#allocation98_spill] sm:$0xff] %v6674_v63  ;;  %v1564_v52 = vsel %vm599_vm14, %v8896_v37, %v8872_v34 }
 0x58a   : > { %2243 = vrot.lane.b32.xlu0 %v6254_v48, %s4322_s24  ;;  %v6679_v59 = vpop.permute.xlu1 %2169 }
 0x58b   : > { %8892 = vst [vmem:[#allocation57_spill] sm:$0xff] %v6679_v59 }
 0x58c   : > { %v6684_v8 = vpop.permute.xlu0 %2157  ;;  %2137 = vrot.lane.b32.xlu1 %v1565_v10, %s4322_s24  ;;  %v1563_v10 = vsel %vm599_vm14, %v8898_v60, %v8896_v37  ;;  %v8902_v60 = vld [vmem:[#allocation143_spill] sm:$0xff] }
 0x58d   : > { %8894 = vst [vmem:[#allocation160_spill] sm:$0xff] %v6684_v8 }
 0x58e   : > { %2231 = vrot.lane.b32.xlu0 %v6242_v23, %s4322_s24  ;;  %v6689_v16 = vpop.permute.xlu1 %2167 }
 0x58f   : > { %8895 = vst [vmem:[#allocation59_spill] sm:$0xff] %v6689_v16 }
 0x590   : > { %v6694_v58 = vpop.permute.xlu0 %1827  ;;  %2133 = vrot.lane.b32.xlu1 %v1564_v52, %s4322_s24  ;;  %v8900_v52 = vld [vmem:[#allocation151_spill] sm:$0xff] }
 0x591   : > { %v1550_v29 = vsel %vm8901_vm13, %v8900_v52, %v8874_v57  ;;  %v1952_v57 = vld [vmem:[%s8334_s4 + $0x8] sm:$0xff]  ;;  %vm8912_vm13 = vmmov %vm8907_vm0 }
 0x592   : > { %2219 = vrot.lane.b32.xlu0 %v6230_v45, %s4322_s24  ;;  %v6699_v46 = vpop.permute.xlu1 %2155  ;;  %2561 = vmatprep.mubr.f32.mxu0 %v1952_v57 }
 0x593   : > { %8897 = vst [vmem:[#allocation134_spill] sm:$0xff] %v6699_v46 }
 0x594   : > { %v6704_v36 = vpop.permute.xlu0 %1887  ;;  %2131 = vrot.lane.b32.xlu1 %v1563_v10, %s4322_s24  ;;  %v1549_v10 = vsel %vm8903_vm1, %v8902_v60, %v8900_v52  ;;  %v8906_v60 = vld [vmem:[#allocation53_spill] sm:$0xff]  ;;  %vm8913_vm1 = vmmov %vm8907_vm0 }
 0x596   : > { %2207 = vrot.lane.b32.xlu0 %v6218_v41, %s4322_s24  ;;  %v6709_v34 = vpop.permute.xlu1 %2145 }
 0x597   : > { %8899 = vst [vmem:[#allocation126_spill] sm:$0xff] %v6709_v34  ;;  %v8904_v34 = vld [vmem:[#allocation161_spill] sm:$0xff] }
 0x598   : > { %v6714_v2 = vpop.permute.xlu0 %2017  ;;  %2127 = vrot.lane.b32.xlu1 %v1550_v29, %s4322_s24  ;;  %v1918_v46 = vsel %vm1212_vm6, %v8904_v34, %v8876_v55  ;;  %v1939_v55 = vsel %vm1212_vm6, %v6350_v15, %v6405_v56  ;;  %v2315_v15 = vsel %vm8910_vm5, %v6429_v11, %v6374_v4  ;;  %v1940_v11 = vsel %vm1212_vm6, %v6405_v56, %v6206_v1  ;;  %vm8916_vm5 = vmmov %vm8907_vm0 }
 0x599   : > { %v1919_v56 = vsel %vm1212_vm6, %v6338_v31, %v6393_v53 }
 0x59a   : > { %2261 = vrot.lane.b32.xlu0 %v6381_v9, %s4322_s24  ;;  %v6719_v37 = vpop.permute.xlu1 %1825 }
 0x59c   : > { %v2078_v63 = vpop.permute.xlu0 %2077  ;;  %2125 = vrot.lane.b32.xlu1 %v1549_v10, %s4322_s24  ;;  %v1917_v10 = vsel %vm1212_vm6, %v8906_v60, %v8904_v34  ;;  %v2316_v34 = vsel %vm8909_vm4, %v6374_v4, %v6237_v3  ;;  %v1920_v60 = vsel %vm1212_vm6, %v6393_v53, %v6194_v54  ;;  %v1936_v53 = vsel %vm1212_vm6, %v6549_v35, %v6254_v48  ;;  %vm8915_vm4 = vmmov %vm8907_vm0 }
 0x59d   : > { %v1931_v48 = vsel %vm1212_vm6, %v6542_v14, %v6537_v20  ;;  %v1928_v14 = vsel %vm1212_vm6, %v6525_v51, %v6230_v45  ;;  %v1948_v45 = vsel %vm1212_vm6, %v6573_v21, %v6278_v44 }
 0x59e   : > { %2201 = vrot.lane.b32.xlu0 %v6369_v13, %s4322_s24  ;;  %v6730_v29 = vpop.permute.xlu1 %1885 }
 0x5a0   : > { %v6735_v8 = vpop.permute.xlu0 %1839  ;;  %2187 = vrot.lane.b32.xlu1 %v1918_v46, %s4322_s24 }
 0x5a1   : > { %8905 = vst [vmem:[#allocation158_spill] sm:$0xff] %v6735_v8 }
 0x5a2   : > { %2273 = vrot.lane.b32.xlu0 %v6489_v19, %s4322_s24  ;;  %v6740_v52 = vpop.permute.xlu1 %2019 }
 0x5a4   : > { %v6745_v16 = vpop.permute.xlu0 %1851  ;;  %2185 = vrot.lane.b32.xlu1 %v1917_v10, %s4322_s24 }
 0x5a6   : > { %2251 = vrot.lane.b32.xlu0 %v1939_v55, %s4322_s24  ;;  %v2080_v46 = vpop.permute.xlu1 %2079 }
 0x5a7   : > { %v2318_v57 = vsel %vm8907_vm0, %v2080_v46, %v6326_v42  ;;  %v2317_v59 = vsel %vm8908_vm3, %v2078_v63, %v2080_v46  ;;  %vm8914_vm3 = vmmov %vm8907_vm0 }
 0x5a8   : > { %v6755_v8 = vpop.permute.xlu0 %1863  ;;  %2183 = vrot.lane.b32.xlu1 %v8877_v49, %s4322_s24  ;;  %2497 = vmatprep.subr.mxu0 %v2318_v57 }
 0x5a9   : > { %2498 = vmatpush1.msra.mxu0 %v2317_v59 }
 0x5aa   : > { %2249 = vrot.lane.b32.xlu0 %v6477_v6, %s4322_s24  ;;  %2499 = vmatprep.subr.mxu0 %v2316_v34  ;;  %v6767_v42 = vpop.permute.xlu1 %1837 }
 0x5ab   : > { %2500 = vmatpush1.msra.mxu0 %v2315_v15  ;;  %v1935_v15 = vsel %vm1212_vm6, %v6554_v62, %v6549_v35  ;;  %v1927_v35 = vsel %vm1212_vm6, %v6530_v5, %v6525_v51  ;;  %v1924_v5 = vsel %vm1212_vm6, %v6513_v24, %v6218_v41 }
 0x5ac   : > { %v6769_v63 = vpop.permute.xlu0 %1875  ;;  %2195 = vrot.lane.b32.xlu1 %v6194_v54, %s4322_s24  ;;  %v1944_v54 = vsel %vm1212_vm6, %v6561_v32, %v6266_v33  ;;  %v1943_v33 = vsel %vm1212_vm6, %v6566_v27, %v6561_v32  ;;  %v1932_v32 = vsel %vm1212_vm6, %v6537_v20, %v6242_v23  ;;  %v1923_v23 = vsel %vm1212_vm6, %v6518_v47, %v6513_v24 }
 0x5ad   : > { %v1942_v47 = vsel %vm1212_vm6, %v6704_v36, %v6381_v9  ;;  %v2311_v9 = vsel %vm8907_vm0, %v6625_v26, %v6630_v30  ;;  %v1921_v26 = vsel %vm1212_vm6, %v6719_v37, %v6694_v58 }
 0x5ae   : > { %2225 = vrot.lane.b32.xlu0 %v6453_v12, %s4322_s24  ;;  %v6775_v3 = vpop.permute.xlu1 %1849 }
 0x5b0   : > { %v6777_v49 = vpop.permute.xlu0 %1899  ;;  %2279 = vrot.lane.b32.xlu1 %v6278_v44, %s4322_s24  ;;  %v1941_v44 = vsel %vm1212_vm6, %v6730_v29, %v6704_v36 }
 0x5b1   : > { %v1946_v37 = vsel %vm1212_vm6, %v6777_v49, %v6489_v19  ;;  %v8925_v19 = vld [vmem:[#allocation157_spill] sm:$0xff] }
 0x5b2   : > { %2213 = vrot.lane.b32.xlu0 %v6441_v22, %s4322_s24  ;;  %v6783_v4 = vpop.permute.xlu1 %1861 }
 0x5b4   : > { %v6788_v59 = vpop.permute.xlu0 %1911  ;;  %2253 = vrot.lane.b32.xlu1 %v1940_v11, %s4322_s24 }
 0x5b6   : > { %2193 = vrot.lane.b32.xlu0 %v1920_v60, %s4322_s24  ;;  %v6795_v10 = vpop.permute.xlu1 %1873 }
 0x5b8   : > { %v6797_v55 = vpop.permute.xlu0 %2005  ;;  %2237 = vrot.lane.b32.xlu1 %v6465_v40, %s4322_s24 }
 0x5ba   : > { %2191 = vrot.lane.b32.xlu0 %v1919_v56, %s4322_s24  ;;  %v1898_v1 = vpop.permute.xlu1 %1897 }
 0x5bc   : > { %v6808_v46 = vpop.permute.xlu0 %2029  ;;  %2265 = vrot.lane.b32.xlu1 %v1944_v54, %s4322_s24 }
 0x5be   : > { %2285 = vrot.lane.b32.xlu0 %v6501_v61, %s4322_s24  ;;  %v6813_v57 = vpop.permute.xlu1 %1909 }
 0x5c0   : > { %v6818_v31 = vpop.permute.xlu0 %2041  ;;  %2241 = vrot.lane.b32.xlu1 %v1936_v53, %s4322_s24 }
 0x5c2   : > { %2263 = vrot.lane.b32.xlu0 %v1943_v33, %s4322_s24  ;;  %v6825_v34 = vpop.permute.xlu1 %2007  ;;  %v2312_v33 = vsel %vm8913_vm1, %v6630_v30, %v6297_v7  ;;  %v2308_v30 = vsel %vm8916_vm5, %v6620_v0, %v6285_v18  ;;  %vm8919_vm1 = vmmov %vm8907_vm0 }
 0x5c3   : > { %vm8923_vm5 = vmmov %vm8907_vm0 }
 0x5c4   : > { %v2054_v11 = vpop.permute.xlu0 %2053  ;;  %2239 = vrot.lane.b32.xlu1 %v1935_v15, %s4322_s24  ;;  %v1922_v15 = vsel %vm1212_vm6, %v6694_v58, %v6369_v13  ;;  %v2304_v58 = vsel %vm8907_vm0, %v6610_v43, %v6273_v39 }
 0x5c6   : > { %2227 = vrot.lane.b32.xlu0 %v1931_v48, %s4322_s24  ;;  %v6835_v60 = vpop.permute.xlu1 %2031  ;;  %v1945_v48 = vsel %vm1212_vm6, %v1898_v1, %v6777_v49 }
 0x5c7   : > { %v2301_v39 = vsel %vm8923_vm5, %v6808_v46, %v6835_v60  ;;  %v1938_v46 = vsel %vm1212_vm6, %v6769_v63, %v6477_v6  ;;  %v8932_v6 = vld [vmem:[#allocation106_spill] sm:$0xff]  ;;  %vm8937_vm5 = vmmov %vm8907_vm0 }
 0x5c8   : > { %v2066_v27 = vpop.permute.xlu0 %2065  ;;  %2229 = vrot.lane.b32.xlu1 %v1932_v32, %s4322_s24 }
 0x5ca   : > { %2215 = vrot.lane.b32.xlu0 %v1927_v35, %s4322_s24  ;;  %v2044_v62 = vpop.permute.xlu1 %2043  ;;  %v8927_v35 = vld [vmem:[#allocation119_spill] sm:$0xff] }
 0x5cb   : > { %v2305_v18 = vsel %vm8919_vm1, %v6818_v31, %v2044_v62  ;;  %vm8930_vm1 = vmmov %vm8907_vm0 }
 0x5cc   : > { %v6848_v56 = vpop.permute.xlu0 %2089  ;;  %2217 = vrot.lane.b32.xlu1 %v1928_v14, %s4322_s24 }
 0x5ce   : > { %2203 = vrot.lane.b32.xlu0 %v1923_v23, %s4322_s24  ;;  %v2056_v20 = vpop.permute.xlu1 %2055  ;;  %v2297_v23 = vsel %vm8907_vm0, %v6714_v2, %v6740_v52  ;;  %v1930_v2 = vsel %vm1212_vm6, %v6745_v16, %v6453_v12  ;;  %v8940_v12 = vld [vmem:[#allocation97_spill] sm:$0xff] }
 0x5cf   : > { %v2310_v36 = vsel %vm8914_vm3, %v2056_v20, %v6422_v28  ;;  %v2309_v7 = vsel %vm8915_vm4, %v2054_v11, %v2056_v20  ;;  %vm8920_vm3 = vmmov %vm8907_vm0  ;;  %v1933_v20 = vsel %vm1212_vm6, %v6783_v4, %v6755_v8 }
 0x5d0   : > { %v6858_v54 = vpop.permute.xlu0 %2101  ;;  %2205 = vrot.lane.b32.xlu1 %v1924_v5, %s4322_s24  ;;  %vm8922_vm4 = vmmov %vm8907_vm0  ;;  %v8931_v5 = vld [vmem:[#allocation182_spill] sm:$0xff] }
 0x5d2   : > { %2277 = vrot.lane.b32.xlu0 %v1948_v45, %s4322_s24  ;;  %v2068_v51 = vpop.permute.xlu1 %2067  ;;  %v8934_v45 = vld [vmem:[#allocation120_spill] sm:$0xff] }
 0x5d3   : > { %v2314_v53 = vsel %vm8911_vm15, %v2068_v51, %v6434_v17  ;;  %v2313_v41 = vsel %vm8912_vm13, %v2066_v27, %v2068_v51  ;;  %vm8917_vm15 = vmmov %vm8907_vm0 }
 0x5d4   : > { %v6871_v24 = vpop.permute.xlu0 %2113  ;;  %2259 = vrot.lane.b32.xlu1 %v1942_v47, %s4322_s24  ;;  %2501 = vmatprep.subr.mxu0 %v2314_v53  ;;  %v2307_v28 = vsel %vm8917_vm15, %v6615_v25, %v6620_v0  ;;  %vm8918_vm13 = vmmov %vm8907_vm0  ;;  %v1937_v0 = vsel %vm1212_vm6, %v6795_v10, %v6769_v63  ;;  %v2303_v25 = vsel %vm8920_vm3, %v6605_v38, %v6610_v43  ;;  %v8921_v10 = vld [vmem:[#allocation115_spill] sm:$0xff]  ;;  %v8924_v38 = vld [vmem:[#allocation82_spill] sm:$0xff] }
 0x5d5   : > { %2502 = vmatpush1.msra.mxu0 %v2313_v41  ;;  %v2306_v1 = vsel %vm8918_vm13, %v2044_v62, %v6410_v50  ;;  %v2302_v31 = vsel %vm8922_vm4, %v6835_v60, %v8921_v10  ;;  %v1934_v43 = vsel %vm1212_vm6, %v6755_v8, %v6465_v40  ;;  %vm8926_vm15 = vmmov %vm8907_vm0  ;;  %v8929_v60 = vld [vmem:[#allocation90_spill] sm:$0xff]  ;;  %v1929_v41 = vsel %vm1212_vm6, %v6775_v3, %v6745_v16  ;;  %v8946_v16 = vld [vmem:[#allocation61_spill] sm:$0xff] }
 0x5d6   : > { %2257 = vrot.lane.b32.xlu0 %v1941_v44, %s4322_s24  ;;  %2503 = vmatprep.subr.mxu0 %v2312_v33  ;;  %v6881_v17 = vpop.permute.xlu1 %2091  ;;  %v2300_v49 = vsel %vm8926_vm15, %v8925_v19, %v8924_v38  ;;  %vm8928_vm13 = vmmov %vm8907_vm0  ;;  %v2298_v40 = vsel %vm8930_vm1, %v6740_v52, %v8929_v60  ;;  %v8936_v52 = vld [vmem:[#allocation111_spill] sm:$0xff]  ;;  %v8939_v44 = vld [vmem:[#allocation76_spill] sm:$0xff] }
 0x5d7   : > { %2504 = vmatpush1.msra.mxu0 %v2311_v9  ;;  %v2299_v62 = vsel %vm8928_vm13, %v8927_v35, %v8925_v19  ;;  %vm8933_vm3 = vmmov %vm8907_vm0  ;;  %v2294_v8 = vsel %vm8937_vm5, %v6825_v34, %v8936_v52  ;;  %v8954_v10 = vld [vmem:[#allocation110_spill] sm:$0xff]  ;;  %v8958_v19 = vld [vmem:[#allocation105_spill] sm:$0xff] }
 0x5d8   : > { %v6891_v29 = vpop.permute.xlu0 %2161  ;;  %2199 = vrot.lane.b32.xlu1 %v1922_v15, %s4322_s24  ;;  %2505 = vmatprep.subr.mxu0 %v2310_v36  ;;  %v2296_v63 = vsel %vm8933_vm3, %v8932_v6, %v8931_v5  ;;  %vm8935_vm4 = vmmov %vm8907_vm0  ;;  %v8942_v15 = vld [vmem:[#allocation6_spill] sm:$0xff]  ;;  %v8962_v60 = vld [vmem:[#allocation8_spill] sm:$0xff] }
 0x5d9   : > { %2506 = vmatpush1.msra.mxu0 %v2309_v7  ;;  %v2295_v51 = vsel %vm8935_vm4, %v8934_v45, %v8932_v6  ;;  %vm8938_vm15 = vmmov %vm8907_vm0  ;;  %v8945_v7 = vld [vmem:[#allocation7_spill] sm:$0xff]  ;;  %v8966_v5 = vld [vmem:[#allocation160_spill] sm:$0xff] }
 0x5da   : > { %2269 = vrot.lane.b32.xlu0 %v1945_v48, %s4322_s24  ;;  %2507 = vmatprep.subr.mxu0 %v2308_v30  ;;  %v6901_v13 = vpop.permute.xlu1 %2103  ;;  %v2293_v53 = vsel %vm8938_vm15, %v6797_v55, %v6825_v34  ;;  %vm8941_vm13 = vmmov %vm8907_vm0  ;;  %v8944_v55 = vld [vmem:[#allocation158_spill] sm:$0xff]  ;;  %v2290_v3 = vsel %vm8907_vm0, %v8946_v16, %v8945_v7  ;;  %v8947_v30 = vld [vmem:[#allocation125_spill] sm:$0xff] }
 0x5db   : > { %2508 = vmatpush1.msra.mxu0 %v2307_v28  ;;  %v2292_v33 = vsel %vm8941_vm13, %v8940_v12, %v8939_v44  ;;  %vm8943_vm1 = vmmov %vm8907_vm0  ;;  %v1926_v34 = vsel %vm1212_vm6, %v8944_v55, %v6441_v22  ;;  %v8950_v22 = vld [vmem:[#allocation118_spill] sm:$0xff]  ;;  %v1954_v52 = vld [vmem:[%s8334_s4 + $0x18] sm:$0xff] }
 0x5dc   : > { %v6911_v11 = vpop.permute.xlu0 %2141  ;;  %2197 = vrot.lane.b32.xlu1 %v1921_v26, %s4322_s24  ;;  %2509 = vmatprep.subr.mxu0 %v2306_v1  ;;  %v2291_v36 = vsel %vm8943_vm1, %v8942_v15, %v8940_v12  ;;  %vm8948_vm3 = vmmov %vm8907_vm0  ;;  %v1925_v26 = vsel %vm1212_vm6, %v6767_v42, %v8944_v55  ;;  %v8949_v1 = vld [vmem:[#allocation52_spill] sm:$0xff]  ;;  %v8976_v44 = vld [vmem:[#allocation77_spill] sm:$0xff] }
 0x5dd   : > { %2510 = vmatpush1.msra.mxu0 %v2305_v18  ;;  %v2289_v28 = vsel %vm8948_vm3, %v8947_v30, %v8946_v16  ;;  %vm8951_vm4 = vmmov %vm8907_vm0  ;;  %v8985_v30 = vld [vmem:[#allocation65_spill] sm:$0xff] }
 0x5de   : > { %2245 = vrot.lane.b32.xlu0 %v1937_v0, %s4322_s24  ;;  %2511 = vmatprep.subr.mxu0 %v2304_v58  ;;  %v6923_v50 = vpop.permute.xlu1 %2115  ;;  %v2288_v18 = vsel %vm8951_vm4, %v8950_v22, %v8949_v1  ;;  %v8952_v58 = vld [vmem:[#allocation74_spill] sm:$0xff]  ;;  %vm8953_vm5 = vmmov %vm8907_vm0 }
 0x5df   : > { %2512 = vmatpush1.msra.mxu0 %v2303_v25  ;;  %v2287_v25 = vsel %vm8953_vm5, %v8952_v58, %v8950_v22  ;;  %vm8955_vm15 = vmmov %vm8907_vm0 }
 0x5e0   : > { %v6934_v32 = vpop.permute.xlu0 %2135  ;;  %2271 = vrot.lane.b32.xlu1 %v1946_v37, %s4322_s24  ;;  %2513 = vmatprep.subr.mxu0 %v2302_v31  ;;  %v1950_v37 = vsel %vm1212_vm6, %v6788_v59, %v6501_v61  ;;  %vm8956_vm13 = vmmov %vm8907_vm0  ;;  %v8961_v61 = vld [vmem:[#allocation59_spill] sm:$0xff] }
 0x5e1   : > { %2514 = vmatpush1.msra.mxu0 %v2301_v39  ;;  %vm8960_vm1 = vmmov %vm8907_vm0 }
 0x5e2   : > { %2235 = vrot.lane.b32.xlu0 %v1934_v43, %s4322_s24  ;;  %2515 = vmatprep.subr.mxu0 %v2300_v49  ;;  %v2176_v27 = vpop.permute.xlu1 %2175  ;;  %v8957_v43 = vld [vmem:[#allocation114_spill] sm:$0xff]  ;;  %v8959_v49 = vld [vmem:[#allocation57_spill] sm:$0xff]  ;;  %vm8963_vm3 = vmmov %vm8907_vm0 }
 0x5e3   : > { %2516 = vmatpush1.msra.mxu0 %v2299_v62  ;;  %v2350_v42 = vsel %vm8955_vm15, %v2176_v27, %v8954_v10  ;;  %v1947_v38 = vsel %vm1212_vm6, %v8957_v43, %v6573_v21  ;;  %v2348_v35 = vsel %vm8960_vm1, %v8959_v49, %v8958_v19  ;;  %v2347_v62 = vsel %vm8907_vm0, %v8961_v61, %v8959_v49  ;;  %vm8964_vm4 = vmmov %vm8907_vm0  ;;  %v8990_v10 = vld [vmem:[#allocation89_spill] sm:$0xff] }
 0x5e4   : > { %v6956_v14 = vpop.permute.xlu0 %2129  ;;  %2247 = vrot.lane.b32.xlu1 %v1938_v46, %s4322_s24  ;;  %2517 = vmatprep.subr.mxu0 %v2298_v40  ;;  %v1949_v46 = vsel %vm1212_vm6, %v6813_v57, %v6788_v59  ;;  %vm8967_vm5 = vmmov %vm8907_vm0  ;;  %v8970_v57 = vld [vmem:[#allocation75_spill] sm:$0xff]  ;;  %vm8972_vm15 = vcmask 777216   ;;  %vm2487_vm1 = vcmask 130048   ;;  %v8993_v19 = vld [vmem:[#allocation73_spill] sm:$0xff] }
 0x5e5   : > { %2518 = vmatpush1.msra.mxu0 %v2297_v23  ;;  %vm8969_vm6 = vmmov %vm8907_vm0  ;;  %4179 = vmatprep.mubr.msk.f32.mxu1 %vm2487_vm1, %v1954_v52  ;;  %v9006_v52 = vld [vmem:[#allocation85_spill] sm:$0xff] }
 0x5e6   : > { %2233 = vrot.lane.b32.xlu0 %v1933_v20, %s4322_s24  ;;  %2519 = vmatprep.subr.mxu0 %v2296_v63  ;;  %v2174_v47 = vpop.permute.xlu1 %2173  ;;  %v8965_v20 = vld [vmem:[#allocation104_spill] sm:$0xff]  ;;  %v8968_v63 = vld [vmem:[#allocation134_spill] sm:$0xff] }
 0x5e7   : > { %2520 = vmatpush1.msra.mxu0 %v2295_v51  ;;  %v2349_v31 = vsel %vm8956_vm13, %v2174_v47, %v2176_v27  ;;  %v2344_v6 = vsel %vm8967_vm5, %v8966_v5, %v8965_v20  ;;  %v2343_v59 = vsel %vm8969_vm6, %v8968_v63, %v8966_v5  ;;  %v8971_v51 = vld [vmem:[#allocation63_spill] sm:$0xff]  ;;  %vm8974_vm13 = vmmov %vm8907_vm0  ;;  %v8998_v20 = vld [vmem:[#allocation174_spill] sm:$0xff] }
 0x5e8   : > { %v6978_v4 = vpop.permute.xlu0 %2189  ;;  %2223 = vrot.lane.b32.xlu1 %v1930_v2, %s4322_s24  ;;  %2521 = vmatprep.subr.mxu0 %v2294_v8  ;;  %v2866_v47 = vsel %vm8972_vm15, %v8971_v51, %v8970_v57  ;;  %vm8981_vm5 = vmmov %vm8907_vm0  ;;  %v9000_v63 = vld [vmem:[#allocation98_spill] sm:$0xff] }
 0x5e9   : > { %2522 = vmatpush1.msra.mxu0 %v2293_v53 }
 0x5ea   : > { %2221 = vrot.lane.b32.xlu0 %v1929_v41, %s4322_s24  ;;  %2523 = vmatprep.subr.mxu0 %v2292_v33  ;;  %v2164_v9 = vpop.permute.xlu1 %2163  ;;  %v8975_v41 = vld [vmem:[#allocation127_spill] sm:$0xff]  ;;  %v8978_v33 = vld [vmem:[#allocation86_spill] sm:$0xff] }
 0x5eb   : > { %2524 = vmatpush1.msra.mxu0 %v2291_v36  ;;  %v2346_v21 = vsel %vm8963_vm3, %v2164_v9, %v8962_v60  ;;  %v2345_v23 = vsel %vm8964_vm4, %v6891_v29, %v2164_v9  ;;  %v8973_v29 = vld [vmem:[#allocation80_spill] sm:$0xff]  ;;  %vm8977_vm3 = vmmov %vm8972_vm15  ;;  %v8979_v9 = vld [vmem:[#allocation126_spill] sm:$0xff] }
 0x5ec   : > { %v7000_v48 = vpop.permute.xlu0 %2181  ;;  %2211 = vrot.lane.b32.xlu1 %v1926_v34, %s4322_s24  ;;  %2525 = vmatprep.subr.mxu0 %v2290_v3  ;;  %v2864_v12 = vsel %vm8977_vm3, %v8976_v44, %v8975_v41  ;;  %vm8980_vm4 = vmmov %vm8907_vm0  ;;  %v8982_v34 = vld [vmem:[#allocation87_spill] sm:$0xff]  ;;  %v8996_v60 = vld [vmem:[#allocation100_spill] sm:$0xff] }
 0x5ed   : > { %2526 = vmatpush1.msra.mxu0 %v2289_v28  ;;  %v2340_v15 = vsel %vm8980_vm4, %v8979_v9, %v8978_v33  ;;  %vm8983_vm6 = vmmov %vm8977_vm3  ;;  %v2828_v5 = vsel %vm553_vm11, %v8998_v20, %v8996_v60 }
 0x5ee   : > { %2209 = vrot.lane.b32.xlu0 %v1925_v26, %s4322_s24  ;;  %2527 = vmatprep.subr.mxu0 %v2288_v18  ;;  %v2152_v0 = vpop.permute.xlu1 %2151  ;;  %v2865_v7 = vsel %vm8983_vm6, %v8982_v34, %v8971_v51  ;;  %vm8984_vm15 = vmmov %vm8907_vm0 }
 0x5ef   : > { %2528 = vmatpush1.msra.mxu0 %v2287_v25  ;;  %v2342_v2 = vsel %vm8974_vm13, %v2152_v0, %v8973_v29  ;;  %vm8986_vm13 = vmmov %vm8977_vm3 }
 0x5f0   : > { %v7022_v39 = vpop.permute.xlu0 %2179  ;;  %2283 = vrot.lane.b32.xlu1 %v1950_v37, %s4322_s24  ;;  %2529 = vmatprep.subr.mxu0 %v2350_v42  ;;  %v2863_v28 = vsel %vm8986_vm13, %v8985_v30, %v8976_v44  ;;  %vm8989_vm3 = vmmov %vm8907_vm0  ;;  %v8991_v42 = vld [vmem:[#allocation95_spill] sm:$0xff] }
 0x5f1   : > { %2530 = vmatpush2.msra.mxu0 %v2349_v31  ;;  %v2848_v31 = vsel %vm569_vm12, %v8991_v42, %v8990_v10  ;;  %vm8992_vm4 = vmmov %vm8907_vm0 }
 0x5f2   : > { %2275 = vrot.lane.b32.xlu0 %v1947_v38, %s4322_s24  ;;  %2531 = vmatprep.subr.mxu0 %v2348_v35  ;;  %v2150_v27 = vpop.permute.xlu1 %2149  ;;  %vm8997_vm6 = vmmov %vm8907_vm0 }
 0x5f3   : > { %2532 = vmatpush2.msra.mxu0 %v2347_v62  ;;  %v2341_v8 = vsel %vm8907_vm0, %v2150_v27, %v2152_v0  ;;  %v8988_v0 = vld [vmem:[#allocation172_spill] sm:$0xff]  ;;  %vm9005_vm13 = vmmov %vm8907_vm0 }
 0x5f4   : > { %v7040_v40 = vpop.permute.xlu0 %2255  ;;  %2281 = vrot.lane.b32.xlu1 %v1949_v46, %s4322_s24  ;;  %2533 = vmatprep.subr.mxu0 %v2346_v21  ;;  %v2849_v49 = vsel %vm569_vm12, %v8993_v19, %v8988_v0  ;;  %v9027_v19 = vld [vmem:[#allocation107_spill] sm:$0xff] }
 0x5f5   : > { %2534 = vmatpush2.msra.mxu0 %v2345_v23 }
 0x5f6   : > { %3013 = vrot.lane.b32.xlu0 %v8970_v57, %s4332_s16  ;;  %2535 = vmatprep.subr.mxu0 %v2344_v6  ;;  %v2144_v45 = vpop.permute.xlu1 %2143  ;;  %v9002_v57 = vld [vmem:[#allocation162_spill] sm:$0xff] }
 0x5f7   : > { %2536 = vmatpush2.msra.mxu0 %v2343_v59  ;;  %v2339_v36 = vsel %vm8981_vm5, %v2144_v45, %v8979_v9  ;;  %vm8995_vm5 = vmmov %vm8907_vm0  ;;  %v9003_v45 = vld [vmem:[#allocation167_spill] sm:$0xff] }
 0x5f8   : > { %v7062_v53 = vpop.permute.xlu0 %2267  ;;  %3011 = vrot.lane.b32.xlu1 %v2866_v47, %s4332_s16  ;;  %2537 = vmatprep.subr.mxu0 %v2342_v2  ;;  %v2826_v51 = vsel %vm553_vm11, %v9003_v45, %v9002_v57  ;;  %v9004_v47 = vld [vmem:[#allocation154_spill] sm:$0xff]  ;;  %v9009_v9 = vld [vmem:[#allocation99_spill] sm:$0xff] }
 0x5f9   : > { %2538 = vmatpush2.msra.mxu0 %v2341_v8  ;;  %v2331_v29 = vsel %vm9005_vm13, %v9004_v47, %v9000_v63  ;;  %v2330_v8 = vsel %vm8907_vm0, %v6923_v50, %v9006_v52  ;;  %vm9020_vm13 = vmmov %vm8907_vm0  ;;  %v1959_v52 = vld [vmem:[%s8334_s4 + $0x40] sm:$0xff] }
 0x5fa   : > { %3005 = vrot.lane.b32.xlu0 %v2864_v12, %s4332_s16  ;;  %2539 = vmatprep.subr.mxu0 %v2340_v15  ;;  %v2140_v55 = vpop.permute.xlu1 %2139  ;;  %v9010_v15 = vld [vmem:[#allocation96_spill] sm:$0xff] }
 0x5fb   : > { %2540 = vmatpush2.msra.mxu0 %v2339_v36  ;;  %v2338_v16 = vsel %vm8984_vm15, %v2140_v55, %v6911_v11  ;;  %v8987_v11 = vld [vmem:[#allocation92_spill] sm:$0xff]  ;;  %vm9001_vm15 = vmmov %vm8907_vm0 }
 0x5fc   : > { %v7080_v3 = vpop.permute.xlu0 %2243  ;;  %3009 = vrot.lane.b32.xlu1 %v2865_v7, %s4332_s16  ;;  %2541 = vmatprep.subr.mxu0 %v2338_v16  ;;  %v2850_v58 = vsel %vm569_vm12, %v8988_v0, %v8987_v11  ;;  %v9013_v7 = vld [vmem:[#allocation152_spill] sm:$0xff] }
 0x5fd   : > { %v9021_v0 = vld [vmem:[#allocation60_spill] sm:$0xff] }
 0x5fe   : > { %3003 = vrot.lane.b32.xlu0 %v2863_v28, %s4332_s16  ;;  %v2138_v26 = vpop.permute.xlu1 %2137 }
 0x5ff   : > { %v2337_v1 = vsel %vm8907_vm0, %v2138_v26, %v2140_v55  ;;  %v9012_v55 = vld [vmem:[#allocation91_spill] sm:$0xff] }
 0x600   : > { %v7088_v22 = vpop.permute.xlu0 %2231  ;;  %3007 = vrot.lane.b32.xlu1 %v8975_v41, %s4332_s16  ;;  %2542 = vmatpush2.msra.mxu0 %v2337_v1  ;;  %v9007_v41 = vld [vmem:[#allocation165_spill] sm:$0xff]  ;;  %v2825_v34 = vsel %vm553_vm11, %v9012_v55, %v9003_v45 }
 0x601   : > { %v2827_v44 = vsel %vm553_vm11, %v9007_v41, %v8998_v20  ;;  %v9018_v1 = vld [vmem:[#allocation93_spill] sm:$0xff]  ;;  %v9034_v20 = vld [vmem:[#allocation68_spill] sm:$0xff] }
 0x602   : > { %3001 = vrot.lane.b32.xlu0 %v8987_v11, %s4332_s16  ;;  %v2134_v18 = vpop.permute.xlu1 %2133  ;;  %v9019_v11 = vld [vmem:[#allocation94_spill] sm:$0xff] }
 0x603   : > { %v2336_v25 = vsel %vm8989_vm3, %v2134_v18, %v6934_v32  ;;  %v8994_v32 = vld [vmem:[#allocation79_spill] sm:$0xff]  ;;  %vm9008_vm3 = vmmov %vm8907_vm0 }
 0x604   : > { %v7099_v37 = vpop.permute.xlu0 %2219  ;;  %2999 = vrot.lane.b32.xlu1 %v2850_v58, %s4332_s16  ;;  %2543 = vmatprep.subr.mxu0 %v2336_v25  ;;  %v2847_v61 = vsel %vm569_vm12, %v8994_v32, %v8991_v42  ;;  %v2329_v12 = vsel %vm9008_vm3, %v6871_v24, %v6923_v50  ;;  %v9015_v50 = vld [vmem:[#allocation122_spill] sm:$0xff]  ;;  %v2323_v58 = vsel %vm8907_vm0, %v9021_v0, %v9019_v11  ;;  %vm9024_vm3 = vmmov %vm8907_vm0 }
 0x605   : > { %v9022_v25 = vld [vmem:[#allocation70_spill] sm:$0xff] }
 0x606   : > { %2993 = vrot.lane.b32.xlu0 %v2848_v31, %s4332_s16  ;;  %v2132_v43 = vpop.permute.xlu1 %2131  ;;  %v9025_v42 = vld [vmem:[#allocation166_spill] sm:$0xff] }
 0x607   : > { %v2335_v38 = vsel %vm8992_vm4, %v2132_v43, %v2134_v18  ;;  %vm9011_vm4 = vmmov %vm8907_vm0  ;;  %v2324_v18 = vsel %vm9020_vm13, %v9019_v11, %v9018_v1  ;;  %v2806_v31 = vsel %vm537_vm10, %v9025_v42, %v9022_v25 }
 0x608   : > { %v7110_v35 = vpop.permute.xlu0 %2207  ;;  %2997 = vrot.lane.b32.xlu1 %v2849_v49, %s4332_s16  ;;  %2544 = vmatpush2.msra.mxu0 %v2335_v38  ;;  %v2328_v36 = vsel %vm9011_vm4, %v9010_v15, %v9009_v9  ;;  %vm9026_vm4 = vmmov %vm8907_vm0  ;;  %v9028_v49 = vld [vmem:[#allocation159_spill] sm:$0xff] }
 0x609   : > { %v2321_v43 = vsel %vm9026_vm4, %v6848_v56, %v6881_v17  ;;  %v9032_v56 = vld [vmem:[#allocation56_spill] sm:$0xff]  ;;  %vm9067_vm4 = vmmov %vm8907_vm0 }
 0x60a   : > { %2991 = vrot.lane.b32.xlu0 %v2847_v61, %s4332_s16  ;;  %v2128_v62 = vpop.permute.xlu1 %2127  ;;  %v1951_v61 = vld [vmem:[%s8334_s4] sm:$0xff] }
 0x60b   : > { %v2334_v27 = vsel %vm8995_vm5, %v2128_v62, %v6956_v14  ;;  %v8999_v14 = vld [vmem:[#allocation101_spill] sm:$0xff]  ;;  %vm9014_vm5 = vmmov %vm8907_vm0 }
 0x60c   : > { %v7119_v46 = vpop.permute.xlu0 %2261  ;;  %2995 = vrot.lane.b32.xlu1 %v8990_v10, %s4332_s16  ;;  %2545 = vmatprep.subr.mxu0 %v2334_v27  ;;  %v2332_v59 = vsel %vm9001_vm15, %v9000_v63, %v8999_v14  ;;  %v2327_v16 = vsel %vm9014_vm5, %v9013_v7, %v9010_v15  ;;  %vm9017_vm15 = vmmov %vm8907_vm0  ;;  %v9031_v27 = vld [vmem:[#allocation54_spill] sm:$0xff]  ;;  %v9035_v14 = vmov 0.0   ;;  %v9039_v15 = vld [vmem:[#allocation163_spill] sm:$0xff] }
 0x60d   : > { %v2325_v28 = vsel %vm9017_vm15, %v6858_v54, %v6901_v13  ;;  %vm9029_vm5 = vmmov %vm8907_vm0  ;;  %v9041_v7 = vld [vmem:[#allocation168_spill] sm:$0xff]  ;;  %vm9057_vm15 = vcmask 121856  }
 0x60e   : > { %2989 = vrot.lane.b32.xlu0 %v8996_v60, %s4332_s16  ;;  %v2126_v21 = vpop.permute.xlu1 %2125  ;;  %v2320_v32 = vsel %vm9029_vm5, %v9028_v49, %v9027_v19  ;;  %v9047_v19 = vld [vmem:[#allocation170_spill] sm:$0xff]  ;;  %vm9060_vm13 = vmmov %vm9057_vm15 }
 0x60f   : > { %v2333_v23 = vsel %vm8997_vm6, %v2126_v21, %v2128_v62  ;;  %vm9016_vm6 = vmmov %vm8907_vm0  ;;  %v9030_v62 = vld [vmem:[#allocation129_spill] sm:$0xff]  ;;  %v1956_v21 = vld [vmem:[%s8334_s4 + $0x28] sm:$0xff] }
 0x610   : > { %v7129_v6 = vpop.permute.xlu0 %2201  ;;  %2987 = vrot.lane.b32.xlu1 %v2828_v5, %s4332_s16  ;;  %2546 = vmatpush2.msra.mxu0 %v2333_v23  ;;  %v2326_v30 = vsel %vm9016_vm6, %v6901_v13, %v9015_v50  ;;  %v9023_v13 = vld [vmem:[#allocation113_spill] sm:$0xff]  ;;  %v2804_v60 = vsel %vm537_vm10, %v9031_v27, %v9030_v62  ;;  %vm9033_vm6 = vmmov %vm8907_vm0  ;;  %v2805_v5 = vsel %vm537_vm10, %v9034_v20, %v9025_v42  ;;  %v9046_v42 = vld [vmem:[#allocation175_spill] sm:$0xff] }
 0x611   : > { %2547 = vmatprep.subr.mxu0 %v2332_v59  ;;  %v2322_v10 = vsel %vm9024_vm3, %v6881_v17, %v9023_v13  ;;  %v2319_v17 = vsel %vm9033_vm6, %v9032_v56, %v9028_v49  ;;  %v1955_v59 = vld [vmem:[%s8334_s4 + $0x20] sm:$0xff]  ;;  %vm9066_vm3 = vmmov %vm8907_vm0 }
 0x612   : > { %2981 = vrot.lane.b32.xlu0 %v2826_v51, %s4332_s16  ;;  %2548 = vmatpush2.msra.mxu0 %v2331_v29  ;;  %v7142_v2 = vpop.permute.xlu1 %2187  ;;  %v1960_v51 = vld [vmem:[%s8334_s4 + $0x48] sm:$0xff]  ;;  %v9049_v56 = vld [vmem:[#allocation66_spill] sm:$0xff]  ;;  %vm9068_vm5 = vmmov %vm8907_vm0 }
 0x613   : > { %2549 = vmatprep.subr.mxu0 %v2330_v8  ;;  %v9037_v8 = vld [vmem:[#allocation169_spill] sm:$0xff]  ;;  %vm9071_vm6 = vmmov %vm8907_vm0 }
 0x614   : > { %v7153_v33 = vpop.permute.xlu0 %2273  ;;  %2985 = vrot.lane.b32.xlu1 %v2827_v44, %s4332_s16  ;;  %2550 = vmatpush2.msra.mxu0 %v2329_v12  ;;  %v9038_v44 = vld [vmem:[#allocation176_spill] sm:$0xff] }
 0x615   : > { %2551 = vmatprep.subr.mxu0 %v2328_v36  ;;  %v2790_v12 = vsel %vm523_vm9, %v9038_v44, %v9037_v8  ;;  %v9040_v36 = vld [vmem:[#allocation171_spill] sm:$0xff] }
 0x616   : > { %2979 = vrot.lane.b32.xlu0 %v2825_v34, %s4332_s16  ;;  %2552 = vmatpush2.msra.mxu0 %v2327_v16  ;;  %v7166_v24 = vpop.permute.xlu1 %2185  ;;  %v2788_v55 = vsel %vm523_vm9, %v9040_v36, %v9039_v15  ;;  %v2789_v16 = vsel %vm523_vm9, %v9041_v7, %v9038_v44  ;;  %v9056_v7 = vld [vmem:[#allocation29_spill] sm:$0xff] }
 0x617   : > { %2553 = vmatprep.subr.mxu0 %v2326_v30  ;;  %v9042_v30 = vld [vmem:[#allocation58_spill] sm:$0xff] }
 0x618   : > { %v7174_v26 = vpop.permute.xlu0 %2251  ;;  %2983 = vrot.lane.b32.xlu1 %v9002_v57, %s4332_s16  ;;  %2554 = vmatpush2.msra.mxu0 %v2325_v28  ;;  %v9036_v57 = vld [vmem:[#allocation67_spill] sm:$0xff]  ;;  %v2787_v28 = vsel %vm523_vm9, %v9042_v30, %v9040_v36 }
 0x619   : > { %2555 = vmatprep.subr.mxu0 %v2324_v18  ;;  %v2803_v45 = vsel %vm537_vm10, %v9036_v57, %v9031_v27  ;;  %v9043_v18 = vld [vmem:[#allocation173_spill] sm:$0xff]  ;;  %v9052_v57 = vld [vmem:[#allocation88_spill] sm:$0xff] }
 0x61a   : > { %2977 = vrot.lane.b32.xlu0 %v9022_v25, %s4332_s16  ;;  %2556 = vmatpush2.msra.mxu0 %v2323_v58  ;;  %v7186_v54 = vpop.permute.xlu1 %2183  ;;  %v9044_v58 = vld [vmem:[#allocation178_spill] sm:$0xff] }
 0x61b   : > { %2557 = vmatprep.subr.mxu0 %v2322_v10  ;;  %v2768_v25 = vsel %vm507_vm8, %v9044_v58, %v9043_v18  ;;  %v9045_v10 = vld [vmem:[#allocation164_spill] sm:$0xff]  ;;  %v2767_v49 = vsel %vm507_vm8, %v9047_v19, %v9044_v58 }
 0x61c   : > { %v7197_v38 = vpop.permute.xlu0 %2249  ;;  %2975 = vrot.lane.b32.xlu1 %v2806_v31, %s4332_s16  ;;  %2558 = vmatpush2.msra.mxu0 %v2321_v43  ;;  %v2766_v31 = vsel %vm507_vm8, %v9046_v42, %v9045_v10  ;;  %v9059_v58 = vld [vmem:[#allocation28_spill] sm:$0xff] }
 0x61d   : > { %2559 = vmatprep.subr.mxu0 %v2320_v32 }
 0x61e   : > { %2969 = vrot.lane.b32.xlu0 %v2804_v60, %s4332_s16  ;;  %2560 = vmatpush2.msra.mxu0 %v2319_v17  ;;  %v7216_v23 = vpop.permute.xlu1 %2195 }
 0x61f   : > { %2562 = vmatmul.mubr.f32.vlgmr.msra.gmra.mxu0 %v1951_v61  ;;  %3209 = vmatprep.subr.mxu0 %v9035_v14  ;;  %v9048_v61 = vld [vmem:[#allocation78_spill] sm:$0xff] }
 0x620   : > { %v7222_v63 = vpop.permute.xlu0 %2225  ;;  %2973 = vrot.lane.b32.xlu1 %v2805_v5, %s4332_s16  ;;  %2567 = vmatprep.mubr.f32.mxu0 %v1956_v21  ;;  %v9050_v21 = vld [vmem:[#allocation179_spill] sm:$0xff] }
 0x621   : > { %v2746_v20 = vsel %vm491_vm7, %v9050_v21, %v9049_v56 }
 0x622   : > { %2967 = vrot.lane.b32.xlu0 %v2803_v45, %s4332_s16  ;;  %v7235_v47 = vpop.permute.xlu1 %2279 }
 0x623   : > { %2568 = vmatmul.mubr.f32.gmra.mxu0 %v1955_v59  ;;  %v9051_v59 = vld [vmem:[#allocation131_spill] sm:$0xff] }
 0x624   : > { %v7237_v29 = vpop.permute.xlu0 %2213  ;;  %2971 = vrot.lane.b32.xlu1 %v9030_v62, %s4332_s16  ;;  %2573 = vmatprep.mubr.f32.mxu0 %v1960_v51  ;;  %v2765_v62 = vsel %vm507_vm8, %v9048_v61, %v9046_v42  ;;  %v2744_v45 = vsel %vm491_vm7, %v9052_v57, %v9051_v59  ;;  %v9061_v42 = vld [vmem:[#allocation133_spill] sm:$0xff] }
 0x626   : > { %2965 = vrot.lane.b32.xlu0 %v9037_v8, %s4332_s16  ;;  %v7246_v41 = vpop.permute.xlu1 %2253 }
 0x627   : > { %2574 = vmatmul.mubr.f32.gmra.mxu0 %v1959_v52  ;;  %v9053_v52 = vld [vmem:[#allocation177_spill] sm:$0xff] }
 0x628   : > { %v7251_v9 = vpop.permute.xlu0 %2193  ;;  %2963 = vrot.lane.b32.xlu1 %v2790_v12, %s4332_s16  ;;  %v2745_v8 = vsel %vm491_vm7, %v9053_v52, %v9050_v21  ;;  %v9054_v12 = vld [vmem:[#allocation69_spill] sm:$0xff]  ;;  %v9065_v52 = vld [vmem:[#allocation102_spill] sm:$0xff] }
 0x62a   : > { %2957 = vrot.lane.b32.xlu0 %v2788_v55, %s4332_s16  ;;  %v7258_v34 = vpop.permute.xlu1 %2237  ;;  %v9055_v55 = vld [vmem:[#allocation4_spill] sm:$0xff] }
 0x62c   : > { %v7263_v50 = vpop.permute.xlu0 %2191  ;;  %2961 = vrot.lane.b32.xlu1 %v2789_v16, %s4332_s16  ;;  %v2668_v16 = vsel %vm9057_vm15, %v9056_v7, %v9055_v55  ;;  %v7367_v55 = vld [vmem:[%s8336_s6 + $0x8] sm:$0xff]  ;;  %vm9072_vm15 = vmmov %vm8907_vm0 }
 0x62d   : > { %4185 = vmatprep.mubr.msk.f32.mxu0 %vm2487_vm1, %v7367_v55 }
 0x62e   : > { %2955 = vrot.lane.b32.xlu0 %v2787_v28, %s4332_s16  ;;  %v7270_v1 = vpop.permute.xlu1 %2265  ;;  %v9058_v28 = vld [vmem:[#allocation14_spill] sm:$0xff] }
 0x630   : > { %v7272_v11 = vpop.permute.xlu0 %2285  ;;  %2959 = vrot.lane.b32.xlu1 %v9039_v15, %s4332_s16  ;;  %v2743_v15 = vsel %vm491_vm7, %v9054_v12, %v9052_v57 }
 0x632   : > { %2953 = vrot.lane.b32.xlu0 %v9043_v18, %s4332_s16  ;;  %v7278_v0 = vpop.permute.xlu1 %2241  ;;  %v2677_v18 = vmul.f32 %v2668_v16, %v9058_v28 }
 0x634   : > { %v2264_v13 = vpop.permute.xlu0 %2263  ;;  %2951 = vrot.lane.b32.xlu1 %v2768_v25, %s4332_s16  ;;  %v7341_v25 = vsel %vm9060_vm13, %v9059_v58, %v9056_v7  ;;  %vm9075_vm13 = vmmov %vm8907_vm0 }
 0x636   : > { %2945 = vrot.lane.b32.xlu0 %v2766_v31, %s4332_s16  ;;  %v7288_v43 = vpop.permute.xlu1 %2239  ;;  %v2676_v31 = vmul.f32 %v7341_v25, %v9061_v42 }
 0x638   : > { %v7293_v32 = vpop.permute.xlu0 %2227  ;;  %2949 = vrot.lane.b32.xlu1 %v2767_v49, %s4332_s16  ;;  %v9062_v49 = vld [vmem:[#allocation5_spill] sm:$0xff] }
 0x639   : > { %v2673_v61 = vmul.f32 %v7341_v25, %v9062_v49 }
 0x63a   : > { %2943 = vrot.lane.b32.xlu0 %v2765_v62, %s4332_s16  ;;  %v7300_v27 = vpop.permute.xlu1 %2229 }
 0x63c   : > { %v7302_v60 = vpop.permute.xlu0 %2215  ;;  %2947 = vrot.lane.b32.xlu1 %v9045_v10, %s4332_s16 }
 0x63e   : > { %2941 = vrot.lane.b32.xlu0 %v9049_v56, %s4332_s16  ;;  %v7308_v17 = vpop.permute.xlu1 %2217  ;;  %v9063_v56 = vld [vmem:[#allocation124_spill] sm:$0xff] }
 0x63f   : > { %v2675_v21 = vmul.f32 %v9059_v58, %v9063_v56 }
 0x640   : > { %v7313_v5 = vpop.permute.xlu0 %2203  ;;  %2939 = vrot.lane.b32.xlu1 %v2746_v20, %s4332_s16 }
 0x642   : > { %2933 = vrot.lane.b32.xlu0 %v2744_v45, %s4332_s16  ;;  %v7320_v51 = vpop.permute.xlu1 %2205 }
 0x644   : > { %v7325_v44 = vpop.permute.xlu0 %2277  ;;  %2937 = vrot.lane.b32.xlu1 %v2745_v8, %s4332_s16  ;;  %v2674_v8 = vmul.f32 %v2668_v16, %v9065_v52  ;;  %v9069_v16 = vld [vmem:[#allocation72_spill] sm:$0xff]  ;;  %v9079_v52 = vld [vmem:[#allocation81_spill] sm:$0xff] }
 0x646   : > { %2931 = vrot.lane.b32.xlu0 %v2743_v15, %s4332_s16  ;;  %v2260_v36 = vpop.permute.xlu1 %2259 }
 0x647   : > { %v2378_v49 = vsel %vm9071_vm6, %v2260_v36, %v7119_v46  ;;  %v2375_v46 = vsel %vm8907_vm0, %v7174_v26, %v7246_v41  ;;  %vm9081_vm6 = vmmov %vm8907_vm0 }
 0x648   : > { %v2258_v30 = vpop.permute.xlu0 %2257  ;;  %2935 = vrot.lane.b32.xlu1 %v9051_v59, %s4332_s16  ;;  %v9064_v59 = vld [vmem:[#allocation116_spill] sm:$0xff] }
 0x649   : > { %v2672_v57 = vmul.f32 %v9059_v58, %v9064_v59 }
 0x64a   : > { %2929 = vrot.lane.b32.xlu0 %v2677_v18, %s4332_s16  ;;  %v7344_v10 = vpop.permute.xlu1 %2199  ;;  %v2380_v18 = vsel %vm9067_vm4, %v7270_v1, %v7062_v53  ;;  %v2377_v53 = vsel %vm9072_vm15, %v2258_v30, %v2260_v36  ;;  %v9076_v36 = vld [vmem:[#allocation180_spill] sm:$0xff]  ;;  %vm9078_vm4 = vmmov %vm8907_vm0 }
 0x64b   : > { %vm9082_vm15 = vmmov %vm8907_vm0 }
 0x64c   : > { %v2270_v19 = vpop.permute.xlu0 %2269  ;;  %2927 = vrot.lane.b32.xlu1 %v2676_v31, %s4332_s16  ;;  %v9070_v31 = vld [vmem:[#allocation181_spill] sm:$0xff] }
 0x64d   : > { %v2887_v30 = vsel %vm599_vm14, %v9076_v36, %v9070_v31 }
 0x64e   : > { %2921 = vrot.lane.b32.xlu0 %v2673_v61, %s4332_s16  ;;  %v7352_v62 = vpop.permute.xlu1 %2197 }
 0x650   : > { %v2246_v20 = vpop.permute.xlu0 %2245  ;;  %2925 = vrot.lane.b32.xlu1 %v2675_v21, %s4332_s16  ;;  %v2376_v21 = vsel %vm9075_vm13, %v7246_v41, %v7040_v40  ;;  %v2371_v41 = vsel %vm9081_vm6, %v7288_v43, %v7278_v0  ;;  %vm9083_vm13 = vmmov %vm8907_vm0 }
 0x651   : > { %vm9087_vm6 = vmmov %vm8907_vm0 }
 0x652   : > { %2919 = vrot.lane.b32.xlu0 %v2672_v57, %s4332_s16  ;;  %v2272_v45 = vpop.permute.xlu1 %2271 }
 0x653   : > { %v2382_v12 = vsel %vm8907_vm0, %v2272_v45, %v7153_v33  ;;  %v2381_v15 = vsel %vm9066_vm3, %v2270_v19, %v2272_v45  ;;  %v2379_v33 = vsel %vm9068_vm5, %v2264_v13, %v7270_v1  ;;  %v2888_v19 = vsel %vm599_vm14, %v9070_v31, %v9069_v16  ;;  %v9073_v1 = vld [vmem:[#allocation71_spill] sm:$0xff]  ;;  %v9074_v13 = vld [vmem:[#allocation84_spill] sm:$0xff]  ;;  %vm9077_vm3 = vmmov %vm8907_vm0 }
 0x654   : > { %v2236_v28 = vpop.permute.xlu0 %2235  ;;  %2923 = vrot.lane.b32.xlu1 %v2674_v8, %s4332_s16  ;;  %2580 = vmatprep.subr.mxu1 %v2382_v12  ;;  %v2886_v56 = vsel %vm599_vm14, %v9074_v13, %v9073_v1  ;;  %v2885_v8 = vsel %vm599_vm14, %v9079_v52, %v9074_v13  ;;  %vm9080_vm5 = vmmov %vm8907_vm0  ;;  %v2897_v12 = vld [vmem:[%s8337_s7 + $0x10] sm:$0xff] }
 0x655   : > { %2581 = vmatpush1.msra.mxu1 %v2381_v15  ;;  %v2372_v26 = vsel %vm9080_vm5, %v7278_v0, %v7080_v3  ;;  %v2368_v3 = vsel %vm8907_vm0, %v7300_v27, %v7088_v22  ;;  %vm9086_vm5 = vmmov %vm8907_vm0  ;;  %v2364_v22 = vsel %vm9087_vm6, %v7308_v17, %v7099_v37 }
 0x656   : > { %3025 = vrot.lane.b32.xlu0 %v9069_v16, %s4332_s16  ;;  %2582 = vmatprep.subr.mxu1 %v2380_v18  ;;  %v2248_v42 = vpop.permute.xlu1 %2247  ;;  %vm9095_vm6 = vmmov %vm8907_vm0 }
 0x657   : > { %2583 = vmatpush1.msra.mxu1 %v2379_v33  ;;  %v2374_v57 = vsel %vm9077_vm3, %v2248_v42, %v7197_v38  ;;  %v2373_v40 = vsel %vm9078_vm4, %v2246_v20, %v2248_v42  ;;  %v2370_v20 = vsel %vm9082_vm15, %v2236_v28, %v7258_v34  ;;  %v2895_v34 = vld [vmem:[%s8337_s7] sm:$0xff]  ;;  %vm9084_vm3 = vmmov %vm8907_vm0  ;;  %v2896_v42 = vld [vmem:[%s8337_s7 + $0x8] sm:$0xff] }
 0x658   : > { %v2234_v61 = vpop.permute.xlu0 %2233  ;;  %3023 = vrot.lane.b32.xlu1 %v2888_v19, %s4332_s16  ;;  %2584 = vmatprep.subr.mxu1 %v2378_v49  ;;  %v2367_v43 = vsel %vm9084_vm3, %v7293_v32, %v7300_v27  ;;  %vm9085_vm4 = vmmov %vm8907_vm0  ;;  %v9089_v27 = vld [vmem:[#allocation45_spill] sm:$0xff] }
 0x659   : > { %2585 = vmatpush1.msra.mxu1 %v2377_v53  ;;  %v2369_v15 = vsel %vm9083_vm13, %v2234_v61, %v2236_v28  ;;  %vm9088_vm15 = vmmov %vm8907_vm0  ;;  %v9094_v53 = vld [vmem:[#allocation46_spill] sm:$0xff] }
 0x65a   : > { %3017 = vrot.lane.b32.xlu0 %v2886_v56, %s4332_s16  ;;  %2586 = vmatprep.subr.mxu1 %v2376_v21  ;;  %v2224_v59 = vpop.permute.xlu1 %2223  ;;  %vm9090_vm13 = vmmov %vm8907_vm0  ;;  %v1958_v56 = vld [vmem:[%s8334_s4 + $0x38] sm:$0xff] }
 0x65b   : > { %2587 = vmatpush1.msra.mxu1 %v2375_v46  ;;  %v2366_v28 = vsel %vm9085_vm4, %v2224_v59, %v7222_v63  ;;  %v2363_v63 = vsel %vm9088_vm15, %v7302_v60, %v7308_v17  ;;  %vm9091_vm3 = vmmov %vm8907_vm0 }
 0x65c   : > { %v2222_v45 = vpop.permute.xlu0 %2221  ;;  %3021 = vrot.lane.b32.xlu1 %v2887_v30, %s4332_s16  ;;  %2588 = vmatprep.subr.mxu1 %v2374_v57  ;;  %v2360_v49 = vsel %vm9091_vm3, %v7320_v51, %v7110_v35  ;;  %vm9092_vm4 = vmmov %vm8907_vm0  ;;  %v2357_v35 = vsel %vm9095_vm6, %v7352_v62, %v7344_v10  ;;  %v1962_v57 = vld [vmem:[%s8334_s4 + $0x58] sm:$0xff] }
 0x65d   : > { %2589 = vmatpush1.msra.mxu1 %v2373_v40  ;;  %v2365_v33 = vsel %vm9086_vm5, %v2222_v45, %v2224_v59  ;;  %v2359_v17 = vsel %vm9092_vm4, %v7313_v5, %v7320_v51  ;;  %vm9093_vm5 = vmmov %vm8907_vm0 }
 0x65e   : > { %3015 = vrot.lane.b32.xlu0 %v2885_v8, %s4332_s16  ;;  %2590 = vmatprep.subr.mxu1 %v2372_v26  ;;  %v2212_v38 = vpop.permute.xlu1 %2211  ;;  %vm9097_vm15 = vmmov %vm8907_vm0  ;;  %v1961_v8 = vld [vmem:[%s8334_s4 + $0x50] sm:$0xff] }
 0x65f   : > { %2591 = vmatpush1.msra.mxu1 %v2371_v41  ;;  %v2362_v31 = vsel %vm9090_vm13, %v2212_v38, %v7237_v29  ;;  %v2358_v29 = vsel %vm9093_vm5, %v7344_v10, %v7129_v6  ;;  %v2356_v5 = vsel %vm9097_vm15, %v7251_v9, %v7216_v23  ;;  %vm9098_vm13 = vmmov %vm8907_vm0  ;;  %v2354_v10 = vsel %vm8907_vm0, %v7142_v2, %v6978_v4 }
 0x660   : > { %v2210_v18 = vpop.permute.xlu0 %2209  ;;  %3019 = vrot.lane.b32.xlu1 %v9073_v1, %s4332_s16  ;;  %2592 = vmatprep.subr.mxu1 %v2370_v20  ;;  %v9096_v1 = vld [vmem:[#allocation2_spill] sm:$0xff]  ;;  %v2355_v6 = vsel %vm9098_vm13, %v7263_v50, %v7251_v9  ;;  %vm9099_vm3 = vmmov %vm8907_vm0 }
 0x661   : > { %2593 = vmatpush1.msra.mxu1 %v2369_v15  ;;  %v2361_v19 = vsel %vm8907_vm0, %v2210_v18, %v2212_v38  ;;  %v2353_v62 = vsel %vm9099_vm3, %v7166_v24, %v7142_v2  ;;  %vm9100_vm4 = vmmov %vm8907_vm0 }
 0x662   : > { %2910 = vperm.xlu0 %4282, %v2897_v12   ;;  %2594 = vmatprep.subr.mxu1 %v2368_v3  ;;  %v2284_v0 = vpop.permute.xlu1 %2283  ;;  %v2352_v23 = vsel %vm9100_vm4, %v7000_v48, %v7186_v54  ;;  %vm9101_vm5 = vmmov %vm8907_vm0 }
 0x663   : > { %2595 = vmatpush1.msra.mxu1 %v2367_v43  ;;  %v2351_v9 = vsel %vm9101_vm5, %v7022_v39, %v7000_v48  ;;  %vm9102_vm6 = vmmov %vm8907_vm0  ;;  %v1953_v48 = vld [vmem:[%s8334_s4 + $0x10] sm:$0xff] }
 0x664   : > { %v2276_v16 = vpop.permute.xlu0 %2275  ;;  %2900 = vperm.xlu1 %4283, %v2895_v34   ;;  %2596 = vmatprep.subr.mxu1 %v2366_v28  ;;  %v2386_v4 = vsel %vm9102_vm6, %v2284_v0, %v7272_v11  ;;  %vm9103_vm15 = vmmov %vm8907_vm0 }
 0x665   : > { %2597 = vmatpush1.msra.mxu1 %v2365_v33  ;;  %vm9104_vm13 = vmmov %vm8907_vm0  ;;  %v2383_v39 = vsel %vm8907_vm0, %v2276_v16, %v7325_v44 }
 0x666   : > { %2598 = vmatprep.subr.mxu1 %v2364_v22  ;;  %v2282_v32 = vpop.permute.xlu1 %2281  ;;  %3294 = vrot.lane.b32.xlu0 %v9089_v27, %s4317_s27  ;;  %v2384_v54 = vsel %vm9104_vm13, %v7325_v44, %v7235_v47  ;;  %v1957_v44 = vld [vmem:[%s8334_s4 + $0x30] sm:$0xff] }
 0x667   : > { %2599 = vmatpush1.msra.mxu1 %v2363_v63  ;;  %v2385_v2 = vsel %vm9103_vm15, %v2282_v32, %v2284_v0 }
 0x668   : > { %v3014_v37 = vpop.permute.xlu0 %3013  ;;  %2905 = vperm.xlu1 %4283, %v2896_v42   ;;  %2600 = vmatprep.subr.mxu1 %v2362_v31 }
 0x669   : > { %2601 = vmatpush1.msra.mxu1 %v2361_v19  ;;  %3210 = vmatpush1.msra.mxu0 %v3014_v37 }
 0x66a   : > { %2602 = vmatprep.subr.mxu1 %v2360_v49  ;;  %v3012_v60 = vpop.permute.xlu1 %3011  ;;  %3211 = vmatprep.subr.mxu0 %v9035_v14 }
 0x66b   : > { %2603 = vmatpush1.msra.mxu1 %v2359_v17  ;;  %3292 = vrot.lane.b32.xlu0 %v9094_v53, %s4317_s27  ;;  %v3058_v21 = vsel %vm1714_vm2, %v3012_v60, %v3014_v37 }
 0x66c   : > { %v3006_v61 = vpop.permute.xlu0 %3005  ;;  %2604 = vmatprep.subr.mxu1 %v2358_v29  ;;  %3296 = vrot.lane.b32.xlu1 %v9096_v1, %s4317_s27 }
 0x66d   : > { %2605 = vmatpush1.msra.mxu1 %v2357_v35 }
 0x66e   : > { %2606 = vmatprep.subr.mxu1 %v2356_v5  ;;  %v3010_v51 = vpop.permute.xlu1 %3009 }
 0x66f   : > { %2607 = vmatpush1.msra.mxu1 %v2355_v6  ;;  %v3057_v47 = vsel %vm1714_vm2, %v3010_v51, %v3012_v60 }
 0x670   : > { %v3004_v13 = vpop.permute.xlu0 %3003  ;;  %2608 = vmatprep.subr.mxu1 %v2354_v10 }
 0x671   : > { %2609 = vmatpush1.msra.mxu1 %v2353_v62  ;;  %v3055_v36 = vsel %vm1714_vm2, %v3004_v13, %v3006_v61 }
 0x672   : > { %2610 = vmatprep.subr.mxu1 %v2352_v23  ;;  %v3008_v50 = vpop.permute.xlu1 %3007 }
 0x673   : > { %2611 = vmatpush1.msra.mxu1 %v2351_v9  ;;  %3212 = vmatpush1.msra.mxu0 %v3008_v50  ;;  %v3056_v46 = vsel %vm1714_vm2, %v3006_v61, %v3008_v50 }
 0x674   : > { %v3002_v24 = vpop.permute.xlu0 %3001  ;;  %2640 = vmatprep.subr.mxu1 %v2386_v4  ;;  %3213 = vmatprep.subr.mxu0 %v9035_v14 }
 0x675   : > { %2641 = vmatpush2.msra.mxu1 %v2385_v2  ;;  %3214 = vmatpush1.msra.mxu0 %v3002_v24 }
 0x676   : > { %2642 = vmatprep.subr.mxu1 %v2384_v54  ;;  %v3000_v11 = vpop.permute.xlu1 %2999  ;;  %3215 = vmatprep.subr.mxu0 %v9035_v14 }
 0x677   : > { %2643 = vmatpush2.msra.mxu1 %v2383_v39  ;;  %v3054_v40 = vsel %vm1714_vm2, %v3000_v11, %v3002_v24 }
 0x678   : > { %v2994_v59 = vpop.permute.xlu0 %2993  ;;  %2645 = vmatmul.mubr.f32.vlgmr.msra.gmra.mxu1 %v1953_v48  ;;  %3126 = vmatprep.subr.mxu1 %v3058_v21 }
 0x679   : > { %3127 = vmatpush1.msra.mxu1 %v3057_v47  ;;  %4180 = vmatprep.mubr.msk.f32.mxu1 %vm2487_vm1, %v1958_v56 }
 0x67a   : > { %3128 = vmatprep.subr.mxu1 %v3056_v46  ;;  %v2998_v30 = vpop.permute.xlu1 %2997 }
 0x67b   : > { %v3053_v45 = vsel %vm1714_vm2, %v2998_v30, %v3000_v11  ;;  %3129 = vmatpush1.msra.mxu1 %v3055_v36 }
 0x67c   : > { %v2992_v52 = vpop.permute.xlu0 %2991  ;;  %2651 = vmatmul.mubr.f32.gmra.mxu1 %v1957_v44  ;;  %3130 = vmatprep.subr.mxu1 %v3054_v40 }
 0x67d   : > { %3131 = vmatpush1.msra.mxu1 %v3053_v45  ;;  %4181 = vmatprep.mubr.msk.f32.mxu1 %vm2487_vm1, %v1962_v57  ;;  %v3051_v38 = vsel %vm1714_vm2, %v2992_v52, %v2994_v59 }
 0x67e   : > { %v2996_v26 = vpop.permute.xlu1 %2995 }
 0x67f   : > { %3216 = vmatpush1.msra.mxu0 %v2996_v26  ;;  %v3052_v41 = vsel %vm1714_vm2, %v2994_v59, %v2996_v26 }
 0x680   : > { %v2990_v20 = vpop.permute.xlu0 %2989  ;;  %2657 = vmatmul.mubr.f32.gmra.mxu1 %v1961_v8  ;;  %3132 = vmatprep.subr.mxu1 %v3052_v41 }
 0x681   : > { %3217 = vmatprep.subr.mxu0 %v9035_v14  ;;  %3133 = vmatpush1.msra.mxu1 %v3051_v38 }
 0x682   : > { %3218 = vmatpush1.msra.mxu0 %v2990_v20  ;;  %v2988_v12 = vpop.permute.xlu1 %2987  ;;  %4182 = vmatprep.mubr.msk.f32.mxu1 %vm2487_vm1, %v7367_v55 }
 0x683   : > { %v3050_v15 = vsel %vm1714_vm2, %v2988_v12, %v2990_v20  ;;  %3219 = vmatprep.subr.mxu0 %v9035_v14 }
 0x684   : > { %v2982_v18 = vpop.permute.xlu0 %2981  ;;  %3134 = vmatprep.subr.mxu1 %v3050_v15 }
 0x686   : > { %v2986_v3 = vpop.permute.xlu1 %2985 }
 0x687   : > { %v3049_v34 = vsel %vm1714_vm2, %v2986_v3, %v2988_v12 }
 0x688   : > { %v2980_v0 = vpop.permute.xlu0 %2979  ;;  %3135 = vmatpush1.msra.mxu1 %v3049_v34 }
 0x689   : > { %v3047_v33 = vsel %vm1714_vm2, %v2980_v0, %v2982_v18 }
 0x68a   : > { %v2984_v43 = vpop.permute.xlu1 %2983 }
 0x68b   : > { %3220 = vmatpush1.msra.mxu0 %v2984_v43  ;;  %v3048_v28 = vsel %vm1714_vm2, %v2982_v18, %v2984_v43  ;;  %v2889_v43 = vld [vmem:[%s8336_s6] sm:$0xff] }
 0x68c   : > { %v2978_v16 = vpop.permute.xlu0 %2977  ;;  %3136 = vmatprep.subr.mxu1 %v3048_v28  ;;  %3221 = vmatprep.subr.mxu0 %v9035_v14 }
 0x68d   : > { %3137 = vmatpush1.msra.mxu1 %v3047_v33  ;;  %3222 = vmatpush1.msra.mxu0 %v2978_v16  ;;  %v2892_v33 = vld [vmem:[%s8336_s6 + $0x18] sm:$0xff] }
 0x68e   : > { %v2976_v55 = vpop.permute.xlu1 %2975  ;;  %3223 = vmatprep.subr.mxu0 %v9035_v14 }
 0x68f   : > { %v3046_v22 = vsel %vm1714_vm2, %v2976_v55, %v2978_v16 }
 0x690   : > { %v2970_v42 = vpop.permute.xlu0 %2969  ;;  %3138 = vmatprep.subr.mxu1 %v3046_v22  ;;  %v2894_v22 = vld [vmem:[%s8336_s6 + $0x28] sm:$0xff] }
 0x692   : > { %v2974_v32 = vpop.permute.xlu1 %2973 }
 0x693   : > { %v3045_v63 = vsel %vm1714_vm2, %v2974_v32, %v2976_v55  ;;  %v2891_v55 = vld [vmem:[%s8336_s6 + $0x10] sm:$0xff] }
 0x694   : > { %v2968_v27 = vpop.permute.xlu0 %2967  ;;  %3139 = vmatpush1.msra.mxu1 %v3045_v63 }
 0x695   : > { %v3043_v37 = vsel %vm1714_vm2, %v2968_v27, %v2970_v42 }
 0x696   : > { %v2972_v31 = vpop.permute.xlu1 %2971 }
 0x697   : > { %3224 = vmatpush1.msra.mxu0 %v2972_v31  ;;  %v3044_v19 = vsel %vm1714_vm2, %v2970_v42, %v2972_v31  ;;  %v2893_v42 = vld [vmem:[%s8336_s6 + $0x20] sm:$0xff] }
 0x698   : > { %v2966_v49 = vpop.permute.xlu0 %2965  ;;  %3140 = vmatprep.subr.mxu1 %v3044_v19  ;;  %3225 = vmatprep.subr.mxu0 %v9035_v14  ;;  %v9105_v19 = vld [vmem:[#allocation23_spill] sm:$0xff] }
 0x699   : > { %3141 = vmatpush1.msra.mxu1 %v3043_v37  ;;  %3226 = vmatpush1.msra.mxu0 %v2966_v49 }
 0x69a   : > { %v2964_v60 = vpop.permute.xlu1 %2963  ;;  %3227 = vmatprep.subr.mxu0 %v9035_v14 }
 0x69b   : > { %v3042_v17 = vsel %vm1714_vm2, %v2964_v60, %v2966_v49 }
 0x69c   : > { %v2958_v29 = vpop.permute.xlu0 %2957  ;;  %3142 = vmatprep.subr.mxu1 %v3042_v17 }
 0x69e   : > { %v2962_v53 = vpop.permute.xlu1 %2961 }
 0x69f   : > { %v3041_v35 = vsel %vm1714_vm2, %v2962_v53, %v2964_v60 }
 0x6a0   : > { %v2956_v61 = vpop.permute.xlu0 %2955  ;;  %3143 = vmatpush1.msra.mxu1 %v3041_v35  ;;  %v9106_v35 = vld [vmem:[#allocation24_spill] sm:$0xff] }
 0x6a1   : > { %v3039_v6 = vsel %vm1714_vm2, %v2956_v61, %v2958_v29 }
 0x6a2   : > { %v2960_v1 = vpop.permute.xlu1 %2959 }
 0x6a3   : > { %3228 = vmatpush1.msra.mxu0 %v2960_v1  ;;  %v3040_v5 = vsel %vm1714_vm2, %v2958_v29, %v2960_v1 }
 0x6a4   : > { %v2954_v51 = vpop.permute.xlu0 %2953  ;;  %3144 = vmatprep.subr.mxu1 %v3040_v5  ;;  %3229 = vmatprep.subr.mxu0 %v9035_v14 }
 0x6a5   : > { %3145 = vmatpush1.msra.mxu1 %v3039_v6  ;;  %3230 = vmatpush1.msra.mxu0 %v2954_v51 }
 0x6a6   : > { %v2952_v10 = vpop.permute.xlu1 %2951  ;;  %3231 = vmatprep.subr.mxu0 %v9035_v14 }
 0x6a7   : > { %v3038_v62 = vsel %vm1714_vm2, %v2952_v10, %v2954_v51 }
 0x6a8   : > { %v2946_v13 = vpop.permute.xlu0 %2945  ;;  %3146 = vmatprep.subr.mxu1 %v3038_v62 }
 0x6aa   : > { %v2950_v23 = vpop.permute.xlu1 %2949 }
 0x6ab   : > { %v3037_v9 = vsel %vm1714_vm2, %v2950_v23, %v2952_v10 }
 0x6ac   : > { %v2944_v50 = vpop.permute.xlu0 %2943  ;;  %3147 = vmatpush1.msra.mxu1 %v3037_v9 }
 0x6ad   : > { %v3035_v24 = vsel %vm1714_vm2, %v2944_v50, %v2946_v13 }
 0x6ae   : > { %v2948_v4 = vpop.permute.xlu1 %2947 }
 0x6af   : > { %3232 = vmatpush1.msra.mxu0 %v2948_v4  ;;  %v3036_v2 = vsel %vm1714_vm2, %v2946_v13, %v2948_v4  ;;  %v9107_v13 = vld [vmem:[#allocation25_spill] sm:$0xff] }
 0x6b0   : > { %v2942_v54 = vpop.permute.xlu0 %2941  ;;  %3148 = vmatprep.subr.mxu1 %v3036_v2  ;;  %3233 = vmatprep.subr.mxu0 %v9035_v14 }
 0x6b1   : > { %3149 = vmatpush1.msra.mxu1 %v3035_v24  ;;  %3234 = vmatpush1.msra.mxu0 %v2942_v54 }
 0x6b2   : > { %v2940_v48 = vpop.permute.xlu1 %2939  ;;  %3235 = vmatprep.subr.mxu0 %v9035_v14 }
 0x6b3   : > { %v3034_v39 = vsel %vm1714_vm2, %v2940_v48, %v2942_v54 }
 0x6b4   : > { %v2934_v11 = vpop.permute.xlu0 %2933  ;;  %3150 = vmatprep.subr.mxu1 %v3034_v39 }
 0x6b6   : > { %v2938_v56 = vpop.permute.xlu1 %2937 }
 0x6b7   : > { %v3033_v21 = vsel %vm1714_vm2, %v2938_v56, %v2940_v48 }
 0x6b8   : > { %v2932_v47 = vpop.permute.xlu0 %2931  ;;  %3151 = vmatpush1.msra.mxu1 %v3033_v21 }
 0x6b9   : > { %v3031_v44 = vsel %vm1714_vm2, %v2932_v47, %v2934_v11 }
 0x6ba   : > { %v2936_v59 = vpop.permute.xlu1 %2935 }
 0x6bb   : > { %3236 = vmatpush1.msra.mxu0 %v2936_v59  ;;  %v3032_v46 = vsel %vm1714_vm2, %v2934_v11, %v2936_v59 }
 0x6bc   : > { %v2930_v36 = vpop.permute.xlu0 %2929  ;;  %3152 = vmatprep.subr.mxu1 %v3032_v46  ;;  %3237 = vmatprep.subr.mxu0 %v9035_v14 }
 0x6bd   : > { %3153 = vmatpush1.msra.mxu1 %v3031_v44  ;;  %3238 = vmatpush1.msra.mxu0 %v2930_v36 }
 0x6be   : > { %v2928_v30 = vpop.permute.xlu1 %2927  ;;  %3239 = vmatprep.subr.mxu0 %v9035_v14 }
 0x6bf   : > { %v3030_v57 = vsel %vm1714_vm2, %v2928_v30, %v2930_v36  ;;  %v9108_v36 = vld [vmem:[#allocation26_spill] sm:$0xff] }
 0x6c0   : > { %v2922_v45 = vpop.permute.xlu0 %2921  ;;  %3154 = vmatprep.subr.mxu1 %v3030_v57 }
 0x6c2   : > { %v2926_v40 = vpop.permute.xlu1 %2925 }
 0x6c3   : > { %v3029_v52 = vsel %vm1714_vm2, %v2926_v40, %v2928_v30  ;;  %v9109_v40 = vld [vmem:[#allocation18_spill] sm:$0xff] }
 0x6c4   : > { %v2920_v8 = vpop.permute.xlu0 %2919  ;;  %3155 = vmatpush1.msra.mxu1 %v3029_v52 }
 0x6c5   : > { %v3027_v38 = vsel %vm1714_vm2, %v2920_v8, %v2922_v45  ;;  %v9110_v8 = vld [vmem:[#allocation22_spill] sm:$0xff] }
 0x6c6   : > { %v2924_v26 = vpop.permute.xlu1 %2923 }
 0x6c7   : > { %3240 = vmatpush1.msra.mxu0 %v2924_v26  ;;  %v3028_v41 = vsel %vm1714_vm2, %v2922_v45, %v2924_v26 }
 0x6c8   : > { %v3026_v20 = vpop.permute.xlu0 %3025  ;;  %3156 = vmatprep.subr.mxu1 %v3028_v41  ;;  %3269 = vmatprep.subr.mxu0 %v9035_v14 }
 0x6c9   : > { %3157 = vmatpush1.msra.mxu1 %v3027_v38  ;;  %3270 = vmatpush2.msra.mxu0 %v3026_v20  ;;  %v9111_v38 = vld [vmem:[#allocation16_spill] sm:$0xff] }
 0x6ca   : > { %v3024_v12 = vpop.permute.xlu1 %3023  ;;  %3271 = vmatprep.subr.mxu0 %v9035_v14 }
 0x6cb   : > { %v3062_v15 = vsel %vm1714_vm2, %v3024_v12, %v3026_v20 }
 0x6cc   : > { %v3018_v18 = vpop.permute.xlu0 %3017  ;;  %3186 = vmatprep.subr.mxu1 %v3062_v15 }
 0x6ce   : > { %v3022_v3 = vpop.permute.xlu1 %3021 }
 0x6cf   : > { %v3061_v34 = vsel %vm1714_vm2, %v3022_v3, %v3024_v12  ;;  %v9112_v12 = vld [vmem:[#allocation20_spill] sm:$0xff] }
 0x6d0   : > { %3187 = vmatpush2.msra.mxu1 %v3061_v34  ;;  %v3016_v0 = vpop.permute.xlu0 %3015 }
 0x6d1   : > { %v3059_v16 = vsel %vm1714_vm2, %v3016_v0, %v3018_v18 }
 0x6d2   : > { %v3020_v28 = vpop.permute.xlu1 %3019 }
 0x6d3   : > { %3272 = vmatpush2.msra.mxu0 %v3020_v28  ;;  %v3060_v14 = vsel %vm1714_vm2, %v3018_v18, %v3020_v28 }
 0x6d4   : > { %3188 = vmatprep.subr.mxu1 %v3060_v14  ;;  %3274 = vmatmul.mubr.f32.vlgmr.msra.gmra.mxu0 %v2889_v43 }
 0x6d5   : > { %3189 = vmatpush2.msra.mxu1 %v3059_v16  ;;  %4186 = vmatprep.mubr.msk.f32.mxu0 %vm2487_vm1, %v2892_v33 }
 0x6d6   : > { %3191 = vmatmul.mubr.f32.vlgmr.msra.gmra.mxu1 %v2889_v43 }
 0x6d7   : > { %4183 = vmatprep.mubr.msk.f32.mxu1 %vm2487_vm1, %v2892_v33 }
 0x6d8   : > { %3279 = vmatmul.mubr.f32.gmra.mxu0 %v2891_v55 }
 0x6d9   : > { %4187 = vmatprep.mubr.msk.f32.mxu0 %vm2487_vm1, %v2894_v22 }
 0x6da   : > { %3197 = vmatmul.mubr.f32.gmra.mxu1 %v2891_v55 }
 0x6db   : > { %4184 = vmatprep.mubr.msk.f32.mxu1 %vm2487_vm1, %v2894_v22  ;;  %vm9123_vm1 = vcmask 777216  }
 0x6dc   : > { %3284 = vmatmul.mubr.f32.gmra.mxu0 %v2893_v42  ;;  %vm9124_vm3 = vmmov %vm9123_vm1 }
 0x6dd   : > { %v7634_v33 = vpop.permute.xlu0 %2910  ;;  %vm9125_vm4 = vmmov %vm9123_vm1 }
 0x6de   : > { %3203 = vmatmul.mubr.f32.gmra.mxu1 %v2893_v42 }
 0x6df   : > { %v2563_v32 = vpop.f32.mrf.mxu0  ;;  %v7598_v48 = vpop.permute.xlu1 %2900 }
 0x6e0   : > { %v2564_v37 = vadd.f32 %v2563_v32, %v9105_v19 }
 0x6e1   : > { %v2565_v63 = vpop.f32.mrf.mxu0  ;;  %v3295_v42 = vpop.permute.xlu0 %3294 }
 0x6e2   : > { %v2566_v60 = vadd.f32 %v2565_v63, %v9105_v19 }
 0x6e3   : > { %v2569_v27 = vpop.f32.mrf.mxu0  ;;  %v7600_v39 = vpop.permute.xlu1 %2905 }
 0x6e4   : > { %v2570_v61 = vadd.f32 %v2569_v27, %v9106_v35 }
 0x6e5   : > { %v2571_v31 = vpop.f32.mrf.mxu0  ;;  %v3293_v19 = vpop.permute.xlu0 %3292 }
 0x6e6   : > { %v2572_v6 = vadd.f32 %v2571_v31, %v9106_v35 }
 0x6e7   : > { %v2575_v29 = vpop.f32.mrf.mxu0  ;;  %v7602_v56 = vpop.permute.xlu1 %3296 }
 0x6e8   : > { %v2576_v23 = vadd.f32 %v2575_v29, %v9107_v13 }
 0x6e9   : > { %v2577_v10 = vpop.f32.mrf.mxu0 }
 0x6ea   : > { %v2578_v4 = vadd.f32 %v2577_v10, %v9107_v13 }
 0x738   : > { %v2646_v49 = vpop.f32.mrf.mxu1 }
 0x739   : > { %v2647_v17 = vadd.f32 %v2646_v49, %v2564_v37 }
 0x73a   : > { %v2648_v53 = vpop.f32.mrf.mxu1 }
 0x73b   : > { %4086 = vst [vmem:[%s7585_s19 + $0x50] sm:$0xff] %v2647_v17  ;;  %v2649_v1 = vadd.f32 %v2648_v53, %v2566_v60  ;;  %v7655_v17 = vsel %vm569_vm12, %v3293_v19, %v3295_v42 }
 0x73c   : > { %v2652_v5 = vpop.f32.mrf.mxu1 }
 0x73d   : > { %4087 = vst [vmem:[%s7585_s19 + $0x58] sm:$0xff] %v2649_v1  ;;  %v2653_v51 = vadd.f32 %v2652_v5, %v2570_v61  ;;  %v7666_v1 = vsel %vm569_vm12, %v3295_v42, %v7602_v56 }
 0x73e   : > { %v2654_v62 = vpop.f32.mrf.mxu1 }
 0x73f   : > { %4088 = vst [vmem:[%s7585_s19 + $0x60] sm:$0xff] %v2653_v51  ;;  %v2655_v9 = vadd.f32 %v2654_v62, %v2572_v6  ;;  %v9113_v6 = vld [vmem:[#allocation27_spill] sm:$0xff]  ;;  %v9115_v62 = vld [vmem:[#allocation21_spill] sm:$0xff] }
 0x740   : > { %v2658_v50 = vpop.f32.mrf.mxu1 }
 0x741   : > { %4089 = vst [vmem:[%s7585_s19 + $0x68] sm:$0xff] %v2655_v9  ;;  %v2659_v2 = vadd.f32 %v2658_v50, %v2576_v23  ;;  %v9116_v23 = vld [vmem:[#allocation15_spill] sm:$0xff] }
 0x742   : > { %v2660_v24 = vpop.f32.mrf.mxu1  ;;  %v9117_v50 = vld [vmem:[#allocation19_spill] sm:$0xff] }
 0x743   : > { %4090 = vst [vmem:[%s7585_s19 + $0x70] sm:$0xff] %v2659_v2  ;;  %v2661_v54 = vadd.f32 %v2660_v24, %v2578_v4 }
 0x745   : > { %4091 = vst [vmem:[%s7585_s19 + $0x78] sm:$0xff] %v2661_v54 }
 0x794   : > { %v3275_v11 = vpop.f32.mrf.mxu0 }
 0x795   : > { %v3276_v21 = vadd.f32 %v3275_v11, %v7598_v48 }
 0x796   : > { %v3277_v47 = vpop.f32.mrf.mxu0  ;;  %v3192_v31 = vpop.f32.mrf.mxu1 }
 0x797   : > { %v3305_v59 = vmul.f32 %v7602_v56, %v3276_v21  ;;  %v3193_v37 = vadd.f32 %v3192_v31, %v7598_v48  ;;  %v9119_v21 = vld [vmem:[#allocation48_spill] sm:$0xff] }
 0x798   : > { %v3280_v46 = vpop.f32.mrf.mxu0  ;;  %v3194_v29 = vpop.f32.mrf.mxu1 }
 0x799   : > { %3381 = vrot.lane.b32.xlu0 %v3305_v59, %s4301_s11  ;;  %3471 = vrot.lane.b32.xlu1 %v3305_v59, %s8570_s21  ;;  %v3325_v30 = vmul.f32 %v3305_v59, %v9108_v36  ;;  %v3343_v52 = vmul.f32 %v3305_v59, %v9109_v40  ;;  %v3361_v26 = vmul.f32 %v3305_v59, %v9110_v8 }
 0x79a   : > { %v3282_v44 = vpop.f32.mrf.mxu0  ;;  %v3281_v41 = vadd.f32 %v3280_v46, %v7600_v39  ;;  %v3334_v20 = vmul.f32 %v3305_v59, %v9111_v38  ;;  %v3352_v15 = vmul.f32 %v3305_v59, %v9112_v12  ;;  %v3315_v3 = vmul.f32 %v3305_v59, %v9056_v7  ;;  %v3198_v24 = vpop.f32.mrf.mxu1 }
 0x79b   : > { %v3303_v53 = vmul.f32 %v7655_v17, %v3193_v37  ;;  %v3195_v35 = vadd.f32 %v3194_v29, %v7598_v48  ;;  %v3199_v54 = vadd.f32 %v3198_v24, %v7600_v39  ;;  %v9118_v48 = vld [vmem:[#allocation149_spill] sm:$0xff] }
 0x79c   : > { %v3285_v57 = vpop.f32.mrf.mxu0  ;;  %v3308_v18 = vmul.f32 %v7602_v56, %v3281_v41  ;;  %v3200_v44 = vpop.f32.mrf.mxu1 }
 0x79d   : > { %3561 = vrot.lane.b32.xlu0 %v3305_v59, %s4303_s15  ;;  %3414 = vrot.lane.b32.xlu1 %v3325_v30, %s4314_s20  ;;  %v3286_v14 = vadd.f32 %v3285_v57, %v7634_v33  ;;  %v3304_v5 = vmul.f32 %v7666_v1, %v3195_v35  ;;  %v3323_v51 = vmul.f32 %v3303_v53, %v9113_v6  ;;  %v9120_v59 = vld [vmem:[#allocation50_spill] sm:$0xff]  ;;  %v9121_v30 = vld [vmem:[#allocation47_spill] sm:$0xff] }
 0x79e   : > { %v3287_v45 = vpop.f32.mrf.mxu0  ;;  %v3328_v34 = vmul.f32 %v3308_v18, %v9108_v36  ;;  %v3364_v0 = vmul.f32 %v3308_v18, %v9110_v8  ;;  %v3355_v43 = vmul.f32 %v3308_v18, %v9112_v12  ;;  %v3337_v28 = vmul.f32 %v3308_v18, %v9111_v38 }
 0x79f   : > { %v3318_v16 = vmul.f32 %v3308_v18, %v9056_v7  ;;  %v3346_v55 = vmul.f32 %v3308_v18, %v9109_v40  ;;  %v3311_v22 = vmul.f32 %v7602_v56, %v3286_v14  ;;  %v3359_v13 = vmul.f32 %v3303_v53, %v9115_v62 }
 0x7a0   : > { %v3332_v9 = vmul.f32 %v3303_v53, %v9116_v23  ;;  %v3350_v4 = vmul.f32 %v3303_v53, %v9117_v50  ;;  %v3313_v2 = vmul.f32 %v3303_v53, %v9059_v58  ;;  %v3324_v11 = vmul.f32 %v3304_v5, %v9118_v48 }
 0x7a1   : > { %3504 = vrot.lane.b32.xlu0 %v3343_v52, %s4316_s12  ;;  %3594 = vrot.lane.b32.xlu1 %v3361_v26, %s4318_s28  ;;  %v3331_v32 = vmul.f32 %v3311_v22, %v9108_v36  ;;  %v3340_v63 = vmul.f32 %v3311_v22, %v9111_v38  ;;  %v3367_v27 = vmul.f32 %v3311_v22, %v9110_v8 }
 0x7a2   : > { %v3349_v49 = vmul.f32 %v3311_v22, %v9109_v40  ;;  %v3358_v60 = vmul.f32 %v3311_v22, %v9112_v12  ;;  %v3321_v61 = vmul.f32 %v3311_v22, %v9056_v7  ;;  %v9114_v7 = vld [vmem:[#allocation17_spill] sm:$0xff]  ;;  %v3306_v56 = vmul.f32 %v7655_v17, %v3199_v54  ;;  %v3204_v12 = vpop.f32.mrf.mxu1 }
 0x7a3   : > { %v3341_v10 = vmul.f32 %v3303_v53, %v9114_v7  ;;  %v3342_v47 = vmul.f32 %v3304_v5, %v9119_v21  ;;  %v3360_v46 = vmul.f32 %v3304_v5, %v9120_v59  ;;  %v3201_v36 = vadd.f32 %v3200_v44, %v7600_v39  ;;  %v9122_v40 = vld [vmem:[#allocation49_spill] sm:$0xff] }
 0x7a4   : > { %v3333_v57 = vmul.f32 %v3304_v5, %v9121_v30  ;;  %v3351_v52 = vmul.f32 %v3304_v5, %v9122_v40  ;;  %v3326_v8 = vmul.f32 %v3306_v56, %v9113_v6  ;;  %v3314_v26 = vmul.f32 %v3304_v5, %v7341_v25 }
 0x7a5   : > { %3447 = vrot.lane.b32.xlu0 %v3334_v20, %s4315_s25  ;;  %3537 = vrot.lane.b32.xlu1 %v3352_v15, %s4317_s27  ;;  %v3307_v45 = vmul.f32 %v7666_v1, %v3201_v36  ;;  %v3362_v39 = vmul.f32 %v3306_v56, %v9115_v62  ;;  %v3335_v41 = vmul.f32 %v3306_v56, %v9116_v23 }
 0x7a6   : > { %v3353_v38 = vmul.f32 %v3306_v56, %v9117_v50  ;;  %v3316_v20 = vmul.f32 %v3306_v56, %v9059_v58  ;;  %v3205_v15 = vadd.f32 %v3204_v12, %v7634_v33 }
 0x7a9   : > { %3477 = vrot.lane.b32.xlu0 %v3308_v18, %s8570_s21  ;;  %3651 = vrot.lane.b32.xlu1 %v3315_v3, %s4332_s16  ;;  %v3344_v3 = vmul.f32 %v3306_v56, %v9114_v7 }
 0x7ad   : > { %3420 = vrot.lane.b32.xlu0 %v3328_v34, %s4314_s20  ;;  %3387 = vrot.lane.b32.xlu1 %v3308_v18, %s4301_s11  ;;  %v3309_v34 = vmul.f32 %v7655_v17, %v3205_v15  ;;  %v3317_v17 = vmul.f32 %v3307_v45, %v7341_v25 }
 0x7af   : > { %v3329_v29 = vmul.f32 %v3309_v34, %v9113_v6  ;;  %v3356_v6 = vmul.f32 %v3309_v34, %v9117_v50  ;;  %v3347_v50 = vmul.f32 %v3309_v34, %v9114_v7 }
 0x7b1   : > { %3600 = vrot.lane.b32.xlu0 %v3364_v0, %s4318_s28  ;;  %3567 = vrot.lane.b32.xlu1 %v3308_v18, %s4303_s15  ;;  %v3327_v18 = vmul.f32 %v3307_v45, %v9118_v48 }
 0x7b5   : > { %3543 = vrot.lane.b32.xlu0 %v3355_v43, %s4317_s27  ;;  %3453 = vrot.lane.b32.xlu1 %v3337_v28, %s4315_s25 }
 0x7b9   : > { %3657 = vrot.lane.b32.xlu0 %v3318_v16, %s4332_s16  ;;  %3510 = vrot.lane.b32.xlu1 %v3346_v55, %s4316_s12  ;;  %v3363_v16 = vmul.f32 %v3307_v45, %v9120_v59  ;;  %v3336_v55 = vmul.f32 %v3307_v45, %v9121_v30 }
 0x7bd   : > { %3393 = vrot.lane.b32.xlu0 %v3311_v22, %s4301_s11  ;;  %3483 = vrot.lane.b32.xlu1 %v3311_v22, %s8570_s21 }
 0x7c1   : > { %3573 = vrot.lane.b32.xlu0 %v3311_v22, %s4303_s15  ;;  %3426 = vrot.lane.b32.xlu1 %v3331_v32, %s4314_s20  ;;  %v3206_v22 = vpop.f32.mrf.mxu1 }
 0x7c2   : > { %v3207_v42 = vadd.f32 %v3206_v22, %v7634_v33 }
 0x7c4   : > { %v3310_v31 = vmul.f32 %v7666_v1, %v3207_v42  ;;  %v3365_v1 = vmul.f32 %v3309_v34, %v9115_v62  ;;  %v3319_v62 = vmul.f32 %v3309_v34, %v9059_v58 }
 0x7c5   : > { %3459 = vrot.lane.b32.xlu0 %v3340_v63, %s4315_s25  ;;  %3606 = vrot.lane.b32.xlu1 %v3367_v27, %s4318_s28  ;;  %v3345_v27 = vmul.f32 %v3307_v45, %v9119_v21 }
 0x7c6   : > { %v3339_v58 = vmul.f32 %v3310_v31, %v9121_v30  ;;  %v3366_v54 = vmul.f32 %v3310_v31, %v9120_v59  ;;  %v3320_v59 = vmul.f32 %v3310_v31, %v7341_v25 }
 0x7c9   : > { %3516 = vrot.lane.b32.xlu0 %v3349_v49, %s4316_s12  ;;  %3549 = vrot.lane.b32.xlu1 %v3358_v60, %s4317_s27  ;;  %v3354_v49 = vmul.f32 %v3307_v45, %v9122_v40 }
 0x7cd   : > { %3467 = vrot.lane.b32.xlu0 %v3303_v53, %s8570_s21  ;;  %3663 = vrot.lane.b32.xlu1 %v3321_v61, %s4332_s16  ;;  %v3338_v61 = vmul.f32 %v3309_v34, %v9116_v23 }
 0x7d1   : > { %3377 = vrot.lane.b32.xlu1 %v3303_v53, %s4301_s11  ;;  %3469 = vrot.lane.b32.xlu0 %v3304_v5, %s8570_s21 }
 0x7d5   : > { %3557 = vrot.lane.b32.xlu1 %v3303_v53, %s4303_s15  ;;  %3410 = vrot.lane.b32.xlu0 %v3323_v51, %s4314_s20 }
 0x7d9   : > { %3500 = vrot.lane.b32.xlu1 %v3341_v10, %s4316_s12  ;;  %3590 = vrot.lane.b32.xlu0 %v3359_v13, %s4318_s28 }
 0x7dd   : > { %3443 = vrot.lane.b32.xlu1 %v3332_v9, %s4315_s25  ;;  %3533 = vrot.lane.b32.xlu0 %v3350_v4, %s4317_s27  ;;  %v3330_v4 = vmul.f32 %v3310_v31, %v9118_v48  ;;  %v3348_v48 = vmul.f32 %v3310_v31, %v9119_v21 }
 0x7e1   : > { %3379 = vrot.lane.b32.xlu1 %v3304_v5, %s4301_s11  ;;  %3647 = vrot.lane.b32.xlu0 %v3313_v2, %s4332_s16 }
 0x7e5   : > { %3559 = vrot.lane.b32.xlu1 %v3304_v5, %s4303_s15  ;;  %3412 = vrot.lane.b32.xlu0 %v3324_v11, %s4314_s20 }
 0x7e9   : > { %3502 = vrot.lane.b32.xlu1 %v3342_v47, %s4316_s12  ;;  %3383 = vrot.lane.b32.xlu0 %v3306_v56, %s4301_s11 }
 0x7ed   : > { %3473 = vrot.lane.b32.xlu1 %v3306_v56, %s8570_s21  ;;  %3592 = vrot.lane.b32.xlu0 %v3360_v46, %s4318_s28 }
 0x7f1   : > { %3445 = vrot.lane.b32.xlu1 %v3333_v57, %s4315_s25  ;;  %3563 = vrot.lane.b32.xlu0 %v3306_v56, %s4303_s15  ;;  %v3357_v56 = vmul.f32 %v3310_v31, %v9122_v40 }
 0x7f5   : > { %3475 = vrot.lane.b32.xlu1 %v3307_v45, %s8570_s21  ;;  %3535 = vrot.lane.b32.xlu0 %v3351_v52, %s4317_s27 }
 0x7f9   : > { %3416 = vrot.lane.b32.xlu1 %v3326_v8, %s4314_s20  ;;  %3649 = vrot.lane.b32.xlu0 %v3314_v26, %s4332_s16 }
 0x7fd   : > { %3596 = vrot.lane.b32.xlu1 %v3362_v39, %s4318_s28  ;;  %3449 = vrot.lane.b32.xlu0 %v3335_v41, %s4315_s25 }
 0x801   : > { %3539 = vrot.lane.b32.xlu1 %v3353_v38, %s4317_s27  ;;  %3385 = vrot.lane.b32.xlu0 %v3307_v45, %s4301_s11 }
 0x805   : > { %3653 = vrot.lane.b32.xlu1 %v3316_v20, %s4332_s16  ;;  %3565 = vrot.lane.b32.xlu0 %v3307_v45, %s4303_s15 }
 0x809   : > { %3418 = vrot.lane.b32.xlu1 %v3327_v18, %s4314_s20  ;;  %3506 = vrot.lane.b32.xlu0 %v3344_v3, %s4316_s12 }
 0x80b   : > { %v7724_v0 = vpop.permute.xlu0 %3381  ;;  %v7726_v43 = vpop.permute.xlu1 %3471 }
 0x80d   : > { %3389 = vrot.lane.b32.xlu1 %v3309_v34, %s4301_s11  ;;  %3479 = vrot.lane.b32.xlu0 %v3309_v34, %s8570_s21 }
 0x80f   : > { %v7730_v28 = vpop.permute.xlu0 %3561  ;;  %v7732_v14 = vpop.permute.xlu1 %3414 }
 0x811   : > { %3598 = vrot.lane.b32.xlu1 %v3363_v16, %s4318_s28  ;;  %3451 = vrot.lane.b32.xlu0 %v3336_v55, %s4315_s25 }
 0x813   : > { %v7739_v32 = vpop.permute.xlu0 %3504  ;;  %v7741_v63 = vpop.permute.xlu1 %3594 }
 0x815   : > { %3569 = vrot.lane.b32.xlu1 %v3309_v34, %s4303_s15  ;;  %3508 = vrot.lane.b32.xlu0 %v3345_v27, %s4316_s12 }
 0x817   : > { %v7747_v19 = vpop.permute.xlu0 %3447  ;;  %v7749_v37 = vpop.permute.xlu1 %3537 }
 0x819   : > { %3541 = vrot.lane.b32.xlu1 %v3354_v49, %s4317_s27  ;;  %3481 = vrot.lane.b32.xlu0 %v3310_v31, %s8570_s21  ;;  %s4333_s21 = smov 64  }
 0x81b   : > { %v7754_v33 = vpop.permute.xlu0 %3477  ;;  %v7756_v60 = vpop.permute.xlu1 %3651 }
 0x81d   : > { %3655 = vrot.lane.b32.xlu1 %v3317_v17, %s4332_s16  ;;  %3422 = vrot.lane.b32.xlu0 %v3329_v29, %s4314_s20 }
 0x81f   : > { %v7762_v53 = vpop.permute.xlu0 %3420  ;;  %v7764_v35 = vpop.permute.xlu1 %3387 }
 0x821   : > { %3455 = vrot.lane.b32.xlu1 %v3338_v61, %s4315_s25  ;;  %3602 = vrot.lane.b32.xlu0 %v3365_v1, %s4318_s28 }
 0x823   : > { %v7770_v5 = vpop.permute.xlu0 %3600  ;;  %v7772_v51 = vpop.permute.xlu1 %3567 }
 0x825   : > { %3391 = vrot.lane.b32.xlu1 %v3310_v31, %s4301_s11  ;;  %3545 = vrot.lane.b32.xlu0 %v3356_v6, %s4317_s27 }
 0x827   : > { %v7777_v10 = vpop.permute.xlu0 %3543  ;;  %v7779_v13 = vpop.permute.xlu1 %3453 }
 0x829   : > { %3571 = vrot.lane.b32.xlu1 %v3310_v31, %s4303_s15  ;;  %3659 = vrot.lane.b32.xlu0 %v3319_v62, %s4332_s16 }
 0x82b   : > { %v7784_v23 = vpop.permute.xlu0 %3657  ;;  %v7786_v9 = vpop.permute.xlu1 %3510 }
 0x82d   : > { %3512 = vrot.lane.b32.xlu1 %v3347_v50, %s4316_s12  ;;  %3424 = vrot.lane.b32.xlu0 %v3330_v4, %s4314_s20 }
 0x82f   : > { %v7792_v2 = vpop.permute.xlu0 %3393  ;;  %v7794_v24 = vpop.permute.xlu1 %3483 }
 0x831   : > { %3457 = vrot.lane.b32.xlu1 %v3339_v58, %s4315_s25  ;;  %3604 = vrot.lane.b32.xlu0 %v3366_v54, %s4318_s28 }
 0x833   : > { %v7800_v11 = vpop.permute.xlu0 %3573  ;;  %v7802_v7 = vpop.permute.xlu1 %3426 }
 0x835   : > { %3514 = vrot.lane.b32.xlu1 %v3348_v48, %s4316_s12  ;;  %3547 = vrot.lane.b32.xlu0 %v3357_v56, %s4317_s27 }
 0x837   : > { %v7808_v47 = vpop.permute.xlu0 %3459  ;;  %v7810_v46 = vpop.permute.xlu1 %3606 }
 0x839   : > { %3723 = vrot.lane.b32.xlu1 %v7726_v43, %s4332_s16  ;;  %3661 = vrot.lane.b32.xlu0 %v3320_v59, %s4332_s16 }
 0x83b   : > { %v7816_v44 = vpop.permute.xlu0 %3516  ;;  %v7818_v21 = vpop.permute.xlu1 %3549 }
 0x83d   : > { %3687 = vrot.lane.b32.xlu1 %v7732_v14, %s4332_s16  ;;  %3669 = vrot.lane.b32.xlu0 %v7724_v0, %s4332_s16 }
 0x83f   : > { %v3468_v36 = vpop.permute.xlu0 %3467  ;;  %v7824_v30 = vpop.permute.xlu1 %3663 }
 0x841   : > { %3675 = vrot.lane.b32.xlu1 %v7764_v35, %s4332_s16  ;;  %3741 = vrot.lane.b32.xlu0 %v7739_v32, %s4332_s16 }
 0x843   : > { %v3378_v25 = vpop.permute.xlu1 %3377  ;;  %v3470_v57 = vpop.permute.xlu0 %3469 }
 0x844   : > { %v3485_v49 = vsel %vm537_vm10, %v3468_v36, %v3470_v57 }
 0x845   : > { %3711 = vrot.lane.b32.xlu1 %v7779_v13, %s4332_s16  ;;  %3705 = vrot.lane.b32.xlu0 %v7747_v19, %s4332_s16 }
 0x847   : > { %v7834_v45 = vpop.permute.xlu1 %3557  ;;  %v3411_v40 = vpop.permute.xlu0 %3410 }
 0x849   : > { %3801 = vrot.lane.b32.xlu1 %v7770_v5, %s4332_s16  ;;  %3795 = vrot.lane.b32.xlu0 %v7741_v63, %s4332_s16 }
 0x84b   : > { %v3501_v52 = vpop.permute.xlu1 %3500  ;;  %v3591_v8 = vpop.permute.xlu0 %3590 }
 0x84d   : > { %3735 = vrot.lane.b32.xlu1 %v7794_v24, %s4332_s16  ;;  %3729 = vrot.lane.b32.xlu0 %v7754_v33, %s4332_s16 }
 0x84f   : > { %v3444_v26 = vpop.permute.xlu1 %3443  ;;  %v7844_v39 = vpop.permute.xlu0 %3533 }
 0x851   : > { %3789 = vrot.lane.b32.xlu1 %v7800_v11, %s4332_s16  ;;  %3693 = vrot.lane.b32.xlu0 %v7762_v53, %s4332_s16 }
 0x853   : > { %v3380_v41 = vpop.permute.xlu1 %3379  ;;  %v7850_v38 = vpop.permute.xlu0 %3647 }
 0x854   : > { %v3396_v15 = vsel %vm491_vm7, %v3380_v41, %v7724_v0  ;;  %v3395_v34 = vsel %vm491_vm7, %v3378_v25, %v3380_v41  ;;  %v3486_v0 = vsel %vm537_vm10, %v3470_v57, %v7726_v43 }
 0x855   : > { %3699 = vrot.lane.b32.xlu1 %v7802_v7, %s4332_s16  ;;  %3681 = vrot.lane.b32.xlu0 %v7792_v2, %s4332_s16 }
 0x857   : > { %v7856_v20 = vpop.permute.xlu1 %3559  ;;  %v3413_v12 = vpop.permute.xlu0 %3412 }
 0x858   : > { %v3429_v29 = vsel %vm507_vm8, %v3413_v12, %v7732_v14  ;;  %v3428_v62 = vsel %vm507_vm8, %v3411_v40, %v3413_v12 }
 0x859   : > { %3667 = vrot.lane.b32.xlu1 %v3396_v15, %s4332_s16  ;;  %3717 = vrot.lane.b32.xlu0 %v7808_v47, %s4332_s16 }
 0x85b   : > { %v3503_v18 = vpop.permute.xlu1 %3502  ;;  %v3384_v3 = vpop.permute.xlu0 %3383 }
 0x85c   : > { %v3519_v22 = vsel %vm553_vm11, %v3503_v18, %v7739_v32  ;;  %v3518_v31 = vsel %vm553_vm11, %v3501_v52, %v3503_v18 }
 0x85d   : > { %3665 = vrot.lane.b32.xlu1 %v3395_v34, %s4332_s16  ;;  %3807 = vrot.lane.b32.xlu0 %v7810_v46, %s4332_s16 }
 0x85f   : > { %v3474_v16 = vpop.permute.xlu1 %3473  ;;  %v3593_v55 = vpop.permute.xlu0 %3592 }
 0x860   : > { %v3609_v14 = vsel %vm599_vm14, %v3593_v55, %v7741_v63  ;;  %v3608_v54 = vsel %vm599_vm14, %v3591_v8, %v3593_v55 }
 0x861   : > { %3739 = vrot.lane.b32.xlu1 %v3519_v22, %s4332_s16  ;;  %3721 = vrot.lane.b32.xlu0 %v3486_v0, %s4332_s16 }
 0x863   : > { %v3446_v42 = vpop.permute.xlu1 %3445  ;;  %v7873_v27 = vpop.permute.xlu0 %3563 }
 0x864   : > { %v3462_v43 = vsel %vm523_vm9, %v3446_v42, %v7747_v19  ;;  %v3461_v6 = vsel %vm523_vm9, %v3444_v26, %v3446_v42 }
 0x865   : > { %3737 = vrot.lane.b32.xlu1 %v3518_v31, %s4332_s16  ;;  %3719 = vrot.lane.b32.xlu0 %v3485_v49, %s4332_s16 }
 0x867   : > { %v3476_v17 = vpop.permute.xlu1 %3475  ;;  %v7879_v32 = vpop.permute.xlu0 %3535 }
 0x868   : > { %v3488_v63 = vsel %vm537_vm10, %v3476_v17, %v7754_v33 }
 0x869   : > { %3703 = vrot.lane.b32.xlu1 %v3462_v43, %s4332_s16  ;;  %3685 = vrot.lane.b32.xlu0 %v3429_v29, %s4332_s16 }
 0x86b   : > { %v3417_v61 = vpop.permute.xlu1 %3416  ;;  %v7887_v1 = vpop.permute.xlu0 %3649 }
 0x86d   : > { %3701 = vrot.lane.b32.xlu1 %v3461_v6, %s4332_s16  ;;  %3683 = vrot.lane.b32.xlu0 %v3428_v62, %s4332_s16 }
 0x86f   : > { %v3597_v50 = vpop.permute.xlu1 %3596  ;;  %v3450_v19 = vpop.permute.xlu0 %3449 }
 0x871   : > { %3793 = vrot.lane.b32.xlu1 %v3609_v14, %s4332_s16 }
 0x873   : > { %v7896_v4 = vpop.permute.xlu1 %3539  ;;  %v3386_v58 = vpop.permute.xlu0 %3385 }
 0x874   : > { %v3398_v48 = vsel %vm491_vm7, %v3386_v58, %v7764_v35  ;;  %v3397_v36 = vsel %vm491_vm7, %v3384_v3, %v3386_v58  ;;  %v3487_v35 = vsel %vm537_vm10, %v3474_v16, %v3476_v17 }
 0x875   : > { %3791 = vrot.lane.b32.xlu1 %v3608_v54, %s4332_s16  ;;  %3673 = vrot.lane.b32.xlu0 %v3398_v48, %s4332_s16 }
 0x877   : > { %v7903_v56 = vpop.permute.xlu1 %3653  ;;  %v7905_v59 = vpop.permute.xlu0 %3565 }
 0x878   : > { %v3578_v8 = vsel %vm9123_vm1, %v7905_v59, %v7772_v51 }
 0x879   : > { %3727 = vrot.lane.b32.xlu1 %v3488_v63, %s4332_s16  ;;  %3671 = vrot.lane.b32.xlu0 %v3397_v36, %s4332_s16 }
 0x87b   : > { %v3419_v25 = vpop.permute.xlu1 %3418  ;;  %v7912_v57 = vpop.permute.xlu0 %3506 }
 0x87c   : > { %v3431_v41 = vsel %vm507_vm8, %v3419_v25, %v7762_v53  ;;  %v3430_v3 = vsel %vm507_vm8, %v3417_v61, %v3419_v25 }
 0x87d   : > { %3725 = vrot.lane.b32.xlu1 %v3487_v35, %s4332_s16 }
 0x87f   : > { %v3390_v40 = vpop.permute.xlu1 %3389  ;;  %v3480_v52 = vpop.permute.xlu0 %3479 }
 0x881   : > { %3781 = vrot.lane.b32.xlu1 %v3578_v8, %s4332_s16 }
 0x883   : > { %v3599_v33 = vpop.permute.xlu1 %3598  ;;  %v3452_v26 = vpop.permute.xlu0 %3451 }
 0x884   : > { %v3464_v12 = vsel %vm523_vm9, %v3452_v26, %v7779_v13  ;;  %v3463_v34 = vsel %vm523_vm9, %v3450_v19, %v3452_v26  ;;  %v3611_v13 = vsel %vm599_vm14, %v3599_v33, %v7770_v5  ;;  %v3610_v0 = vsel %vm599_vm14, %v3597_v50, %v3599_v33 }
 0x885   : > { %3691 = vrot.lane.b32.xlu1 %v3431_v41, %s4332_s16  ;;  %3709 = vrot.lane.b32.xlu0 %v3464_v12, %s4332_s16 }
 0x887   : > { %v3570_v15 = vpop.permute.xlu1 %3569  ;;  %v7926_v18 = vpop.permute.xlu0 %3508 }
 0x889   : > { %3689 = vrot.lane.b32.xlu1 %v3430_v3, %s4332_s16  ;;  %3707 = vrot.lane.b32.xlu0 %v3463_v34, %s4332_s16 }
 0x88b   : > { %v7932_v16 = vpop.permute.xlu1 %3541  ;;  %v3482_v53 = vpop.permute.xlu0 %3481 }
 0x88c   : > { %v3490_v49 = vsel %vm537_vm10, %v3482_v53, %v7794_v24  ;;  %v3489_v29 = vsel %vm537_vm10, %v3480_v52, %v3482_v53  ;;  %vm3917_vm10 = vcmask 719872  }
 0x88d   : > { %3799 = vrot.lane.b32.xlu0 %v3611_v13, %s4332_s16  ;;  %v3553_v13 = vsel %vm569_vm12, %v7896_v4, %v7932_v16 }
 0x88f   : > { %v7937_v55 = vpop.permute.xlu1 %3655  ;;  %v3423_v22 = vpop.permute.xlu0 %3422 }
 0x891   : > { %3797 = vrot.lane.b32.xlu0 %v3610_v0, %s4332_s16 }
 0x893   : > { %v3456_v42 = vpop.permute.xlu1 %3455  ;;  %v7941_v31 = vpop.permute.xlu0 %3602 }
 0x895   : > { %3733 = vrot.lane.b32.xlu0 %v3490_v49, %s4332_s16  ;;  %v3615_v49 = vld [vmem:[%s8338_s8 + $0x8] sm:$0xff] }
 0x896   : > { %4188 = vmatprep.mubr.msk.f32.mxu1 %vm3917_vm10, %v3615_v49 }
 0x897   : > { %v3392_v17 = vpop.permute.xlu1 %3391  ;;  %v7946_v43 = vpop.permute.xlu0 %3545 }
 0x898   : > { %v3400_v5 = vsel %vm491_vm7, %v3392_v17, %v7792_v2  ;;  %v3399_v62 = vsel %vm491_vm7, %v3390_v40, %v3392_v17  ;;  %vm9126_vm7 = vmmov %vm9123_vm1 }
 0x899   : > { %3679 = vrot.lane.b32.xlu1 %v3400_v5, %s4332_s16  ;;  %3731 = vrot.lane.b32.xlu0 %v3489_v29, %s4332_s16  ;;  %v3577_v40 = vsel %vm9126_vm7, %v7873_v27, %v7905_v59  ;;  %v3620_v29 = vld [vmem:[%s8339_s9] sm:$0xff] }
 0x89b   : > { %v3572_v61 = vpop.permute.xlu1 %3571  ;;  %v3660_v6 = vpop.permute.xlu0 %3659 }
 0x89c   : > { %v3580_v24 = vsel %vm9124_vm3, %v3572_v61, %v7800_v11  ;;  %v3579_v2 = vsel %vm9125_vm4, %v3570_v15, %v3572_v61  ;;  %v3554_v15 = vsel %vm569_vm12, %v7932_v16, %v7777_v10 }
 0x89d   : > { %3677 = vrot.lane.b32.xlu1 %v3399_v62, %s4332_s16  ;;  %3787 = vrot.lane.b32.xlu0 %v3580_v24, %s4332_s16  ;;  %v3622_v62 = vld [vmem:[%s8339_s9 + $0x10] sm:$0xff] }
 0x89f   : > { %v3513_v50 = vpop.permute.xlu1 %3512  ;;  %v3425_v19 = vpop.permute.xlu0 %3424 }
 0x8a0   : > { %v3433_v54 = vsel %vm507_vm8, %v3425_v19, %v7802_v7  ;;  %v3432_v36 = vsel %vm507_vm8, %v3423_v22, %v3425_v19  ;;  %vm9127_vm8 = vmmov %vm9123_vm1 }
 0x8a1   : > { %3785 = vrot.lane.b32.xlu0 %v3579_v2, %s4332_s16  ;;  %v3576_v33 = vsel %vm9127_vm8, %v7856_v20, %v7730_v28  ;;  %v3520_v2 = vsel %vm553_vm11, %v7912_v57, %v7926_v18  ;;  %v9131_v57 = vld [vmem:[#allocation31_spill] sm:$0xff] }
 0x8a3   : > { %v3458_v14 = vpop.permute.xlu1 %3457  ;;  %v3605_v58 = vpop.permute.xlu0 %3604 }
 0x8a4   : > { %v3466_v48 = vsel %vm523_vm9, %v3458_v14, %v7808_v47  ;;  %v3465_v25 = vsel %vm523_vm9, %v3456_v42, %v3458_v14  ;;  %vm9128_vm9 = vmmov %vm9123_vm1  ;;  %v3613_v53 = vsel %vm599_vm14, %v3605_v58, %v7810_v46  ;;  %v9129_v14 = vld [vmem:[#allocation10_spill] sm:$0xff] }
 0x8a5   : > { %3715 = vrot.lane.b32.xlu1 %v3466_v48, %s4332_s16  ;;  %3697 = vrot.lane.b32.xlu0 %v3433_v54, %s4332_s16  ;;  %v3575_v59 = vsel %vm9128_vm9, %v7834_v45, %v7856_v20  ;;  %v3551_v20 = vsel %vm569_vm12, %v7844_v39, %v7879_v32 }
 0x8a7   : > { %v3515_v11 = vpop.permute.xlu1 %3514  ;;  %v3548_v63 = vpop.permute.xlu0 %3547 }
 0x8a8   : > { %v3523_v4 = vsel %vm553_vm11, %v3515_v11, %v7816_v44  ;;  %v3522_v42 = vsel %vm553_vm11, %v3513_v50, %v3515_v11  ;;  %v3555_v17 = vsel %vm569_vm12, %v7946_v43, %v3548_v63 }
 0x8a9   : > { %3713 = vrot.lane.b32.xlu1 %v3465_v25, %s4332_s16  ;;  %3695 = vrot.lane.b32.xlu0 %v3432_v36, %s4332_s16  ;;  %v9133_v36 = vld [vmem:[#allocation34_spill] sm:$0xff] }
 0x8ab   : > { %v7970_v35 = vpop.permute.xlu1 %3723  ;;  %v7972_v7 = vpop.permute.xlu0 %3661 }
 0x8ac   : > { %v7976_v47 = vsel %vm1714_vm2, %v3660_v6, %v7972_v7  ;;  %v3521_v6 = vsel %vm553_vm11, %v7926_v18, %v7786_v9  ;;  %v811_v18 = vadd.f32 %v9131_v57, %v9129_v14  ;;  %vm4037_vm11 = vcmask 523264  }
 0x8ad   : > { %3779 = vrot.lane.b32.xlu1 %v3577_v40, %s4332_s16  ;;  %3783 = vrot.lane.b32.xlu0 %v7772_v51, %s4332_s16 }
 0x8af   : > { %v7984_v52 = vpop.permute.xlu1 %3687  ;;  %v3670_v8 = vpop.permute.xlu0 %3669 }
 0x8b1   : > { %3777 = vrot.lane.b32.xlu1 %v7730_v28, %s4332_s16  ;;  %3775 = vrot.lane.b32.xlu0 %v3576_v33, %s4332_s16  ;;  %v3552_v28 = vsel %vm569_vm12, %v7879_v32, %v7749_v37  ;;  %v3612_v32 = vsel %vm599_vm14, %v7941_v31, %v3605_v58  ;;  %v9130_v58 = vld [vmem:[#allocation32_spill] sm:$0xff] }
 0x8b2   : > { %v813_v54 = vadd.f32 %v9130_v58, %v9129_v14  ;;  %v9145_v58 = vld [vmem:[#allocation13_spill] sm:$0xff] }
 0x8b3   : > { %v7992_v26 = vpop.permute.xlu1 %3675  ;;  %v3742_v27 = vpop.permute.xlu0 %3741 }
 0x8b5   : > { %3765 = vrot.lane.b32.xlu1 %v7777_v10, %s4332_s16  ;;  %3773 = vrot.lane.b32.xlu0 %v3575_v59, %s4332_s16 }
 0x8b7   : > { %v8000_v51 = vpop.permute.xlu1 %3711  ;;  %v8002_v41 = vpop.permute.xlu0 %3705 }
 0x8b9   : > { %3757 = vrot.lane.b32.xlu1 %v3552_v28, %s4332_s16  ;;  %3771 = vrot.lane.b32.xlu0 %v7818_v21, %s4332_s16 }
 0x8bb   : > { %v8010_v12 = vpop.permute.xlu1 %3801  ;;  %v8012_v45 = vpop.permute.xlu0 %3795 }
 0x8bd   : > { %3755 = vrot.lane.b32.xlu1 %v3551_v20, %s4332_s16  ;;  %3763 = vrot.lane.b32.xlu0 %v3554_v15, %s4332_s16 }
 0x8bf   : > { %v8022_v3 = vpop.permute.xlu1 %3735  ;;  %v8024_v34 = vpop.permute.xlu0 %3729 }
 0x8c1   : > { %3761 = vrot.lane.b32.xlu0 %v3553_v13, %s4332_s16  ;;  %3805 = vrot.lane.b32.xlu1 %v3613_v53, %s4332_s16  ;;  %v9136_v53 = vld [vmem:[#allocation35_spill] sm:$0xff] }
 0x8c3   : > { %v8033_v10 = vpop.permute.xlu1 %3789  ;;  %v8035_v39 = vpop.permute.xlu0 %3693 }
 0x8c5   : > { %3759 = vrot.lane.b32.xlu0 %v7749_v37, %s4332_s16  ;;  %3803 = vrot.lane.b32.xlu1 %v3612_v32, %s4332_s16  ;;  %v3556_v37 = vsel %vm569_vm12, %v3548_v63, %v7818_v21  ;;  %v9132_v63 = vld [vmem:[#allocation9_spill] sm:$0xff]  ;;  %v9137_v32 = vld [vmem:[#allocation11_spill] sm:$0xff] }
 0x8c6   : > { %v817_v25 = vadd.f32 %v9133_v36, %v9132_v63  ;;  %v819_v13 = vadd.f32 %v9136_v53, %v9132_v63 }
 0x8c7   : > { %v8042_v46 = vpop.permute.xlu1 %3699  ;;  %v8044_v22 = vpop.permute.xlu0 %3681 }
 0x8c9   : > { %3751 = vrot.lane.b32.xlu0 %v3523_v4, %s4332_s16  ;;  %3753 = vrot.lane.b32.xlu1 %v7816_v44, %s4332_s16  ;;  %v9138_v4 = vld [vmem:[#allocation38_spill] sm:$0xff] }
 0x8cb   : > { %v3668_v16 = vpop.permute.xlu1 %3667  ;;  %v8051_v0 = vpop.permute.xlu0 %3717 }
 0x8cc   : > { %v8057_v31 = vsel %vm1714_vm2, %v3668_v16, %v3670_v8  ;;  %v9134_v8 = vld [vmem:[#allocation30_spill] sm:$0xff] }
 0x8cd   : > { %3749 = vrot.lane.b32.xlu0 %v3522_v42, %s4332_s16  ;;  %3769 = vrot.lane.b32.xlu1 %v3556_v37, %s4332_s16  ;;  %v930_v33 = vadd.f32 %v9134_v8, %v9129_v14 }
 0x8cf   : > { %v3666_v44 = vpop.permute.xlu1 %3665  ;;  %v8070_v5 = vpop.permute.xlu0 %3807 }
 0x8d0   : > { %v8068_v21 = vsel %vm1714_vm2, %v3666_v44, %v3668_v16  ;;  %v825_v16 = vadd.f32 %v9138_v4, %v9137_v32 }
 0x8d1   : > { %3747 = vrot.lane.b32.xlu0 %v7786_v9, %s4332_s16  ;;  %3767 = vrot.lane.b32.xlu1 %v3555_v17, %s4332_s16  ;;  %v3621_v9 = vld [vmem:[%s8339_s9 + $0x8] sm:$0xff]  ;;  %v9140_v17 = vld [vmem:[#allocation12_spill] sm:$0xff] }
 0x8d3   : > { %v3740_v61 = vpop.permute.xlu1 %3739  ;;  %v8086_v24 = vpop.permute.xlu0 %3721 }
 0x8d4   : > { %v3840_v43 = vsel %vm1714_vm2, %v3740_v61, %v3742_v27  ;;  %v9135_v27 = vld [vmem:[#allocation33_spill] sm:$0xff] }
 0x8d5   : > { %3625 = vperm.xlu0 %4282, %v3620_v29   ;;  %3745 = vrot.lane.b32.xlu1 %v3521_v6, %s4332_s16  ;;  %v935_v59 = vadd.f32 %v9135_v27, %v9132_v63  ;;  %v9141_v29 = vld [vmem:[#allocation40_spill] sm:$0xff]  ;;  %v9147_v63 = vld [vmem:[#allocation43_spill] sm:$0xff] }
 0x8d6   : > { %3927 = vmatprep.subr.mxu1 %v3840_v43  ;;  %v9142_v43 = vld [vmem:[#allocation36_spill] sm:$0xff]  ;;  %v835_v36 = vadd.f32 %v9147_v63, %v9145_v58 }
 0x8d7   : > { %v3738_v50 = vpop.permute.xlu1 %3737  ;;  %v8100_v11 = vpop.permute.xlu0 %3719 }
 0x8d8   : > { %v3839_v19 = vsel %vm1714_vm2, %v3738_v50, %v3740_v61  ;;  %v829_v61 = vadd.f32 %v9141_v29, %v9140_v17  ;;  %v9143_v50 = vld [vmem:[#allocation39_spill] sm:$0xff] }
 0x8d9   : > { %3635 = vperm.xlu0 %4282, %v3622_v62   ;;  %3743 = vrot.lane.b32.xlu1 %v3520_v2, %s4332_s16  ;;  %v940_v62 = vadd.f32 %v9142_v43, %v9137_v32 }
 0x8da   : > { %3928 = vmatpush1.msra.mxu1 %v3839_v19  ;;  %v945_v19 = vadd.f32 %v9143_v50, %v9140_v17 }
 0x8db   : > { %v8098_v48 = vpop.permute.xlu1 %3703  ;;  %v8115_v28 = vpop.permute.xlu0 %3685 }
 0x8dd   : > { %4021 = vrot.lane.b32.xlu0 %v813_v54, %s4333_s21  ;;  %3630 = vperm.xlu1 %4283, %v3621_v9   ;;  %v9144_v9 = vld [vmem:[#allocation41_spill] sm:$0xff]  ;;  %v9146_v54 = vld [vmem:[#allocation44_spill] sm:$0xff] }
 0x8de   : > { %v831_v14 = vadd.f32 %v9144_v9, %v9140_v17  ;;  %v837_v57 = vadd.f32 %v9146_v54, %v9145_v58 }
 0x8df   : > { %v8107_v40 = vpop.permute.xlu1 %3701  ;;  %v8130_v49 = vpop.permute.xlu0 %3683 }
 0x8e0   : > { %v3827_v63 = vsel %vm1714_vm2, %v8107_v40, %v8098_v48 }
 0x8e1   : > { %4025 = vrot.lane.b32.xlu0 %v817_v25, %s4333_s21  ;;  %4019 = vrot.lane.b32.xlu1 %v811_v18, %s4333_s21 }
 0x8e3   : > { %v3794_v20 = vpop.permute.xlu1 %3793 }
 0x8e4   : > { %v8119_v15 = vsel %vm1714_vm2, %v3794_v20, %v8012_v45  ;;  %v9139_v45 = vld [vmem:[#allocation37_spill] sm:$0xff] }
 0x8e5   : > { %4029 = vrot.lane.b32.xlu0 %v935_v59, %s4333_s21  ;;  %4023 = vrot.lane.b32.xlu1 %v930_v33, %s4333_s21  ;;  %v823_v44 = vadd.f32 %v9139_v45, %v9137_v32  ;;  %v9148_v33 = vld [vmem:[#allocation42_spill] sm:$0xff] }
 0x8e6   : > { %v950_v27 = vadd.f32 %v9148_v33, %v9145_v58 }
 0x8e7   : > { %v3792_v42 = vpop.permute.xlu1 %3791  ;;  %v8138_v6 = vpop.permute.xlu0 %3673 }
 0x8e8   : > { %v8128_v37 = vsel %vm1714_vm2, %v3792_v42, %v3794_v20 }
 0x8e9   : > { %4033 = vrot.lane.b32.xlu0 %v825_v16, %s4333_s21  ;;  %4027 = vrot.lane.b32.xlu1 %v819_v13, %s4333_s21 }
 0x8eb   : > { %v3728_v2 = vpop.permute.xlu1 %3727  ;;  %v8152_v18 = vpop.permute.xlu0 %3671 }
 0x8ec   : > { %v3836_v29 = vsel %vm1714_vm2, %v3728_v2, %v8024_v34 }
 0x8ed   : > { %4062 = vrot.lane.b32.xlu0 %v829_v61, %s4333_s21  ;;  %4031 = vrot.lane.b32.xlu1 %v823_v44, %s4333_s21 }
 0x8ef   : > { %v3726_v25 = vpop.permute.xlu1 %3725 }
 0x8f0   : > { %v3835_v61 = vsel %vm1714_vm2, %v3726_v25, %v3728_v2 }
 0x8f1   : > { %4066 = vrot.lane.b32.xlu0 %v945_v19, %s4333_s21  ;;  %4035 = vrot.lane.b32.xlu1 %v940_v62, %s4333_s21  ;;  %v3833_v62 = vsel %vm1714_vm2, %v8100_v11, %v8086_v24 }
 0x8f3   : > { %v8161_v20 = vpop.permute.xlu1 %3781 }
 0x8f5   : > { %4070 = vrot.lane.b32.xlu0 %v837_v57, %s4333_s21  ;;  %4064 = vrot.lane.b32.xlu1 %v831_v14, %s4333_s21 }
 0x8f7   : > { %v3710_v8 = vpop.permute.xlu0 %3709  ;;  %v3692_v13 = vpop.permute.xlu1 %3691 }
 0x8f9   : > { %4068 = vrot.lane.b32.xlu1 %v835_v36, %s4333_s21 }
 0x8fb   : > { %v3708_v59 = vpop.permute.xlu0 %3707  ;;  %v3690_v42 = vpop.permute.xlu1 %3689 }
 0x8fc   : > { %v3823_v33 = vsel %vm1714_vm2, %v3690_v42, %v3692_v13 }
 0x8fd   : > { %4072 = vrot.lane.b32.xlu1 %v950_v27, %s4333_s21 }
 0x8ff   : > { %v8164_v53 = vpop.permute.xlu0 %3799 }
 0x903   : > { %v8166_v32 = vpop.permute.xlu0 %3797 }
 0x907   : > { %v3734_v4 = vpop.permute.xlu0 %3733 }
 0x908   : > { %v3838_v16 = vsel %vm1714_vm2, %v3734_v4, %v8022_v3  ;;  %v3834_v3 = vsel %vm1714_vm2, %v8086_v24, %v7970_v35  ;;  %v3830_v35 = vsel %vm1714_vm2, %v3710_v8, %v8000_v51  ;;  %v3829_v24 = vsel %vm1714_vm2, %v3708_v59, %v3710_v8 }
 0x909   : > { %3929 = vmatprep.subr.mxu1 %v3838_v16 }
 0x90b   : > { %v3732_v45 = vpop.permute.xlu0 %3731  ;;  %v3680_v17 = vpop.permute.xlu1 %3679 }
 0x90c   : > { %v3837_v44 = vsel %vm1714_vm2, %v3732_v45, %v3734_v4 }
 0x90d   : > { %3930 = vmatpush1.msra.mxu1 %v3837_v44 }
 0x90e   : > { %3931 = vmatprep.subr.mxu1 %v3836_v29 }
 0x90f   : > { %3932 = vmatpush1.msra.mxu1 %v3835_v61  ;;  %v8174_v43 = vpop.permute.xlu0 %3787  ;;  %v3678_v50 = vpop.permute.xlu1 %3677 }
 0x910   : > { %3933 = vmatprep.subr.mxu1 %v3834_v3  ;;  %v3819_v59 = vsel %vm1714_vm2, %v3678_v50, %v3680_v17 }
 0x911   : > { %3934 = vmatpush1.msra.mxu1 %v3833_v62 }
 0x913   : > { %v8182_v19 = vpop.permute.xlu0 %3785 }
 0x914   : > { %v3855_v16 = vsel %vm1714_vm2, %v8182_v19, %v8174_v43 }
 0x917   : > { %v3716_v34 = vpop.permute.xlu1 %3715  ;;  %v3698_v9 = vpop.permute.xlu0 %3697 }
 0x918   : > { %v3832_v2 = vsel %vm1714_vm2, %v3716_v34, %v8051_v0  ;;  %v3828_v0 = vsel %vm1714_vm2, %v8098_v48, %v8002_v41  ;;  %v3826_v51 = vsel %vm1714_vm2, %v3698_v9, %v8042_v46  ;;  %v3824_v41 = vsel %vm1714_vm2, %v3692_v13, %v8035_v39 }
 0x919   : > { %3935 = vmatprep.subr.mxu1 %v3832_v2  ;;  %v3822_v48 = vsel %vm1714_vm2, %v8115_v28, %v7984_v52  ;;  %v3821_v46 = vsel %vm1714_vm2, %v8130_v49, %v8115_v28  ;;  %v3820_v39 = vsel %vm1714_vm2, %v3680_v17, %v8044_v22  ;;  %v3818_v52 = vsel %vm1714_vm2, %v8138_v6, %v7992_v26  ;;  %v3614_v2 = vld [vmem:[%s8338_s8] sm:$0xff] }
 0x91a   : > { %v3817_v28 = vsel %vm1714_vm2, %v8152_v18, %v8138_v6  ;;  %v3814_v22 = vsel %vm1714_vm2, %v7972_v7, %v7824_v30  ;;  %v3812_v6 = vsel %vm1714_vm2, %v7937_v55, %v7784_v23  ;;  %v3809_v30 = vsel %vm1714_vm2, %v7850_v38, %v7887_v1 }
 0x91b   : > { %v3714_v14 = vpop.permute.xlu1 %3713  ;;  %v3696_v58 = vpop.permute.xlu0 %3695  ;;  %v3859_v38 = vsel %vm1714_vm2, %v8166_v32, %v8164_v53 }
 0x91c   : > { %v3831_v54 = vsel %vm1714_vm2, %v3714_v14, %v3716_v34  ;;  %v3825_v36 = vsel %vm1714_vm2, %v3696_v58, %v3698_v9  ;;  %v3617_v58 = vld [vmem:[%s8338_s8 + $0x18] sm:$0xff] }
 0x91d   : > { %3936 = vmatpush1.msra.mxu1 %v3831_v54  ;;  %v3616_v54 = vld [vmem:[%s8338_s8 + $0x10] sm:$0xff] }
 0x91e   : > { %3937 = vmatprep.subr.mxu1 %v3830_v35 }
 0x91f   : > { %v8190_v11 = vpop.permute.xlu1 %3779  ;;  %3938 = vmatpush1.msra.mxu1 %v3829_v24  ;;  %v8192_v57 = vpop.permute.xlu0 %3783  ;;  %v3619_v24 = vld [vmem:[%s8338_s8 + $0x28] sm:$0xff] }
 0x920   : > { %3939 = vmatprep.subr.mxu1 %v3828_v0 }
 0x921   : > { %3940 = vmatpush1.msra.mxu1 %v3827_v63 }
 0x922   : > { %3941 = vmatprep.subr.mxu1 %v3826_v51 }
 0x923   : > { %v8203_v25 = vpop.permute.xlu1 %3777  ;;  %3942 = vmatpush1.msra.mxu1 %v3825_v36  ;;  %v8205_v8 = vpop.permute.xlu0 %3775 }
 0x924   : > { %3943 = vmatprep.subr.mxu1 %v3824_v41 }
 0x925   : > { %3944 = vmatpush1.msra.mxu1 %v3823_v33 }
 0x926   : > { %3945 = vmatprep.subr.mxu1 %v3822_v48 }
 0x927   : > { %v8216_v40 = vpop.permute.xlu1 %3765  ;;  %3946 = vmatpush1.msra.mxu1 %v3821_v46  ;;  %v3774_v27 = vpop.permute.xlu0 %3773 }
 0x928   : > { %3947 = vmatprep.subr.mxu1 %v3820_v39 }
 0x929   : > { %3948 = vmatpush1.msra.mxu1 %v3819_v59 }
 0x92a   : > { %3949 = vmatprep.subr.mxu1 %v3818_v52 }
 0x92b   : > { %v3758_v49 = vpop.permute.xlu1 %3757  ;;  %3950 = vmatpush1.msra.mxu1 %v3817_v28  ;;  %v3772_v13 = vpop.permute.xlu0 %3771 }
 0x92c   : > { %3951 = vmatprep.subr.mxu1 %v8057_v31  ;;  %v3811_v31 = vsel %vm1714_vm2, %v7903_v56, %v7937_v55 }
 0x92d   : > { %3952 = vmatpush1.msra.mxu1 %v8068_v21  ;;  %v3810_v21 = vsel %vm1714_vm2, %v7887_v1, %v7756_v60  ;;  %v3860_v60 = vsel %vm1714_vm2, %v8164_v53, %v8010_v12  ;;  %v3854_v53 = vsel %vm1714_vm2, %v8161_v20, %v8192_v57 }
 0x92e   : > { %3953 = vmatprep.subr.mxu1 %v3814_v22 }
 0x92f   : > { %v3756_v4 = vpop.permute.xlu1 %3755  ;;  %3954 = vmatpush1.msra.mxu1 %v7976_v47  ;;  %v3764_v26 = vpop.permute.xlu0 %3763 }
 0x930   : > { %3955 = vmatprep.subr.mxu1 %v3812_v6  ;;  %v3845_v3 = vsel %vm1714_vm2, %v3756_v4, %v3758_v49 }
 0x931   : > { %3956 = vmatpush1.msra.mxu1 %v3811_v31 }
 0x932   : > { %3957 = vmatprep.subr.mxu1 %v3810_v21 }
 0x933   : > { %v3806_v7 = vpop.permute.xlu1 %3805  ;;  %3958 = vmatpush1.msra.mxu1 %v3809_v30  ;;  %v3762_v47 = vpop.permute.xlu0 %3761 }
 0x934   : > { %v3862_v23 = vsel %vm1714_vm2, %v3806_v7, %v8070_v5  ;;  %v3856_v5 = vsel %vm1714_vm2, %v8174_v43, %v8033_v10  ;;  %v3852_v10 = vsel %vm1714_vm2, %v8205_v8, %v8203_v25  ;;  %v3847_v29 = vsel %vm1714_vm2, %v3762_v47, %v3764_v26 }
 0x935   : > { %3969 = vmatprep.subr.mxu1 %v3862_v23 }
 0x937   : > { %v3804_v18 = vpop.permute.xlu1 %3803  ;;  %v3760_v55 = vpop.permute.xlu0 %3759 }
 0x938   : > { %v3861_v56 = vsel %vm1714_vm2, %v3804_v18, %v3806_v7  ;;  %v3846_v43 = vsel %vm1714_vm2, %v3758_v49, %v3760_v55 }
 0x939   : > { %3970 = vmatpush2.msra.mxu1 %v3861_v56 }
 0x93a   : > { %3971 = vmatprep.subr.mxu1 %v3860_v60 }
 0x93b   : > { %v3754_v1 = vpop.permute.xlu1 %3753  ;;  %3972 = vmatpush2.msra.mxu1 %v3859_v38  ;;  %v3752_v12 = vpop.permute.xlu0 %3751 }
 0x93c   : > { %3973 = vmatprep.subr.mxu1 %v8119_v15  ;;  %v3853_v15 = vsel %vm1714_vm2, %v8190_v11, %v8161_v20  ;;  %v3848_v20 = vsel %vm1714_vm2, %v3764_v26, %v8216_v40  ;;  %v3844_v62 = vsel %vm1714_vm2, %v3752_v12, %v3754_v1  ;;  %v3618_v11 = vld [vmem:[%s8338_s8 + $0x20] sm:$0xff] }
 0x93d   : > { %3974 = vmatpush2.msra.mxu1 %v8128_v37  ;;  %v3851_v37 = vsel %vm1714_vm2, %v3774_v27, %v8205_v8 }
 0x93e   : > { %3975 = vmatprep.subr.mxu1 %v3856_v5 }
 0x93f   : > { %v3770_v42 = vpop.permute.xlu1 %3769  ;;  %3976 = vmatpush2.msra.mxu1 %v3855_v16  ;;  %v3750_v44 = vpop.permute.xlu0 %3749 }
 0x940   : > { %3977 = vmatprep.subr.mxu1 %v3854_v53  ;;  %v3850_v45 = vsel %vm1714_vm2, %v3770_v42, %v3772_v13  ;;  %v3843_v50 = vsel %vm1714_vm2, %v3750_v44, %v3752_v12 }
 0x941   : > { %3978 = vmatpush2.msra.mxu1 %v3853_v15 }
 0x942   : > { %3979 = vmatprep.subr.mxu1 %v3852_v10 }
 0x943   : > { %v3768_v32 = vpop.permute.xlu1 %3767  ;;  %3980 = vmatpush2.msra.mxu1 %v3851_v37  ;;  %v3748_v19 = vpop.permute.xlu0 %3747 }
 0x944   : > { %v3849_v17 = vsel %vm1714_vm2, %v3768_v32, %v3770_v42  ;;  %3981 = vmatprep.subr.mxu1 %v3850_v45 }
 0x945   : > { %3982 = vmatpush2.msra.mxu1 %v3849_v17 }
 0x946   : > { %3983 = vmatprep.subr.mxu1 %v3848_v20 }
 0x947   : > { %v3746_v61 = vpop.permute.xlu1 %3745  ;;  %3984 = vmatpush2.msra.mxu1 %v3847_v29 }
 0x948   : > { %3985 = vmatprep.subr.mxu1 %v3846_v43  ;;  %v3842_v9 = vsel %vm1714_vm2, %v3746_v61, %v3748_v19 }
 0x949   : > { %3986 = vmatpush2.msra.mxu1 %v3845_v3 }
 0x94a   : > { %3987 = vmatprep.subr.mxu1 %v3844_v62 }
 0x94b   : > { %v3744_v34 = vpop.permute.xlu1 %3743  ;;  %3988 = vmatpush2.msra.mxu1 %v3843_v50 }
 0x94c   : > { %v3841_v14 = vsel %vm1714_vm2, %v3744_v34, %v3746_v61  ;;  %3989 = vmatprep.subr.mxu1 %v3842_v9 }
 0x94d   : > { %3990 = vmatpush2.msra.mxu1 %v3841_v14 }
 0x94e   : > { %3992 = vmatmul.mubr.f32.vlgmr.msra.gmra.mxu1 %v3614_v2 }
 0x94f   : > { %4189 = vmatprep.mubr.msk.f32.mxu1 %vm3917_vm10, %v3617_v58 }
 0x950   : > { %v3626_v35 = vpop.permute.xlu0 %3625 }
 0x952   : > { %3998 = vmatmul.mubr.f32.gmra.mxu1 %v3616_v54 }
 0x953   : > { %4190 = vmatprep.mubr.msk.f32.mxu1 %vm3917_vm10, %v3619_v24 }
 0x954   : > { %v3636_v57 = vpop.permute.xlu0 %3635 }
 0x956   : > { %4004 = vmatmul.mubr.f32.gmra.mxu1 %v3618_v11 }
 0x958   : > { %v3631_v0 = vpop.permute.xlu1 %3630  ;;  %v4022_v63 = vpop.permute.xlu0 %4021 }
 0x95c   : > { %v4020_v51 = vpop.permute.xlu1 %4019  ;;  %v4026_v36 = vpop.permute.xlu0 %4025 }
 0x95d   : > { %v4038_v25 = vsel %vm4037_vm11, %v4020_v51, %v4022_v63 }
 0x95e   : > { %4050 = vst [vmem:[%s7585_s19] sm:$0xff] %v4038_v25 }
 0x960   : > { %v4024_v8 = vpop.permute.xlu1 %4023  ;;  %v4030_v41 = vpop.permute.xlu0 %4029 }
 0x961   : > { %v4039_v33 = vsel %vm4037_vm11, %v4022_v63, %v4024_v8 }
 0x962   : > { %4051 = vst [vmem:[%s7585_s19 + $0x8] sm:$0xff] %v4039_v33 }
 0x964   : > { %v4028_v48 = vpop.permute.xlu1 %4027  ;;  %v4034_v46 = vpop.permute.xlu0 %4033 }
 0x965   : > { %v4040_v40 = vsel %vm4037_vm11, %v4026_v36, %v4028_v48  ;;  %v4041_v27 = vsel %vm4037_vm11, %v4028_v48, %v4030_v41 }
 0x966   : > { %4052 = vst [vmem:[%s7585_s19 + $0x10] sm:$0xff] %v4040_v40  ;;  %4053 = vst [vmem:[%s7585_s19 + $0x18] sm:$0xff] %v4041_v27 }
 0x968   : > { %v4032_v39 = vpop.permute.xlu1 %4031  ;;  %v4063_v59 = vpop.permute.xlu0 %4062 }
 0x969   : > { %v4042_v52 = vsel %vm4037_vm11, %v4032_v39, %v4034_v46 }
 0x96a   : > { %4054 = vst [vmem:[%s7585_s19 + $0x20] sm:$0xff] %v4042_v52 }
 0x96c   : > { %v4036_v28 = vpop.permute.xlu1 %4035  ;;  %v4067_v13 = vpop.permute.xlu0 %4066 }
 0x96d   : > { %v4043_v49 = vsel %vm4037_vm11, %v4034_v46, %v4036_v28 }
 0x96e   : > { %4055 = vst [vmem:[%s7585_s19 + $0x28] sm:$0xff] %v4043_v49 }
 0x970   : > { %v4065_v22 = vpop.permute.xlu1 %4064  ;;  %v4071_v6 = vpop.permute.xlu0 %4070 }
 0x971   : > { %v4074_v4 = vsel %vm4037_vm11, %v4063_v59, %v4065_v22  ;;  %v4075_v26 = vsel %vm4037_vm11, %v4065_v22, %v4067_v13 }
 0x972   : > { %4082 = vst [vmem:[%s7585_s19 + $0x30] sm:$0xff] %v4074_v4  ;;  %4083 = vst [vmem:[%s7585_s19 + $0x38] sm:$0xff] %v4075_v26 }
 0x974   : > { %v4069_v31 = vpop.permute.xlu1 %4068 }
 0x975   : > { %v4076_v21 = vsel %vm4037_vm11, %v4069_v31, %v4071_v6 }
 0x976   : > { %4084 = vst [vmem:[%s7585_s19 + $0x40] sm:$0xff] %v4076_v21 }
 0x978   : > { %v4073_v30 = vpop.permute.xlu1 %4072 }
 0x979   : > { %v4077_v7 = vsel %vm4037_vm11, %v4071_v6, %v4073_v30 }
 0x97a   : > { %4085 = vst [vmem:[%s7585_s19 + $0x48] sm:$0xff] %v4077_v7 }
 0xa0e   : > { %v3993_v47 = vpop.f32.mrf.mxu1 }
 0xa0f   : > { %v3994_v23 = vadd.f32 %v3993_v47, %v3626_v35 }
 0xa10   : > { %v3995_v18 = vpop.f32.mrf.mxu1 }
 0xa11   : > { %4092 = vst [vmem:[%s7585_s19 + $0x80] sm:$0xff] %v3994_v23  ;;  %v3996_v56 = vadd.f32 %v3995_v18, %v3626_v35 }
 0xa12   : > { %v3999_v55 = vpop.f32.mrf.mxu1 }
 0xa13   : > { %4093 = vst [vmem:[%s7585_s19 + $0x88] sm:$0xff] %v3996_v56  ;;  %v4000_v60 = vadd.f32 %v3999_v55, %v3631_v0 }
 0xa14   : > { %v4001_v38 = vpop.f32.mrf.mxu1 }
 0xa15   : > { %4094 = vst [vmem:[%s7585_s19 + $0x90] sm:$0xff] %v4000_v60  ;;  %v4002_v1 = vadd.f32 %v4001_v38, %v3631_v0 }
 0xa16   : > { %v4005_v5 = vpop.f32.mrf.mxu1 }
 0xa17   : > { %4095 = vst [vmem:[%s7585_s19 + $0x98] sm:$0xff] %v4002_v1  ;;  %v4006_v16 = vadd.f32 %v4005_v5, %v3636_v57 }
 0xa18   : > { %v4007_v12 = vpop.f32.mrf.mxu1 }
 0xa19   : > { %4096 = vst [vmem:[%s7585_s19 + $0xa0] sm:$0xff] %v4006_v16  ;;  %v4008_v42 = vadd.f32 %v4007_v12, %v3636_v57 }
 0xa1b   : > { %4097 = vst [vmem:[%s7585_s19 + $0xa8] sm:$0xff] %v4008_v42 }
 0xa1c PF: > { %s20_s13 = sadd.s32 1, %s4292_s13  }
 0xa1d   : > { %p17_p4 = scmp.ge.s32.totalorder %s20_s13, 4  }
 0xa1f   :  { %19 = sbr.rel (!%p17_p4) target bundleno = 1 (0x1), region = 90 }

</bundles_post_ra>
